<compile_context>
chip_gen: v5e
topology: v5e:2x2
jax: 0.10.0
libtpu: 0.0.40
codegen_flags: <defaults>
</compile_context>

<pallas_src>
import jax
import jax.numpy as jnp
import numpy as np
from jax import lax
from jax.experimental import pallas as pl
from jax.experimental.pallas import tpu as pltpu

H = 16            # GRU input/hidden size, also output size of linear2
T = 28            # sequence length implied by Linear(448, 64): 448 / 16
D1 = 64           # linear1 / posEnc output size


def actor_kernel(state_ref,            # (T, B, 16)  time-major GRU input
                 pos_ref,              # (B, 16)
                 wih_ref, whh_ref,     # (16, 48), (16, 48)   GRU weights^T
                 bih_ref, bhh_ref,     # (1, 48), (1, 48)     GRU biases
                 w1_ref, b1_ref,       # (T, 16, 64), (1, 64) linear1 (fused)
                 wp_ref, bp_ref,       # (16, 64), (1, 64)    posEnc
                 w2_ref, b2_ref,       # (64, 16), (1, 16)    linear2
                 out1_ref,             # (T, 16)
                 out2_ref,             # (B, 16)
                 hs_scr):              # (T, B, 16) VMEM scratch: relu(h_t)
    t_steps, batch, hid = state_ref.shape

    wih = wih_ref[...]
    whh = whh_ref[...]
    # Hoist bias broadcasts out of the loop (JAX does not CSE broadcast_in_dim).
    bih_b = jnp.broadcast_to(bih_ref[...], (batch, 3 * hid))
    bhh_b = jnp.broadcast_to(bhh_ref[...], (batch, 3 * hid))

    # --- Hoisted input projection: independent of the recurrence, pipelines
    # freely on the MXU while the serial chain below waits on EUP/VPU.
    gis = [
        jnp.dot(state_ref[t], wih, preferred_element_type=jnp.float32) + bih_b
        for t in range(t_steps)
    ]

    # --- Serial GRU recurrence, fully unrolled; h carried in vregs.
    h = jnp.zeros((batch, hid), jnp.float32)
    for t in range(t_steps):
        gi = gis[t]
        gh = jnp.dot(h, whh, preferred_element_type=jnp.float32) + bhh_b
        # PyTorch GRU gate order: r, z, n
        r = jax.nn.sigmoid(gi[:, 0:hid] + gh[:, 0:hid])
        z = jax.nn.sigmoid(gi[:, hid:2 * hid] + gh[:, hid:2 * hid])
        n = jnp.tanh(gi[:, 2 * hid:3 * hid] + r * gh[:, 2 * hid:3 * hid])
        h = (1.0 - z) * n + z * h

        # Side outputs: cheap static stores, NOT on the recurrence critical path.
        hs_scr[t] = jnp.maximum(h, 0.0)                   # relu(code1[:, t, :])
        out1_ref[pl.ds(t, 1), :] = h[batch - 1:batch, :]  # raw last-batch row

    # out1 = sigmoid(code1[-1]): one batched sigmoid + one full-tile store.
    out1_ref[...] = jax.nn.sigmoid(out1_ref[...])

    # --- linear1 over the flattened relu(code1), decoupled from the recurrence:
    # code3_pre = b1 + sum_t relu(h_t) @ W1^T[t*16:(t+1)*16, :]
    # 28 independent matmuls back-to-back at MXU cadence.
    acc = jnp.broadcast_to(b1_ref[...], (batch, w1_ref.shape[2]))
    for t in range(t_steps):
        acc = acc + jnp.dot(hs_scr[t], w1_ref[t],
                            preferred_element_type=jnp.float32)
    code3 = jnp.maximum(acc, 0.0)                                            # (B, 64)

    poscode = jnp.maximum(
        jnp.dot(pos_ref[...], wp_ref[...],
                preferred_element_type=jnp.float32) + bp_ref[...], 0.0)      # (B, 64)
    code4 = jnp.maximum(
        jnp.dot(code3 + poscode, w2_ref[...],
                preferred_element_type=jnp.float32) + b2_ref[...], 0.0)      # (B, 16)
    out2_ref[...] = jnp.tanh(code4)


def prepare_params(params):
    """One-time weight re-layout (right-multiply form). Do NOT call per step."""
    wih, whh, bih, bhh, w1, b1, wp, bp, w2, b2 = params
    return (jnp.transpose(wih), jnp.transpose(whh), bih[None], bhh[None],
            jnp.transpose(w1).reshape(T, H, D1), b1[None],
            jnp.transpose(wp), bp[None],
            jnp.transpose(w2), b2[None])


@jax.jit
def actor_forward(x_btd, adj, pos, prep_params):
    """x_btd: (B, T, 16) NTC like PyTorch batch_first GRU. adj is unused."""
    del adj  # unused by Actor.forward (kept for interface fidelity)
    B, Tn, Hn = x_btd.shape
    assert (Tn, Hn) == (T, H)

    state_tbh = jnp.transpose(x_btd, (1, 0, 2))          # (T, B, 16)
    inputs = (state_tbh, pos) + tuple(prep_params)

    # TODO(synk): if this Actor is evaluated over many independent batches,
    # add a parallel grid axis over batch to use both v7x TensorCores.
    out1, out2 = pl.pallas_call(
        actor_kernel,
        out_shape=(jax.ShapeDtypeStruct((T, H), jnp.float32),
                   jax.ShapeDtypeStruct((B, H), jnp.float32)),
        in_specs=[pl.BlockSpec(memory_space=pltpu.MemorySpace.VMEM)] * len(inputs),
        out_specs=(pl.BlockSpec(memory_space=pltpu.MemorySpace.VMEM),
                   pl.BlockSpec(memory_space=pltpu.MemorySpace.VMEM)),
        scratch_shapes=[pltpu.VMEM((T, B, H), jnp.float32)],
    )(*inputs)
    return out1, out2


def actor_reference(x_btd, pos, params):
    """Pure-JAX reference matching the PyTorch forward."""
    wih, whh, bih, bhh, w1, b1, wp, bp, w2, b2 = params
    B, Tn, Hn = x_btd.shape
    h0 = jnp.zeros((B, Hn), jnp.float32)

    def step(h, x_t):
        gi = x_t @ wih.T + bih
        gh = h @ whh.T + bhh
        r = jax.nn.sigmoid(gi[:, :Hn] + gh[:, :Hn])
        z = jax.nn.sigmoid(gi[:, Hn:2 * Hn] + gh[:, Hn:2 * Hn])
        n = jnp.tanh(gi[:, 2 * Hn:] + r * gh[:, 2 * Hn:])
        h_new = (1.0 - z) * n + z * h
        return h_new, h_new

    _, hs = lax.scan(step, h0, jnp.transpose(x_btd, (1, 0, 2)))
    code1 = jnp.transpose(hs, (1, 0, 2))                     # (B, T, 16)
    out1 = jax.nn.sigmoid(code1[-1])                         # (T, 16)
    code2 = jnp.maximum(code1, 0.0).reshape(B, -1)           # (B, 448)
    code3 = jnp.maximum(code2 @ w1.T + b1, 0.0)
    poscode = jnp.maximum(pos @ wp.T + bp, 0.0)
    code4 = jnp.maximum((code3 + poscode) @ w2.T + b2, 0.0)
    out2 = jnp.tanh(code4)
    return out1, out2


def init_params(key):
    """Deterministic init mimicking PyTorch default uniform(-1/sqrt(fan), +)."""
    ks = jax.random.split(key, 10)

    def u(k, shape, lim):
        return jax.random.uniform(k, shape, jnp.float32, -lim, lim)

    lim_gru = 1.0 / np.sqrt(H)
    wih = u(ks[0], (3 * H, H), lim_gru)      # weight_ih_l0
    whh = u(ks[1], (3 * H, H), lim_gru)      # weight_hh_l0
    bih = u(ks[2], (3 * H,), lim_gru)
    bhh = u(ks[3], (3 * H,), lim_gru)

    lim1 = 1.0 / np.sqrt(T * H)              # linear1: in_features = 448
    w1 = u(ks[4], (D1, T * H), lim1)
    b1 = u(ks[5], (D1,), lim1)

    limp = 1.0 / np.sqrt(H)                  # posEnc: in_features = 16
    wp = u(ks[6], (D1, H), limp)
    bp = u(ks[7], (D1,), limp)

    lim2 = 1.0 / np.sqrt(D1)                 # linear2: in_features = 64
    w2 = u(ks[8], (H, D1), lim2)
    b2 = u(ks[9], (H,), lim2)
    return (wih, whh, bih, bhh, w1, b1, wp, bp, w2, b2)


if __name__ == "__main__":
    B = 2
    key = jax.random.PRNGKey(0)
    kx, kadj, kpos, kparam = jax.random.split(key, 4)

    x = jax.random.normal(kx, (B, T, H), jnp.float32)        # state[0]
    adj = jax.random.normal(kadj, (B, H, H), jnp.float32)    # state[1] (unused)
    pos = jax.random.normal(kpos, (B, H), jnp.float32)       # state[2]
    params = init_params(kparam)
    prep = prepare_params(params)                            # one-time re-layout

    out1, out2 = actor_forward(x, adj, pos, prep)
    out1, out2 = jax.block_until_ready((out1, out2))

    ref1, ref2 = actor_reference(x, pos, params)
    ref1, ref2 = jax.block_until_ready((ref1, ref2))

    assert out1.shape == (T, H) and out2.shape == (B, H)
    assert np.allclose(np.asarray(out1), np.asarray(ref1), atol=5e-2, rtol=5e-2)
    assert np.allclose(np.asarray(out2), np.asarray(ref2), atol=5e-2, rtol=5e-2)
    print("KERNEL_OK")
</pallas_src>

<mosaic_0001>
module attributes {stable_mosaic.version = 11 : i64} {
  func.func @actor_kernel(%arg0: memref<28x2x16xf32, #tpu.memory_space<vmem>>, %arg1: memref<2x16xf32, #tpu.memory_space<vmem>>, %arg2: memref<16x48xf32, #tpu.memory_space<vmem>>, %arg3: memref<16x48xf32, #tpu.memory_space<vmem>>, %arg4: memref<1x48xf32, #tpu.memory_space<vmem>>, %arg5: memref<1x48xf32, #tpu.memory_space<vmem>>, %arg6: memref<28x16x64xf32, #tpu.memory_space<vmem>>, %arg7: memref<1x64xf32, #tpu.memory_space<vmem>>, %arg8: memref<16x64xf32, #tpu.memory_space<vmem>>, %arg9: memref<1x64xf32, #tpu.memory_space<vmem>>, %arg10: memref<64x16xf32, #tpu.memory_space<vmem>>, %arg11: memref<1x16xf32, #tpu.memory_space<vmem>>, %arg12: memref<28x16xf32, #tpu.memory_space<vmem>>, %arg13: memref<2x16xf32, #tpu.memory_space<vmem>>, %arg14: memref<28x2x16xf32, #tpu.memory_space<vmem>>) attributes {dimension_semantics = [], scalar_prefetch = 0 : i64, scratch_operands = 1 : i64, tpu.core_type = #tpu.core_type<tc>} {
    %c0 = arith.constant 0 : index
    %c0_0 = arith.constant 0 : index
    %0 = vector.load %arg2[%c0, %c0_0] : memref<16x48xf32, #tpu.memory_space<vmem>>, vector<16x48xf32>
    %c0_1 = arith.constant 0 : index
    %c0_2 = arith.constant 0 : index
    %1 = vector.load %arg3[%c0_1, %c0_2] : memref<16x48xf32, #tpu.memory_space<vmem>>, vector<16x48xf32>
    %c0_3 = arith.constant 0 : index
    %c0_4 = arith.constant 0 : index
    %2 = vector.load %arg4[%c0_3, %c0_4] : memref<1x48xf32, #tpu.memory_space<vmem>>, vector<1x48xf32>
    %3 = vector.shape_cast %2 : vector<1x48xf32> to vector<1x48xf32>
    %4 = vector.broadcast %3 : vector<1x48xf32> to vector<2x48xf32>
    %c0_5 = arith.constant 0 : index
    %c0_6 = arith.constant 0 : index
    %5 = vector.load %arg5[%c0_5, %c0_6] : memref<1x48xf32, #tpu.memory_space<vmem>>, vector<1x48xf32>
    %6 = vector.shape_cast %5 : vector<1x48xf32> to vector<1x48xf32>
    %7 = vector.broadcast %6 : vector<1x48xf32> to vector<2x48xf32>
    %c0_7 = arith.constant 0 : index
    %c0_8 = arith.constant 0 : index
    %c0_9 = arith.constant 0 : index
    %8 = vector.load %arg0[%c0_7, %c0_8, %c0_9] : memref<28x2x16xf32, #tpu.memory_space<vmem>>, vector<1x2x16xf32>
    %9 = vector.shape_cast %8 : vector<1x2x16xf32> to vector<2x16xf32>
    %cst = arith.constant dense<0.000000e+00> : vector<2x48xf32>
    %10 = tpu.matmul %9, %0, %cst {dimension_numbers = #tpu.dot_dimension_numbers<[1], [0], [0], [1], [0, 0, 1, 1], [], []>} : vector<2x16xf32>, vector<16x48xf32>, vector<2x48xf32> -> vector<2x48xf32>
    %11 = arith.addf %10, %4 : vector<2x48xf32>
    %c1 = arith.constant 1 : index
    %c0_10 = arith.constant 0 : index
    %c0_11 = arith.constant 0 : index
    %12 = vector.load %arg0[%c1, %c0_10, %c0_11] : memref<28x2x16xf32, #tpu.memory_space<vmem>>, vector<1x2x16xf32>
    %13 = vector.shape_cast %12 : vector<1x2x16xf32> to vector<2x16xf32>
    %cst_12 = arith.constant dense<0.000000e+00> : vector<2x48xf32>
    %14 = tpu.matmul %13, %0, %cst_12 {dimension_numbers = #tpu.dot_dimension_numbers<[1], [0], [0], [1], [0, 0, 1, 1], [], []>} : vector<2x16xf32>, vector<16x48xf32>, vector<2x48xf32> -> vector<2x48xf32>
    %15 = arith.addf %14, %4 : vector<2x48xf32>
    %c2 = arith.constant 2 : index
    %c0_13 = arith.constant 0 : index
    %c0_14 = arith.constant 0 : index
    %16 = vector.load %arg0[%c2, %c0_13, %c0_14] : memref<28x2x16xf32, #tpu.memory_space<vmem>>, vector<1x2x16xf32>
    %17 = vector.shape_cast %16 : vector<1x2x16xf32> to vector<2x16xf32>
    %cst_15 = arith.constant dense<0.000000e+00> : vector<2x48xf32>
    %18 = tpu.matmul %17, %0, %cst_15 {dimension_numbers = #tpu.dot_dimension_numbers<[1], [0], [0], [1], [0, 0, 1, 1], [], []>} : vector<2x16xf32>, vector<16x48xf32>, vector<2x48xf32> -> vector<2x48xf32>
    %19 = arith.addf %18, %4 : vector<2x48xf32>
    %c3 = arith.constant 3 : index
    %c0_16 = arith.constant 0 : index
    %c0_17 = arith.constant 0 : index
    %20 = vector.load %arg0[%c3, %c0_16, %c0_17] : memref<28x2x16xf32, #tpu.memory_space<vmem>>, vector<1x2x16xf32>
    %21 = vector.shape_cast %20 : vector<1x2x16xf32> to vector<2x16xf32>
    %cst_18 = arith.constant dense<0.000000e+00> : vector<2x48xf32>
    %22 = tpu.matmul %21, %0, %cst_18 {dimension_numbers = #tpu.dot_dimension_numbers<[1], [0], [0], [1], [0, 0, 1, 1], [], []>} : vector<2x16xf32>, vector<16x48xf32>, vector<2x48xf32> -> vector<2x48xf32>
    %23 = arith.addf %22, %4 : vector<2x48xf32>
    %c4 = arith.constant 4 : index
    %c0_19 = arith.constant 0 : index
    %c0_20 = arith.constant 0 : index
    %24 = vector.load %arg0[%c4, %c0_19, %c0_20] : memref<28x2x16xf32, #tpu.memory_space<vmem>>, vector<1x2x16xf32>
    %25 = vector.shape_cast %24 : vector<1x2x16xf32> to vector<2x16xf32>
    %cst_21 = arith.constant dense<0.000000e+00> : vector<2x48xf32>
    %26 = tpu.matmul %25, %0, %cst_21 {dimension_numbers = #tpu.dot_dimension_numbers<[1], [0], [0], [1], [0, 0, 1, 1], [], []>} : vector<2x16xf32>, vector<16x48xf32>, vector<2x48xf32> -> vector<2x48xf32>
    %27 = arith.addf %26, %4 : vector<2x48xf32>
    %c5 = arith.constant 5 : index
    %c0_22 = arith.constant 0 : index
    %c0_23 = arith.constant 0 : index
    %28 = vector.load %arg0[%c5, %c0_22, %c0_23] : memref<28x2x16xf32, #tpu.memory_space<vmem>>, vector<1x2x16xf32>
    %29 = vector.shape_cast %28 : vector<1x2x16xf32> to vector<2x16xf32>
    %cst_24 = arith.constant dense<0.000000e+00> : vector<2x48xf32>
    %30 = tpu.matmul %29, %0, %cst_24 {dimension_numbers = #tpu.dot_dimension_numbers<[1], [0], [0], [1], [0, 0, 1, 1], [], []>} : vector<2x16xf32>, vector<16x48xf32>, vector<2x48xf32> -> vector<2x48xf32>
    %31 = arith.addf %30, %4 : vector<2x48xf32>
    %c6 = arith.constant 6 : index
    %c0_25 = arith.constant 0 : index
    %c0_26 = arith.constant 0 : index
    %32 = vector.load %arg0[%c6, %c0_25, %c0_26] : memref<28x2x16xf32, #tpu.memory_space<vmem>>, vector<1x2x16xf32>
    %33 = vector.shape_cast %32 : vector<1x2x16xf32> to vector<2x16xf32>
    %cst_27 = arith.constant dense<0.000000e+00> : vector<2x48xf32>
    %34 = tpu.matmul %33, %0, %cst_27 {dimension_numbers = #tpu.dot_dimension_numbers<[1], [0], [0], [1], [0, 0, 1, 1], [], []>} : vector<2x16xf32>, vector<16x48xf32>, vector<2x48xf32> -> vector<2x48xf32>
    %35 = arith.addf %34, %4 : vector<2x48xf32>
    %c7 = arith.constant 7 : index
    %c0_28 = arith.constant 0 : index
    %c0_29 = arith.constant 0 : index
    %36 = vector.load %arg0[%c7, %c0_28, %c0_29] : memref<28x2x16xf32, #tpu.memory_space<vmem>>, vector<1x2x16xf32>
    %37 = vector.shape_cast %36 : vector<1x2x16xf32> to vector<2x16xf32>
    %cst_30 = arith.constant dense<0.000000e+00> : vector<2x48xf32>
    %38 = tpu.matmul %37, %0, %cst_30 {dimension_numbers = #tpu.dot_dimension_numbers<[1], [0], [0], [1], [0, 0, 1, 1], [], []>} : vector<2x16xf32>, vector<16x48xf32>, vector<2x48xf32> -> vector<2x48xf32>
    %39 = arith.addf %38, %4 : vector<2x48xf32>
    %c8 = arith.constant 8 : index
    %c0_31 = arith.constant 0 : index
    %c0_32 = arith.constant 0 : index
    %40 = vector.load %arg0[%c8, %c0_31, %c0_32] : memref<28x2x16xf32, #tpu.memory_space<vmem>>, vector<1x2x16xf32>
    %41 = vector.shape_cast %40 : vector<1x2x16xf32> to vector<2x16xf32>
    %cst_33 = arith.constant dense<0.000000e+00> : vector<2x48xf32>
    %42 = tpu.matmul %41, %0, %cst_33 {dimension_numbers = #tpu.dot_dimension_numbers<[1], [0], [0], [1], [0, 0, 1, 1], [], []>} : vector<2x16xf32>, vector<16x48xf32>, vector<2x48xf32> -> vector<2x48xf32>
    %43 = arith.addf %42, %4 : vector<2x48xf32>
    %c9 = arith.constant 9 : index
    %c0_34 = arith.constant 0 : index
    %c0_35 = arith.constant 0 : index
    %44 = vector.load %arg0[%c9, %c0_34, %c0_35] : memref<28x2x16xf32, #tpu.memory_space<vmem>>, vector<1x2x16xf32>
    %45 = vector.shape_cast %44 : vector<1x2x16xf32> to vector<2x16xf32>
    %cst_36 = arith.constant dense<0.000000e+00> : vector<2x48xf32>
    %46 = tpu.matmul %45, %0, %cst_36 {dimension_numbers = #tpu.dot_dimension_numbers<[1], [0], [0], [1], [0, 0, 1, 1], [], []>} : vector<2x16xf32>, vector<16x48xf32>, vector<2x48xf32> -> vector<2x48xf32>
    %47 = arith.addf %46, %4 : vector<2x48xf32>
    %c10 = arith.constant 10 : index
    %c0_37 = arith.constant 0 : index
    %c0_38 = arith.constant 0 : index
    %48 = vector.load %arg0[%c10, %c0_37, %c0_38] : memref<28x2x16xf32, #tpu.memory_space<vmem>>, vector<1x2x16xf32>
    %49 = vector.shape_cast %48 : vector<1x2x16xf32> to vector<2x16xf32>
    %cst_39 = arith.constant dense<0.000000e+00> : vector<2x48xf32>
    %50 = tpu.matmul %49, %0, %cst_39 {dimension_numbers = #tpu.dot_dimension_numbers<[1], [0], [0], [1], [0, 0, 1, 1], [], []>} : vector<2x16xf32>, vector<16x48xf32>, vector<2x48xf32> -> vector<2x48xf32>
    %51 = arith.addf %50, %4 : vector<2x48xf32>
    %c11 = arith.constant 11 : index
    %c0_40 = arith.constant 0 : index
    %c0_41 = arith.constant 0 : index
    %52 = vector.load %arg0[%c11, %c0_40, %c0_41] : memref<28x2x16xf32, #tpu.memory_space<vmem>>, vector<1x2x16xf32>
    %53 = vector.shape_cast %52 : vector<1x2x16xf32> to vector<2x16xf32>
    %cst_42 = arith.constant dense<0.000000e+00> : vector<2x48xf32>
    %54 = tpu.matmul %53, %0, %cst_42 {dimension_numbers = #tpu.dot_dimension_numbers<[1], [0], [0], [1], [0, 0, 1, 1], [], []>} : vector<2x16xf32>, vector<16x48xf32>, vector<2x48xf32> -> vector<2x48xf32>
    %55 = arith.addf %54, %4 : vector<2x48xf32>
    %c12 = arith.constant 12 : index
    %c0_43 = arith.constant 0 : index
    %c0_44 = arith.constant 0 : index
    %56 = vector.load %arg0[%c12, %c0_43, %c0_44] : memref<28x2x16xf32, #tpu.memory_space<vmem>>, vector<1x2x16xf32>
    %57 = vector.shape_cast %56 : vector<1x2x16xf32> to vector<2x16xf32>
    %cst_45 = arith.constant dense<0.000000e+00> : vector<2x48xf32>
    %58 = tpu.matmul %57, %0, %cst_45 {dimension_numbers = #tpu.dot_dimension_numbers<[1], [0], [0], [1], [0, 0, 1, 1], [], []>} : vector<2x16xf32>, vector<16x48xf32>, vector<2x48xf32> -> vector<2x48xf32>
    %59 = arith.addf %58, %4 : vector<2x48xf32>
    %c13 = arith.constant 13 : index
    %c0_46 = arith.constant 0 : index
    %c0_47 = arith.constant 0 : index
    %60 = vector.load %arg0[%c13, %c0_46, %c0_47] : memref<28x2x16xf32, #tpu.memory_space<vmem>>, vector<1x2x16xf32>
    %61 = vector.shape_cast %60 : vector<1x2x16xf32> to vector<2x16xf32>
    %cst_48 = arith.constant dense<0.000000e+00> : vector<2x48xf32>
    %62 = tpu.matmul %61, %0, %cst_48 {dimension_numbers = #tpu.dot_dimension_numbers<[1], [0], [0], [1], [0, 0, 1, 1], [], []>} : vector<2x16xf32>, vector<16x48xf32>, vector<2x48xf32> -> vector<2x48xf32>
    %63 = arith.addf %62, %4 : vector<2x48xf32>
    %c14 = arith.constant 14 : index
    %c0_49 = arith.constant 0 : index
    %c0_50 = arith.constant 0 : index
    %64 = vector.load %arg0[%c14, %c0_49, %c0_50] : memref<28x2x16xf32, #tpu.memory_space<vmem>>, vector<1x2x16xf32>
    %65 = vector.shape_cast %64 : vector<1x2x16xf32> to vector<2x16xf32>
    %cst_51 = arith.constant dense<0.000000e+00> : vector<2x48xf32>
    %66 = tpu.matmul %65, %0, %cst_51 {dimension_numbers = #tpu.dot_dimension_numbers<[1], [0], [0], [1], [0, 0, 1, 1], [], []>} : vector<2x16xf32>, vector<16x48xf32>, vector<2x48xf32> -> vector<2x48xf32>
    %67 = arith.addf %66, %4 : vector<2x48xf32>
    %c15 = arith.constant 15 : index
    %c0_52 = arith.constant 0 : index
    %c0_53 = arith.constant 0 : index
    %68 = vector.load %arg0[%c15, %c0_52, %c0_53] : memref<28x2x16xf32, #tpu.memory_space<vmem>>, vector<1x2x16xf32>
    %69 = vector.shape_cast %68 : vector<1x2x16xf32> to vector<2x16xf32>
    %cst_54 = arith.constant dense<0.000000e+00> : vector<2x48xf32>
    %70 = tpu.matmul %69, %0, %cst_54 {dimension_numbers = #tpu.dot_dimension_numbers<[1], [0], [0], [1], [0, 0, 1, 1], [], []>} : vector<2x16xf32>, vector<16x48xf32>, vector<2x48xf32> -> vector<2x48xf32>
    %71 = arith.addf %70, %4 : vector<2x48xf32>
    %c16 = arith.constant 16 : index
    %c0_55 = arith.constant 0 : index
    %c0_56 = arith.constant 0 : index
    %72 = vector.load %arg0[%c16, %c0_55, %c0_56] : memref<28x2x16xf32, #tpu.memory_space<vmem>>, vector<1x2x16xf32>
    %73 = vector.shape_cast %72 : vector<1x2x16xf32> to vector<2x16xf32>
    %cst_57 = arith.constant dense<0.000000e+00> : vector<2x48xf32>
    %74 = tpu.matmul %73, %0, %cst_57 {dimension_numbers = #tpu.dot_dimension_numbers<[1], [0], [0], [1], [0, 0, 1, 1], [], []>} : vector<2x16xf32>, vector<16x48xf32>, vector<2x48xf32> -> vector<2x48xf32>
    %75 = arith.addf %74, %4 : vector<2x48xf32>
    %c17 = arith.constant 17 : index
    %c0_58 = arith.constant 0 : index
    %c0_59 = arith.constant 0 : index
    %76 = vector.load %arg0[%c17, %c0_58, %c0_59] : memref<28x2x16xf32, #tpu.memory_space<vmem>>, vector<1x2x16xf32>
    %77 = vector.shape_cast %76 : vector<1x2x16xf32> to vector<2x16xf32>
    %cst_60 = arith.constant dense<0.000000e+00> : vector<2x48xf32>
    %78 = tpu.matmul %77, %0, %cst_60 {dimension_numbers = #tpu.dot_dimension_numbers<[1], [0], [0], [1], [0, 0, 1, 1], [], []>} : vector<2x16xf32>, vector<16x48xf32>, vector<2x48xf32> -> vector<2x48xf32>
    %79 = arith.addf %78, %4 : vector<2x48xf32>
    %c18 = arith.constant 18 : index
    %c0_61 = arith.constant 0 : index
    %c0_62 = arith.constant 0 : index
    %80 = vector.load %arg0[%c18, %c0_61, %c0_62] : memref<28x2x16xf32, #tpu.memory_space<vmem>>, vector<1x2x16xf32>
    %81 = vector.shape_cast %80 : vector<1x2x16xf32> to vector<2x16xf32>
    %cst_63 = arith.constant dense<0.000000e+00> : vector<2x48xf32>
    %82 = tpu.matmul %81, %0, %cst_63 {dimension_numbers = #tpu.dot_dimension_numbers<[1], [0], [0], [1], [0, 0, 1, 1], [], []>} : vector<2x16xf32>, vector<16x48xf32>, vector<2x48xf32> -> vector<2x48xf32>
    %83 = arith.addf %82, %4 : vector<2x48xf32>
    %c19 = arith.constant 19 : index
    %c0_64 = arith.constant 0 : index
    %c0_65 = arith.constant 0 : index
    %84 = vector.load %arg0[%c19, %c0_64, %c0_65] : memref<28x2x16xf32, #tpu.memory_space<vmem>>, vector<1x2x16xf32>
    %85 = vector.shape_cast %84 : vector<1x2x16xf32> to vector<2x16xf32>
    %cst_66 = arith.constant dense<0.000000e+00> : vector<2x48xf32>
    %86 = tpu.matmul %85, %0, %cst_66 {dimension_numbers = #tpu.dot_dimension_numbers<[1], [0], [0], [1], [0, 0, 1, 1], [], []>} : vector<2x16xf32>, vector<16x48xf32>, vector<2x48xf32> -> vector<2x48xf32>
    %87 = arith.addf %86, %4 : vector<2x48xf32>
    %c20 = arith.constant 20 : index
    %c0_67 = arith.constant 0 : index
    %c0_68 = arith.constant 0 : index
    %88 = vector.load %arg0[%c20, %c0_67, %c0_68] : memref<28x2x16xf32, #tpu.memory_space<vmem>>, vector<1x2x16xf32>
    %89 = vector.shape_cast %88 : vector<1x2x16xf32> to vector<2x16xf32>
    %cst_69 = arith.constant dense<0.000000e+00> : vector<2x48xf32>
    %90 = tpu.matmul %89, %0, %cst_69 {dimension_numbers = #tpu.dot_dimension_numbers<[1], [0], [0], [1], [0, 0, 1, 1], [], []>} : vector<2x16xf32>, vector<16x48xf32>, vector<2x48xf32> -> vector<2x48xf32>
    %91 = arith.addf %90, %4 : vector<2x48xf32>
    %c21 = arith.constant 21 : index
    %c0_70 = arith.constant 0 : index
    %c0_71 = arith.constant 0 : index
    %92 = vector.load %arg0[%c21, %c0_70, %c0_71] : memref<28x2x16xf32, #tpu.memory_space<vmem>>, vector<1x2x16xf32>
    %93 = vector.shape_cast %92 : vector<1x2x16xf32> to vector<2x16xf32>
    %cst_72 = arith.constant dense<0.000000e+00> : vector<2x48xf32>
    %94 = tpu.matmul %93, %0, %cst_72 {dimension_numbers = #tpu.dot_dimension_numbers<[1], [0], [0], [1], [0, 0, 1, 1], [], []>} : vector<2x16xf32>, vector<16x48xf32>, vector<2x48xf32> -> vector<2x48xf32>
    %95 = arith.addf %94, %4 : vector<2x48xf32>
    %c22 = arith.constant 22 : index
    %c0_73 = arith.constant 0 : index
    %c0_74 = arith.constant 0 : index
    %96 = vector.load %arg0[%c22, %c0_73, %c0_74] : memref<28x2x16xf32, #tpu.memory_space<vmem>>, vector<1x2x16xf32>
    %97 = vector.shape_cast %96 : vector<1x2x16xf32> to vector<2x16xf32>
    %cst_75 = arith.constant dense<0.000000e+00> : vector<2x48xf32>
    %98 = tpu.matmul %97, %0, %cst_75 {dimension_numbers = #tpu.dot_dimension_numbers<[1], [0], [0], [1], [0, 0, 1, 1], [], []>} : vector<2x16xf32>, vector<16x48xf32>, vector<2x48xf32> -> vector<2x48xf32>
    %99 = arith.addf %98, %4 : vector<2x48xf32>
    %c23 = arith.constant 23 : index
    %c0_76 = arith.constant 0 : index
    %c0_77 = arith.constant 0 : index
    %100 = vector.load %arg0[%c23, %c0_76, %c0_77] : memref<28x2x16xf32, #tpu.memory_space<vmem>>, vector<1x2x16xf32>
    %101 = vector.shape_cast %100 : vector<1x2x16xf32> to vector<2x16xf32>
    %cst_78 = arith.constant dense<0.000000e+00> : vector<2x48xf32>
    %102 = tpu.matmul %101, %0, %cst_78 {dimension_numbers = #tpu.dot_dimension_numbers<[1], [0], [0], [1], [0, 0, 1, 1], [], []>} : vector<2x16xf32>, vector<16x48xf32>, vector<2x48xf32> -> vector<2x48xf32>
    %103 = arith.addf %102, %4 : vector<2x48xf32>
    %c24 = arith.constant 24 : index
    %c0_79 = arith.constant 0 : index
    %c0_80 = arith.constant 0 : index
    %104 = vector.load %arg0[%c24, %c0_79, %c0_80] : memref<28x2x16xf32, #tpu.memory_space<vmem>>, vector<1x2x16xf32>
    %105 = vector.shape_cast %104 : vector<1x2x16xf32> to vector<2x16xf32>
    %cst_81 = arith.constant dense<0.000000e+00> : vector<2x48xf32>
    %106 = tpu.matmul %105, %0, %cst_81 {dimension_numbers = #tpu.dot_dimension_numbers<[1], [0], [0], [1], [0, 0, 1, 1], [], []>} : vector<2x16xf32>, vector<16x48xf32>, vector<2x48xf32> -> vector<2x48xf32>
    %107 = arith.addf %106, %4 : vector<2x48xf32>
    %c25 = arith.constant 25 : index
    %c0_82 = arith.constant 0 : index
    %c0_83 = arith.constant 0 : index
    %108 = vector.load %arg0[%c25, %c0_82, %c0_83] : memref<28x2x16xf32, #tpu.memory_space<vmem>>, vector<1x2x16xf32>
    %109 = vector.shape_cast %108 : vector<1x2x16xf32> to vector<2x16xf32>
    %cst_84 = arith.constant dense<0.000000e+00> : vector<2x48xf32>
    %110 = tpu.matmul %109, %0, %cst_84 {dimension_numbers = #tpu.dot_dimension_numbers<[1], [0], [0], [1], [0, 0, 1, 1], [], []>} : vector<2x16xf32>, vector<16x48xf32>, vector<2x48xf32> -> vector<2x48xf32>
    %111 = arith.addf %110, %4 : vector<2x48xf32>
    %c26 = arith.constant 26 : index
    %c0_85 = arith.constant 0 : index
    %c0_86 = arith.constant 0 : index
    %112 = vector.load %arg0[%c26, %c0_85, %c0_86] : memref<28x2x16xf32, #tpu.memory_space<vmem>>, vector<1x2x16xf32>
    %113 = vector.shape_cast %112 : vector<1x2x16xf32> to vector<2x16xf32>
    %cst_87 = arith.constant dense<0.000000e+00> : vector<2x48xf32>
    %114 = tpu.matmul %113, %0, %cst_87 {dimension_numbers = #tpu.dot_dimension_numbers<[1], [0], [0], [1], [0, 0, 1, 1], [], []>} : vector<2x16xf32>, vector<16x48xf32>, vector<2x48xf32> -> vector<2x48xf32>
    %115 = arith.addf %114, %4 : vector<2x48xf32>
    %c27 = arith.constant 27 : index
    %c0_88 = arith.constant 0 : index
    %c0_89 = arith.constant 0 : index
    %116 = vector.load %arg0[%c27, %c0_88, %c0_89] : memref<28x2x16xf32, #tpu.memory_space<vmem>>, vector<1x2x16xf32>
    %117 = vector.shape_cast %116 : vector<1x2x16xf32> to vector<2x16xf32>
    %cst_90 = arith.constant dense<0.000000e+00> : vector<2x48xf32>
    %118 = tpu.matmul %117, %0, %cst_90 {dimension_numbers = #tpu.dot_dimension_numbers<[1], [0], [0], [1], [0, 0, 1, 1], [], []>} : vector<2x16xf32>, vector<16x48xf32>, vector<2x48xf32> -> vector<2x48xf32>
    %119 = arith.addf %118, %4 : vector<2x48xf32>
    %cst_91 = arith.constant 0.000000e+00 : f32
    %120 = vector.broadcast %cst_91 : f32 to vector<2x16xf32>
    %cst_92 = arith.constant dense<0.000000e+00> : vector<2x48xf32>
    %121 = tpu.matmul %120, %1, %cst_92 {dimension_numbers = #tpu.dot_dimension_numbers<[1], [0], [0], [1], [0, 0, 1, 1], [], []>} : vector<2x16xf32>, vector<16x48xf32>, vector<2x48xf32> -> vector<2x48xf32>
    %122 = arith.addf %121, %7 : vector<2x48xf32>
    %123 = vector.extract_strided_slice %11 {offsets = [0, 0], sizes = [2, 16], strides = [1, 1]} : vector<2x48xf32> to vector<2x16xf32>
    %124 = vector.extract_strided_slice %122 {offsets = [0, 0], sizes = [2, 16], strides = [1, 1]} : vector<2x48xf32> to vector<2x16xf32>
    %125 = arith.addf %123, %124 : vector<2x16xf32>
    %126 = arith.negf %125 : vector<2x16xf32>
    %127 = math.exp %126 : vector<2x16xf32>
    %cst_93 = arith.constant 1.000000e+00 : f32
    %128 = vector.broadcast %cst_93 : f32 to vector<2x16xf32>
    %129 = arith.addf %128, %127 : vector<2x16xf32>
    %130 = arith.divf %128, %129 : vector<2x16xf32>
    %131 = vector.extract_strided_slice %11 {offsets = [0, 16], sizes = [2, 16], strides = [1, 1]} : vector<2x48xf32> to vector<2x16xf32>
    %132 = vector.extract_strided_slice %122 {offsets = [0, 16], sizes = [2, 16], strides = [1, 1]} : vector<2x48xf32> to vector<2x16xf32>
    %133 = arith.addf %131, %132 : vector<2x16xf32>
    %134 = arith.negf %133 : vector<2x16xf32>
    %135 = math.exp %134 : vector<2x16xf32>
    %cst_94 = arith.constant 1.000000e+00 : f32
    %136 = vector.broadcast %cst_94 : f32 to vector<2x16xf32>
    %137 = arith.addf %136, %135 : vector<2x16xf32>
    %138 = arith.divf %136, %137 : vector<2x16xf32>
    %139 = vector.extract_strided_slice %11 {offsets = [0, 32], sizes = [2, 16], strides = [1, 1]} : vector<2x48xf32> to vector<2x16xf32>
    %140 = vector.extract_strided_slice %122 {offsets = [0, 32], sizes = [2, 16], strides = [1, 1]} : vector<2x48xf32> to vector<2x16xf32>
    %141 = arith.mulf %130, %140 : vector<2x16xf32>
    %142 = arith.addf %139, %141 : vector<2x16xf32>
    %143 = math.tanh %142 : vector<2x16xf32>
    %cst_95 = arith.constant 1.000000e+00 : f32
    %144 = vector.broadcast %cst_95 : f32 to vector<2x16xf32>
    %145 = arith.subf %144, %138 : vector<2x16xf32>
    %146 = arith.mulf %145, %143 : vector<2x16xf32>
    %147 = arith.mulf %138, %120 : vector<2x16xf32>
    %148 = arith.addf %146, %147 : vector<2x16xf32>
    %cst_96 = arith.constant 0.000000e+00 : f32
    %149 = vector.broadcast %cst_96 : f32 to vector<2x16xf32>
    %150 = arith.maximumf %148, %149 : vector<2x16xf32>
    %c0_97 = arith.constant 0 : index
    %c0_98 = arith.constant 0 : index
    %c0_99 = arith.constant 0 : index
    %151 = vector.load %arg14[%c0_97, %c0_98, %c0_99] : memref<28x2x16xf32, #tpu.memory_space<vmem>>, vector<1x2x16xf32>
    %152 = vector.shape_cast %151 : vector<1x2x16xf32> to vector<2x16xf32>
    %153 = vector.shape_cast %150 : vector<2x16xf32> to vector<1x2x16xf32>
    tpu.vector_store %arg14[%c0_97, %c0_98, %c0_99], %153 {strides = array<i32>} : memref<28x2x16xf32, #tpu.memory_space<vmem>>, vector<1x2x16xf32>,
    %154 = vector.extract_strided_slice %148 {offsets = [1, 0], sizes = [1, 16], strides = [1, 1]} : vector<2x16xf32> to vector<1x16xf32>
    %c0_100 = arith.constant 0 : index
    %c0_101 = arith.constant 0 : index
    %155 = vector.load %arg12[%c0_100, %c0_101] : memref<28x16xf32, #tpu.memory_space<vmem>>, vector<1x16xf32>
    tpu.vector_store %arg12[%c0_100, %c0_101], %154 {strides = array<i32>} : memref<28x16xf32, #tpu.memory_space<vmem>>, vector<1x16xf32>,
    %cst_102 = arith.constant dense<0.000000e+00> : vector<2x48xf32>
    %156 = tpu.matmul %148, %1, %cst_102 {dimension_numbers = #tpu.dot_dimension_numbers<[1], [0], [0], [1], [0, 0, 1, 1], [], []>} : vector<2x16xf32>, vector<16x48xf32>, vector<2x48xf32> -> vector<2x48xf32>
    %157 = arith.addf %156, %7 : vector<2x48xf32>
    %158 = vector.extract_strided_slice %15 {offsets = [0, 0], sizes = [2, 16], strides = [1, 1]} : vector<2x48xf32> to vector<2x16xf32>
    %159 = vector.extract_strided_slice %157 {offsets = [0, 0], sizes = [2, 16], strides = [1, 1]} : vector<2x48xf32> to vector<2x16xf32>
    %160 = arith.addf %158, %159 : vector<2x16xf32>
    %161 = arith.negf %160 : vector<2x16xf32>
    %162 = math.exp %161 : vector<2x16xf32>
    %cst_103 = arith.constant 1.000000e+00 : f32
    %163 = vector.broadcast %cst_103 : f32 to vector<2x16xf32>
    %164 = arith.addf %163, %162 : vector<2x16xf32>
    %165 = arith.divf %163, %164 : vector<2x16xf32>
    %166 = vector.extract_strided_slice %15 {offsets = [0, 16], sizes = [2, 16], strides = [1, 1]} : vector<2x48xf32> to vector<2x16xf32>
    %167 = vector.extract_strided_slice %157 {offsets = [0, 16], sizes = [2, 16], strides = [1, 1]} : vector<2x48xf32> to vector<2x16xf32>
    %168 = arith.addf %166, %167 : vector<2x16xf32>
    %169 = arith.negf %168 : vector<2x16xf32>
    %170 = math.exp %169 : vector<2x16xf32>
    %cst_104 = arith.constant 1.000000e+00 : f32
    %171 = vector.broadcast %cst_104 : f32 to vector<2x16xf32>
    %172 = arith.addf %171, %170 : vector<2x16xf32>
    %173 = arith.divf %171, %172 : vector<2x16xf32>
    %174 = vector.extract_strided_slice %15 {offsets = [0, 32], sizes = [2, 16], strides = [1, 1]} : vector<2x48xf32> to vector<2x16xf32>
    %175 = vector.extract_strided_slice %157 {offsets = [0, 32], sizes = [2, 16], strides = [1, 1]} : vector<2x48xf32> to vector<2x16xf32>
    %176 = arith.mulf %165, %175 : vector<2x16xf32>
    %177 = arith.addf %174, %176 : vector<2x16xf32>
    %178 = math.tanh %177 : vector<2x16xf32>
    %cst_105 = arith.constant 1.000000e+00 : f32
    %179 = vector.broadcast %cst_105 : f32 to vector<2x16xf32>
    %180 = arith.subf %179, %173 : vector<2x16xf32>
    %181 = arith.mulf %180, %178 : vector<2x16xf32>
    %182 = arith.mulf %173, %148 : vector<2x16xf32>
    %183 = arith.addf %181, %182 : vector<2x16xf32>
    %cst_106 = arith.constant 0.000000e+00 : f32
    %184 = vector.broadcast %cst_106 : f32 to vector<2x16xf32>
    %185 = arith.maximumf %183, %184 : vector<2x16xf32>
    %c1_107 = arith.constant 1 : index
    %c0_108 = arith.constant 0 : index
    %c0_109 = arith.constant 0 : index
    %186 = vector.load %arg14[%c1_107, %c0_108, %c0_109] : memref<28x2x16xf32, #tpu.memory_space<vmem>>, vector<1x2x16xf32>
    %187 = vector.shape_cast %186 : vector<1x2x16xf32> to vector<2x16xf32>
    %188 = vector.shape_cast %185 : vector<2x16xf32> to vector<1x2x16xf32>
    tpu.vector_store %arg14[%c1_107, %c0_108, %c0_109], %188 {strides = array<i32>} : memref<28x2x16xf32, #tpu.memory_space<vmem>>, vector<1x2x16xf32>,
    %189 = vector.extract_strided_slice %183 {offsets = [1, 0], sizes = [1, 16], strides = [1, 1]} : vector<2x16xf32> to vector<1x16xf32>
    %c1_110 = arith.constant 1 : index
    %c0_111 = arith.constant 0 : index
    %190 = vector.load %arg12[%c1_110, %c0_111] : memref<28x16xf32, #tpu.memory_space<vmem>>, vector<1x16xf32>
    tpu.vector_store %arg12[%c1_110, %c0_111], %189 {strides = array<i32>} : memref<28x16xf32, #tpu.memory_space<vmem>>, vector<1x16xf32>,
    %cst_112 = arith.constant dense<0.000000e+00> : vector<2x48xf32>
    %191 = tpu.matmul %183, %1, %cst_112 {dimension_numbers = #tpu.dot_dimension_numbers<[1], [0], [0], [1], [0, 0, 1, 1], [], []>} : vector<2x16xf32>, vector<16x48xf32>, vector<2x48xf32> -> vector<2x48xf32>
    %192 = arith.addf %191, %7 : vector<2x48xf32>
    %193 = vector.extract_strided_slice %19 {offsets = [0, 0], sizes = [2, 16], strides = [1, 1]} : vector<2x48xf32> to vector<2x16xf32>
    %194 = vector.extract_strided_slice %192 {offsets = [0, 0], sizes = [2, 16], strides = [1, 1]} : vector<2x48xf32> to vector<2x16xf32>
    %195 = arith.addf %193, %194 : vector<2x16xf32>
    %196 = arith.negf %195 : vector<2x16xf32>
    %197 = math.exp %196 : vector<2x16xf32>
    %cst_113 = arith.constant 1.000000e+00 : f32
    %198 = vector.broadcast %cst_113 : f32 to vector<2x16xf32>
    %199 = arith.addf %198, %197 : vector<2x16xf32>
    %200 = arith.divf %198, %199 : vector<2x16xf32>
    %201 = vector.extract_strided_slice %19 {offsets = [0, 16], sizes = [2, 16], strides = [1, 1]} : vector<2x48xf32> to vector<2x16xf32>
    %202 = vector.extract_strided_slice %192 {offsets = [0, 16], sizes = [2, 16], strides = [1, 1]} : vector<2x48xf32> to vector<2x16xf32>
    %203 = arith.addf %201, %202 : vector<2x16xf32>
    %204 = arith.negf %203 : vector<2x16xf32>
    %205 = math.exp %204 : vector<2x16xf32>
    %cst_114 = arith.constant 1.000000e+00 : f32
    %206 = vector.broadcast %cst_114 : f32 to vector<2x16xf32>
    %207 = arith.addf %206, %205 : vector<2x16xf32>
    %208 = arith.divf %206, %207 : vector<2x16xf32>
    %209 = vector.extract_strided_slice %19 {offsets = [0, 32], sizes = [2, 16], strides = [1, 1]} : vector<2x48xf32> to vector<2x16xf32>
    %210 = vector.extract_strided_slice %192 {offsets = [0, 32], sizes = [2, 16], strides = [1, 1]} : vector<2x48xf32> to vector<2x16xf32>
    %211 = arith.mulf %200, %210 : vector<2x16xf32>
    %212 = arith.addf %209, %211 : vector<2x16xf32>
    %213 = math.tanh %212 : vector<2x16xf32>
    %cst_115 = arith.constant 1.000000e+00 : f32
    %214 = vector.broadcast %cst_115 : f32 to vector<2x16xf32>
    %215 = arith.subf %214, %208 : vector<2x16xf32>
    %216 = arith.mulf %215, %213 : vector<2x16xf32>
    %217 = arith.mulf %208, %183 : vector<2x16xf32>
    %218 = arith.addf %216, %217 : vector<2x16xf32>
    %cst_116 = arith.constant 0.000000e+00 : f32
    %219 = vector.broadcast %cst_116 : f32 to vector<2x16xf32>
    %220 = arith.maximumf %218, %219 : vector<2x16xf32>
    %c2_117 = arith.constant 2 : index
    %c0_118 = arith.constant 0 : index
    %c0_119 = arith.constant 0 : index
    %221 = vector.load %arg14[%c2_117, %c0_118, %c0_119] : memref<28x2x16xf32, #tpu.memory_space<vmem>>, vector<1x2x16xf32>
    %222 = vector.shape_cast %221 : vector<1x2x16xf32> to vector<2x16xf32>
    %223 = vector.shape_cast %220 : vector<2x16xf32> to vector<1x2x16xf32>
    tpu.vector_store %arg14[%c2_117, %c0_118, %c0_119], %223 {strides = array<i32>} : memref<28x2x16xf32, #tpu.memory_space<vmem>>, vector<1x2x16xf32>,
    %224 = vector.extract_strided_slice %218 {offsets = [1, 0], sizes = [1, 16], strides = [1, 1]} : vector<2x16xf32> to vector<1x16xf32>
    %c2_120 = arith.constant 2 : index
    %c0_121 = arith.constant 0 : index
    %225 = vector.load %arg12[%c2_120, %c0_121] : memref<28x16xf32, #tpu.memory_space<vmem>>, vector<1x16xf32>
    tpu.vector_store %arg12[%c2_120, %c0_121], %224 {strides = array<i32>} : memref<28x16xf32, #tpu.memory_space<vmem>>, vector<1x16xf32>,
    %cst_122 = arith.constant dense<0.000000e+00> : vector<2x48xf32>
    %226 = tpu.matmul %218, %1, %cst_122 {dimension_numbers = #tpu.dot_dimension_numbers<[1], [0], [0], [1], [0, 0, 1, 1], [], []>} : vector<2x16xf32>, vector<16x48xf32>, vector<2x48xf32> -> vector<2x48xf32>
    %227 = arith.addf %226, %7 : vector<2x48xf32>
    %228 = vector.extract_strided_slice %23 {offsets = [0, 0], sizes = [2, 16], strides = [1, 1]} : vector<2x48xf32> to vector<2x16xf32>
    %229 = vector.extract_strided_slice %227 {offsets = [0, 0], sizes = [2, 16], strides = [1, 1]} : vector<2x48xf32> to vector<2x16xf32>
    %230 = arith.addf %228, %229 : vector<2x16xf32>
    %231 = arith.negf %230 : vector<2x16xf32>
    %232 = math.exp %231 : vector<2x16xf32>
    %cst_123 = arith.constant 1.000000e+00 : f32
    %233 = vector.broadcast %cst_123 : f32 to vector<2x16xf32>
    %234 = arith.addf %233, %232 : vector<2x16xf32>
    %235 = arith.divf %233, %234 : vector<2x16xf32>
    %236 = vector.extract_strided_slice %23 {offsets = [0, 16], sizes = [2, 16], strides = [1, 1]} : vector<2x48xf32> to vector<2x16xf32>
    %237 = vector.extract_strided_slice %227 {offsets = [0, 16], sizes = [2, 16], strides = [1, 1]} : vector<2x48xf32> to vector<2x16xf32>
    %238 = arith.addf %236, %237 : vector<2x16xf32>
    %239 = arith.negf %238 : vector<2x16xf32>
    %240 = math.exp %239 : vector<2x16xf32>
    %cst_124 = arith.constant 1.000000e+00 : f32
    %241 = vector.broadcast %cst_124 : f32 to vector<2x16xf32>
    %242 = arith.addf %241, %240 : vector<2x16xf32>
    %243 = arith.divf %241, %242 : vector<2x16xf32>
    %244 = vector.extract_strided_slice %23 {offsets = [0, 32], sizes = [2, 16], strides = [1, 1]} : vector<2x48xf32> to vector<2x16xf32>
    %245 = vector.extract_strided_slice %227 {offsets = [0, 32], sizes = [2, 16], strides = [1, 1]} : vector<2x48xf32> to vector<2x16xf32>
    %246 = arith.mulf %235, %245 : vector<2x16xf32>
    %247 = arith.addf %244, %246 : vector<2x16xf32>
    %248 = math.tanh %247 : vector<2x16xf32>
    %cst_125 = arith.constant 1.000000e+00 : f32
    %249 = vector.broadcast %cst_125 : f32 to vector<2x16xf32>
    %250 = arith.subf %249, %243 : vector<2x16xf32>
    %251 = arith.mulf %250, %248 : vector<2x16xf32>
    %252 = arith.mulf %243, %218 : vector<2x16xf32>
    %253 = arith.addf %251, %252 : vector<2x16xf32>
    %cst_126 = arith.constant 0.000000e+00 : f32
    %254 = vector.broadcast %cst_126 : f32 to vector<2x16xf32>
    %255 = arith.maximumf %253, %254 : vector<2x16xf32>
    %c3_127 = arith.constant 3 : index
    %c0_128 = arith.constant 0 : index
    %c0_129 = arith.constant 0 : index
    %256 = vector.load %arg14[%c3_127, %c0_128, %c0_129] : memref<28x2x16xf32, #tpu.memory_space<vmem>>, vector<1x2x16xf32>
    %257 = vector.shape_cast %256 : vector<1x2x16xf32> to vector<2x16xf32>
    %258 = vector.shape_cast %255 : vector<2x16xf32> to vector<1x2x16xf32>
    tpu.vector_store %arg14[%c3_127, %c0_128, %c0_129], %258 {strides = array<i32>} : memref<28x2x16xf32, #tpu.memory_space<vmem>>, vector<1x2x16xf32>,
    %259 = vector.extract_strided_slice %253 {offsets = [1, 0], sizes = [1, 16], strides = [1, 1]} : vector<2x16xf32> to vector<1x16xf32>
    %c3_130 = arith.constant 3 : index
    %c0_131 = arith.constant 0 : index
    %260 = vector.load %arg12[%c3_130, %c0_131] : memref<28x16xf32, #tpu.memory_space<vmem>>, vector<1x16xf32>
    tpu.vector_store %arg12[%c3_130, %c0_131], %259 {strides = array<i32>} : memref<28x16xf32, #tpu.memory_space<vmem>>, vector<1x16xf32>,
    %cst_132 = arith.constant dense<0.000000e+00> : vector<2x48xf32>
    %261 = tpu.matmul %253, %1, %cst_132 {dimension_numbers = #tpu.dot_dimension_numbers<[1], [0], [0], [1], [0, 0, 1, 1], [], []>} : vector<2x16xf32>, vector<16x48xf32>, vector<2x48xf32> -> vector<2x48xf32>
    %262 = arith.addf %261, %7 : vector<2x48xf32>
    %263 = vector.extract_strided_slice %27 {offsets = [0, 0], sizes = [2, 16], strides = [1, 1]} : vector<2x48xf32> to vector<2x16xf32>
    %264 = vector.extract_strided_slice %262 {offsets = [0, 0], sizes = [2, 16], strides = [1, 1]} : vector<2x48xf32> to vector<2x16xf32>
    %265 = arith.addf %263, %264 : vector<2x16xf32>
    %266 = arith.negf %265 : vector<2x16xf32>
    %267 = math.exp %266 : vector<2x16xf32>
    %cst_133 = arith.constant 1.000000e+00 : f32
    %268 = vector.broadcast %cst_133 : f32 to vector<2x16xf32>
    %269 = arith.addf %268, %267 : vector<2x16xf32>
    %270 = arith.divf %268, %269 : vector<2x16xf32>
    %271 = vector.extract_strided_slice %27 {offsets = [0, 16], sizes = [2, 16], strides = [1, 1]} : vector<2x48xf32> to vector<2x16xf32>
    %272 = vector.extract_strided_slice %262 {offsets = [0, 16], sizes = [2, 16], strides = [1, 1]} : vector<2x48xf32> to vector<2x16xf32>
    %273 = arith.addf %271, %272 : vector<2x16xf32>
    %274 = arith.negf %273 : vector<2x16xf32>
    %275 = math.exp %274 : vector<2x16xf32>
    %cst_134 = arith.constant 1.000000e+00 : f32
    %276 = vector.broadcast %cst_134 : f32 to vector<2x16xf32>
    %277 = arith.addf %276, %275 : vector<2x16xf32>
    %278 = arith.divf %276, %277 : vector<2x16xf32>
    %279 = vector.extract_strided_slice %27 {offsets = [0, 32], sizes = [2, 16], strides = [1, 1]} : vector<2x48xf32> to vector<2x16xf32>
    %280 = vector.extract_strided_slice %262 {offsets = [0, 32], sizes = [2, 16], strides = [1, 1]} : vector<2x48xf32> to vector<2x16xf32>
    %281 = arith.mulf %270, %280 : vector<2x16xf32>
    %282 = arith.addf %279, %281 : vector<2x16xf32>
    %283 = math.tanh %282 : vector<2x16xf32>
    %cst_135 = arith.constant 1.000000e+00 : f32
    %284 = vector.broadcast %cst_135 : f32 to vector<2x16xf32>
    %285 = arith.subf %284, %278 : vector<2x16xf32>
    %286 = arith.mulf %285, %283 : vector<2x16xf32>
    %287 = arith.mulf %278, %253 : vector<2x16xf32>
    %288 = arith.addf %286, %287 : vector<2x16xf32>
    %cst_136 = arith.constant 0.000000e+00 : f32
    %289 = vector.broadcast %cst_136 : f32 to vector<2x16xf32>
    %290 = arith.maximumf %288, %289 : vector<2x16xf32>
    %c4_137 = arith.constant 4 : index
    %c0_138 = arith.constant 0 : index
    %c0_139 = arith.constant 0 : index
    %291 = vector.load %arg14[%c4_137, %c0_138, %c0_139] : memref<28x2x16xf32, #tpu.memory_space<vmem>>, vector<1x2x16xf32>
    %292 = vector.shape_cast %291 : vector<1x2x16xf32> to vector<2x16xf32>
    %293 = vector.shape_cast %290 : vector<2x16xf32> to vector<1x2x16xf32>
    tpu.vector_store %arg14[%c4_137, %c0_138, %c0_139], %293 {strides = array<i32>} : memref<28x2x16xf32, #tpu.memory_space<vmem>>, vector<1x2x16xf32>,
    %294 = vector.extract_strided_slice %288 {offsets = [1, 0], sizes = [1, 16], strides = [1, 1]} : vector<2x16xf32> to vector<1x16xf32>
    %c4_140 = arith.constant 4 : index
    %c0_141 = arith.constant 0 : index
    %295 = vector.load %arg12[%c4_140, %c0_141] : memref<28x16xf32, #tpu.memory_space<vmem>>, vector<1x16xf32>
    tpu.vector_store %arg12[%c4_140, %c0_141], %294 {strides = array<i32>} : memref<28x16xf32, #tpu.memory_space<vmem>>, vector<1x16xf32>,
    %cst_142 = arith.constant dense<0.000000e+00> : vector<2x48xf32>
    %296 = tpu.matmul %288, %1, %cst_142 {dimension_numbers = #tpu.dot_dimension_numbers<[1], [0], [0], [1], [0, 0, 1, 1], [], []>} : vector<2x16xf32>, vector<16x48xf32>, vector<2x48xf32> -> vector<2x48xf32>
    %297 = arith.addf %296, %7 : vector<2x48xf32>
    %298 = vector.extract_strided_slice %31 {offsets = [0, 0], sizes = [2, 16], strides = [1, 1]} : vector<2x48xf32> to vector<2x16xf32>
    %299 = vector.extract_strided_slice %297 {offsets = [0, 0], sizes = [2, 16], strides = [1, 1]} : vector<2x48xf32> to vector<2x16xf32>
    %300 = arith.addf %298, %299 : vector<2x16xf32>
    %301 = arith.negf %300 : vector<2x16xf32>
    %302 = math.exp %301 : vector<2x16xf32>
    %cst_143 = arith.constant 1.000000e+00 : f32
    %303 = vector.broadcast %cst_143 : f32 to vector<2x16xf32>
    %304 = arith.addf %303, %302 : vector<2x16xf32>
    %305 = arith.divf %303, %304 : vector<2x16xf32>
    %306 = vector.extract_strided_slice %31 {offsets = [0, 16], sizes = [2, 16], strides = [1, 1]} : vector<2x48xf32> to vector<2x16xf32>
    %307 = vector.extract_strided_slice %297 {offsets = [0, 16], sizes = [2, 16], strides = [1, 1]} : vector<2x48xf32> to vector<2x16xf32>
    %308 = arith.addf %306, %307 : vector<2x16xf32>
    %309 = arith.negf %308 : vector<2x16xf32>
    %310 = math.exp %309 : vector<2x16xf32>
    %cst_144 = arith.constant 1.000000e+00 : f32
    %311 = vector.broadcast %cst_144 : f32 to vector<2x16xf32>
    %312 = arith.addf %311, %310 : vector<2x16xf32>
    %313 = arith.divf %311, %312 : vector<2x16xf32>
    %314 = vector.extract_strided_slice %31 {offsets = [0, 32], sizes = [2, 16], strides = [1, 1]} : vector<2x48xf32> to vector<2x16xf32>
    %315 = vector.extract_strided_slice %297 {offsets = [0, 32], sizes = [2, 16], strides = [1, 1]} : vector<2x48xf32> to vector<2x16xf32>
    %316 = arith.mulf %305, %315 : vector<2x16xf32>
    %317 = arith.addf %314, %316 : vector<2x16xf32>
    %318 = math.tanh %317 : vector<2x16xf32>
    %cst_145 = arith.constant 1.000000e+00 : f32
    %319 = vector.broadcast %cst_145 : f32 to vector<2x16xf32>
    %320 = arith.subf %319, %313 : vector<2x16xf32>
    %321 = arith.mulf %320, %318 : vector<2x16xf32>
    %322 = arith.mulf %313, %288 : vector<2x16xf32>
    %323 = arith.addf %321, %322 : vector<2x16xf32>
    %cst_146 = arith.constant 0.000000e+00 : f32
    %324 = vector.broadcast %cst_146 : f32 to vector<2x16xf32>
    %325 = arith.maximumf %323, %324 : vector<2x16xf32>
    %c5_147 = arith.constant 5 : index
    %c0_148 = arith.constant 0 : index
    %c0_149 = arith.constant 0 : index
    %326 = vector.load %arg14[%c5_147, %c0_148, %c0_149] : memref<28x2x16xf32, #tpu.memory_space<vmem>>, vector<1x2x16xf32>
    %327 = vector.shape_cast %326 : vector<1x2x16xf32> to vector<2x16xf32>
    %328 = vector.shape_cast %325 : vector<2x16xf32> to vector<1x2x16xf32>
    tpu.vector_store %arg14[%c5_147, %c0_148, %c0_149], %328 {strides = array<i32>} : memref<28x2x16xf32, #tpu.memory_space<vmem>>, vector<1x2x16xf32>,
    %329 = vector.extract_strided_slice %323 {offsets = [1, 0], sizes = [1, 16], strides = [1, 1]} : vector<2x16xf32> to vector<1x16xf32>
    %c5_150 = arith.constant 5 : index
    %c0_151 = arith.constant 0 : index
    %330 = vector.load %arg12[%c5_150, %c0_151] : memref<28x16xf32, #tpu.memory_space<vmem>>, vector<1x16xf32>
    tpu.vector_store %arg12[%c5_150, %c0_151], %329 {strides = array<i32>} : memref<28x16xf32, #tpu.memory_space<vmem>>, vector<1x16xf32>,
    %cst_152 = arith.constant dense<0.000000e+00> : vector<2x48xf32>
    %331 = tpu.matmul %323, %1, %cst_152 {dimension_numbers = #tpu.dot_dimension_numbers<[1], [0], [0], [1], [0, 0, 1, 1], [], []>} : vector<2x16xf32>, vector<16x48xf32>, vector<2x48xf32> -> vector<2x48xf32>
    %332 = arith.addf %331, %7 : vector<2x48xf32>
    %333 = vector.extract_strided_slice %35 {offsets = [0, 0], sizes = [2, 16], strides = [1, 1]} : vector<2x48xf32> to vector<2x16xf32>
    %334 = vector.extract_strided_slice %332 {offsets = [0, 0], sizes = [2, 16], strides = [1, 1]} : vector<2x48xf32> to vector<2x16xf32>
    %335 = arith.addf %333, %334 : vector<2x16xf32>
    %336 = arith.negf %335 : vector<2x16xf32>
    %337 = math.exp %336 : vector<2x16xf32>
    %cst_153 = arith.constant 1.000000e+00 : f32
    %338 = vector.broadcast %cst_153 : f32 to vector<2x16xf32>
    %339 = arith.addf %338, %337 : vector<2x16xf32>
    %340 = arith.divf %338, %339 : vector<2x16xf32>
    %341 = vector.extract_strided_slice %35 {offsets = [0, 16], sizes = [2, 16], strides = [1, 1]} : vector<2x48xf32> to vector<2x16xf32>
    %342 = vector.extract_strided_slice %332 {offsets = [0, 16], sizes = [2, 16], strides = [1, 1]} : vector<2x48xf32> to vector<2x16xf32>
    %343 = arith.addf %341, %342 : vector<2x16xf32>
    %344 = arith.negf %343 : vector<2x16xf32>
    %345 = math.exp %344 : vector<2x16xf32>
    %cst_154 = arith.constant 1.000000e+00 : f32
    %346 = vector.broadcast %cst_154 : f32 to vector<2x16xf32>
    %347 = arith.addf %346, %345 : vector<2x16xf32>
    %348 = arith.divf %346, %347 : vector<2x16xf32>
    %349 = vector.extract_strided_slice %35 {offsets = [0, 32], sizes = [2, 16], strides = [1, 1]} : vector<2x48xf32> to vector<2x16xf32>
    %350 = vector.extract_strided_slice %332 {offsets = [0, 32], sizes = [2, 16], strides = [1, 1]} : vector<2x48xf32> to vector<2x16xf32>
    %351 = arith.mulf %340, %350 : vector<2x16xf32>
    %352 = arith.addf %349, %351 : vector<2x16xf32>
    %353 = math.tanh %352 : vector<2x16xf32>
    %cst_155 = arith.constant 1.000000e+00 : f32
    %354 = vector.broadcast %cst_155 : f32 to vector<2x16xf32>
    %355 = arith.subf %354, %348 : vector<2x16xf32>
    %356 = arith.mulf %355, %353 : vector<2x16xf32>
    %357 = arith.mulf %348, %323 : vector<2x16xf32>
    %358 = arith.addf %356, %357 : vector<2x16xf32>
    %cst_156 = arith.constant 0.000000e+00 : f32
    %359 = vector.broadcast %cst_156 : f32 to vector<2x16xf32>
    %360 = arith.maximumf %358, %359 : vector<2x16xf32>
    %c6_157 = arith.constant 6 : index
    %c0_158 = arith.constant 0 : index
    %c0_159 = arith.constant 0 : index
    %361 = vector.load %arg14[%c6_157, %c0_158, %c0_159] : memref<28x2x16xf32, #tpu.memory_space<vmem>>, vector<1x2x16xf32>
    %362 = vector.shape_cast %361 : vector<1x2x16xf32> to vector<2x16xf32>
    %363 = vector.shape_cast %360 : vector<2x16xf32> to vector<1x2x16xf32>
    tpu.vector_store %arg14[%c6_157, %c0_158, %c0_159], %363 {strides = array<i32>} : memref<28x2x16xf32, #tpu.memory_space<vmem>>, vector<1x2x16xf32>,
    %364 = vector.extract_strided_slice %358 {offsets = [1, 0], sizes = [1, 16], strides = [1, 1]} : vector<2x16xf32> to vector<1x16xf32>
    %c6_160 = arith.constant 6 : index
    %c0_161 = arith.constant 0 : index
    %365 = vector.load %arg12[%c6_160, %c0_161] : memref<28x16xf32, #tpu.memory_space<vmem>>, vector<1x16xf32>
    tpu.vector_store %arg12[%c6_160, %c0_161], %364 {strides = array<i32>} : memref<28x16xf32, #tpu.memory_space<vmem>>, vector<1x16xf32>,
    %cst_162 = arith.constant dense<0.000000e+00> : vector<2x48xf32>
    %366 = tpu.matmul %358, %1, %cst_162 {dimension_numbers = #tpu.dot_dimension_numbers<[1], [0], [0], [1], [0, 0, 1, 1], [], []>} : vector<2x16xf32>, vector<16x48xf32>, vector<2x48xf32> -> vector<2x48xf32>
    %367 = arith.addf %366, %7 : vector<2x48xf32>
    %368 = vector.extract_strided_slice %39 {offsets = [0, 0], sizes = [2, 16], strides = [1, 1]} : vector<2x48xf32> to vector<2x16xf32>
    %369 = vector.extract_strided_slice %367 {offsets = [0, 0], sizes = [2, 16], strides = [1, 1]} : vector<2x48xf32> to vector<2x16xf32>
    %370 = arith.addf %368, %369 : vector<2x16xf32>
    %371 = arith.negf %370 : vector<2x16xf32>
    %372 = math.exp %371 : vector<2x16xf32>
    %cst_163 = arith.constant 1.000000e+00 : f32
    %373 = vector.broadcast %cst_163 : f32 to vector<2x16xf32>
    %374 = arith.addf %373, %372 : vector<2x16xf32>
    %375 = arith.divf %373, %374 : vector<2x16xf32>
    %376 = vector.extract_strided_slice %39 {offsets = [0, 16], sizes = [2, 16], strides = [1, 1]} : vector<2x48xf32> to vector<2x16xf32>
    %377 = vector.extract_strided_slice %367 {offsets = [0, 16], sizes = [2, 16], strides = [1, 1]} : vector<2x48xf32> to vector<2x16xf32>
    %378 = arith.addf %376, %377 : vector<2x16xf32>
    %379 = arith.negf %378 : vector<2x16xf32>
    %380 = math.exp %379 : vector<2x16xf32>
    %cst_164 = arith.constant 1.000000e+00 : f32
    %381 = vector.broadcast %cst_164 : f32 to vector<2x16xf32>
    %382 = arith.addf %381, %380 : vector<2x16xf32>
    %383 = arith.divf %381, %382 : vector<2x16xf32>
    %384 = vector.extract_strided_slice %39 {offsets = [0, 32], sizes = [2, 16], strides = [1, 1]} : vector<2x48xf32> to vector<2x16xf32>
    %385 = vector.extract_strided_slice %367 {offsets = [0, 32], sizes = [2, 16], strides = [1, 1]} : vector<2x48xf32> to vector<2x16xf32>
    %386 = arith.mulf %375, %385 : vector<2x16xf32>
    %387 = arith.addf %384, %386 : vector<2x16xf32>
    %388 = math.tanh %387 : vector<2x16xf32>
    %cst_165 = arith.constant 1.000000e+00 : f32
    %389 = vector.broadcast %cst_165 : f32 to vector<2x16xf32>
    %390 = arith.subf %389, %383 : vector<2x16xf32>
    %391 = arith.mulf %390, %388 : vector<2x16xf32>
    %392 = arith.mulf %383, %358 : vector<2x16xf32>
    %393 = arith.addf %391, %392 : vector<2x16xf32>
    %cst_166 = arith.constant 0.000000e+00 : f32
    %394 = vector.broadcast %cst_166 : f32 to vector<2x16xf32>
    %395 = arith.maximumf %393, %394 : vector<2x16xf32>
    %c7_167 = arith.constant 7 : index
    %c0_168 = arith.constant 0 : index
    %c0_169 = arith.constant 0 : index
    %396 = vector.load %arg14[%c7_167, %c0_168, %c0_169] : memref<28x2x16xf32, #tpu.memory_space<vmem>>, vector<1x2x16xf32>
    %397 = vector.shape_cast %396 : vector<1x2x16xf32> to vector<2x16xf32>
    %398 = vector.shape_cast %395 : vector<2x16xf32> to vector<1x2x16xf32>
    tpu.vector_store %arg14[%c7_167, %c0_168, %c0_169], %398 {strides = array<i32>} : memref<28x2x16xf32, #tpu.memory_space<vmem>>, vector<1x2x16xf32>,
    %399 = vector.extract_strided_slice %393 {offsets = [1, 0], sizes = [1, 16], strides = [1, 1]} : vector<2x16xf32> to vector<1x16xf32>
    %c7_170 = arith.constant 7 : index
    %c0_171 = arith.constant 0 : index
    %400 = vector.load %arg12[%c7_170, %c0_171] : memref<28x16xf32, #tpu.memory_space<vmem>>, vector<1x16xf32>
    tpu.vector_store %arg12[%c7_170, %c0_171], %399 {strides = array<i32>} : memref<28x16xf32, #tpu.memory_space<vmem>>, vector<1x16xf32>,
    %cst_172 = arith.constant dense<0.000000e+00> : vector<2x48xf32>
    %401 = tpu.matmul %393, %1, %cst_172 {dimension_numbers = #tpu.dot_dimension_numbers<[1], [0], [0], [1], [0, 0, 1, 1], [], []>} : vector<2x16xf32>, vector<16x48xf32>, vector<2x48xf32> -> vector<2x48xf32>
    %402 = arith.addf %401, %7 : vector<2x48xf32>
    %403 = vector.extract_strided_slice %43 {offsets = [0, 0], sizes = [2, 16], strides = [1, 1]} : vector<2x48xf32> to vector<2x16xf32>
    %404 = vector.extract_strided_slice %402 {offsets = [0, 0], sizes = [2, 16], strides = [1, 1]} : vector<2x48xf32> to vector<2x16xf32>
    %405 = arith.addf %403, %404 : vector<2x16xf32>
    %406 = arith.negf %405 : vector<2x16xf32>
    %407 = math.exp %406 : vector<2x16xf32>
    %cst_173 = arith.constant 1.000000e+00 : f32
    %408 = vector.broadcast %cst_173 : f32 to vector<2x16xf32>
    %409 = arith.addf %408, %407 : vector<2x16xf32>
    %410 = arith.divf %408, %409 : vector<2x16xf32>
    %411 = vector.extract_strided_slice %43 {offsets = [0, 16], sizes = [2, 16], strides = [1, 1]} : vector<2x48xf32> to vector<2x16xf32>
    %412 = vector.extract_strided_slice %402 {offsets = [0, 16], sizes = [2, 16], strides = [1, 1]} : vector<2x48xf32> to vector<2x16xf32>
    %413 = arith.addf %411, %412 : vector<2x16xf32>
    %414 = arith.negf %413 : vector<2x16xf32>
    %415 = math.exp %414 : vector<2x16xf32>
    %cst_174 = arith.constant 1.000000e+00 : f32
    %416 = vector.broadcast %cst_174 : f32 to vector<2x16xf32>
    %417 = arith.addf %416, %415 : vector<2x16xf32>
    %418 = arith.divf %416, %417 : vector<2x16xf32>
    %419 = vector.extract_strided_slice %43 {offsets = [0, 32], sizes = [2, 16], strides = [1, 1]} : vector<2x48xf32> to vector<2x16xf32>
    %420 = vector.extract_strided_slice %402 {offsets = [0, 32], sizes = [2, 16], strides = [1, 1]} : vector<2x48xf32> to vector<2x16xf32>
    %421 = arith.mulf %410, %420 : vector<2x16xf32>
    %422 = arith.addf %419, %421 : vector<2x16xf32>
    %423 = math.tanh %422 : vector<2x16xf32>
    %cst_175 = arith.constant 1.000000e+00 : f32
    %424 = vector.broadcast %cst_175 : f32 to vector<2x16xf32>
    %425 = arith.subf %424, %418 : vector<2x16xf32>
    %426 = arith.mulf %425, %423 : vector<2x16xf32>
    %427 = arith.mulf %418, %393 : vector<2x16xf32>
    %428 = arith.addf %426, %427 : vector<2x16xf32>
    %cst_176 = arith.constant 0.000000e+00 : f32
    %429 = vector.broadcast %cst_176 : f32 to vector<2x16xf32>
    %430 = arith.maximumf %428, %429 : vector<2x16xf32>
    %c8_177 = arith.constant 8 : index
    %c0_178 = arith.constant 0 : index
    %c0_179 = arith.constant 0 : index
    %431 = vector.load %arg14[%c8_177, %c0_178, %c0_179] : memref<28x2x16xf32, #tpu.memory_space<vmem>>, vector<1x2x16xf32>
    %432 = vector.shape_cast %431 : vector<1x2x16xf32> to vector<2x16xf32>
    %433 = vector.shape_cast %430 : vector<2x16xf32> to vector<1x2x16xf32>
    tpu.vector_store %arg14[%c8_177, %c0_178, %c0_179], %433 {strides = array<i32>} : memref<28x2x16xf32, #tpu.memory_space<vmem>>, vector<1x2x16xf32>,
    %434 = vector.extract_strided_slice %428 {offsets = [1, 0], sizes = [1, 16], strides = [1, 1]} : vector<2x16xf32> to vector<1x16xf32>
    %c8_180 = arith.constant 8 : index
    %c0_181 = arith.constant 0 : index
    %435 = vector.load %arg12[%c8_180, %c0_181] : memref<28x16xf32, #tpu.memory_space<vmem>>, vector<1x16xf32>
    tpu.vector_store %arg12[%c8_180, %c0_181], %434 {strides = array<i32>} : memref<28x16xf32, #tpu.memory_space<vmem>>, vector<1x16xf32>,
    %cst_182 = arith.constant dense<0.000000e+00> : vector<2x48xf32>
    %436 = tpu.matmul %428, %1, %cst_182 {dimension_numbers = #tpu.dot_dimension_numbers<[1], [0], [0], [1], [0, 0, 1, 1], [], []>} : vector<2x16xf32>, vector<16x48xf32>, vector<2x48xf32> -> vector<2x48xf32>
    %437 = arith.addf %436, %7 : vector<2x48xf32>
    %438 = vector.extract_strided_slice %47 {offsets = [0, 0], sizes = [2, 16], strides = [1, 1]} : vector<2x48xf32> to vector<2x16xf32>
    %439 = vector.extract_strided_slice %437 {offsets = [0, 0], sizes = [2, 16], strides = [1, 1]} : vector<2x48xf32> to vector<2x16xf32>
    %440 = arith.addf %438, %439 : vector<2x16xf32>
    %441 = arith.negf %440 : vector<2x16xf32>
    %442 = math.exp %441 : vector<2x16xf32>
    %cst_183 = arith.constant 1.000000e+00 : f32
    %443 = vector.broadcast %cst_183 : f32 to vector<2x16xf32>
    %444 = arith.addf %443, %442 : vector<2x16xf32>
    %445 = arith.divf %443, %444 : vector<2x16xf32>
    %446 = vector.extract_strided_slice %47 {offsets = [0, 16], sizes = [2, 16], strides = [1, 1]} : vector<2x48xf32> to vector<2x16xf32>
    %447 = vector.extract_strided_slice %437 {offsets = [0, 16], sizes = [2, 16], strides = [1, 1]} : vector<2x48xf32> to vector<2x16xf32>
    %448 = arith.addf %446, %447 : vector<2x16xf32>
    %449 = arith.negf %448 : vector<2x16xf32>
    %450 = math.exp %449 : vector<2x16xf32>
    %cst_184 = arith.constant 1.000000e+00 : f32
    %451 = vector.broadcast %cst_184 : f32 to vector<2x16xf32>
    %452 = arith.addf %451, %450 : vector<2x16xf32>
    %453 = arith.divf %451, %452 : vector<2x16xf32>
    %454 = vector.extract_strided_slice %47 {offsets = [0, 32], sizes = [2, 16], strides = [1, 1]} : vector<2x48xf32> to vector<2x16xf32>
    %455 = vector.extract_strided_slice %437 {offsets = [0, 32], sizes = [2, 16], strides = [1, 1]} : vector<2x48xf32> to vector<2x16xf32>
    %456 = arith.mulf %445, %455 : vector<2x16xf32>
    %457 = arith.addf %454, %456 : vector<2x16xf32>
    %458 = math.tanh %457 : vector<2x16xf32>
    %cst_185 = arith.constant 1.000000e+00 : f32
    %459 = vector.broadcast %cst_185 : f32 to vector<2x16xf32>
    %460 = arith.subf %459, %453 : vector<2x16xf32>
    %461 = arith.mulf %460, %458 : vector<2x16xf32>
    %462 = arith.mulf %453, %428 : vector<2x16xf32>
    %463 = arith.addf %461, %462 : vector<2x16xf32>
    %cst_186 = arith.constant 0.000000e+00 : f32
    %464 = vector.broadcast %cst_186 : f32 to vector<2x16xf32>
    %465 = arith.maximumf %463, %464 : vector<2x16xf32>
    %c9_187 = arith.constant 9 : index
    %c0_188 = arith.constant 0 : index
    %c0_189 = arith.constant 0 : index
    %466 = vector.load %arg14[%c9_187, %c0_188, %c0_189] : memref<28x2x16xf32, #tpu.memory_space<vmem>>, vector<1x2x16xf32>
    %467 = vector.shape_cast %466 : vector<1x2x16xf32> to vector<2x16xf32>
    %468 = vector.shape_cast %465 : vector<2x16xf32> to vector<1x2x16xf32>
    tpu.vector_store %arg14[%c9_187, %c0_188, %c0_189], %468 {strides = array<i32>} : memref<28x2x16xf32, #tpu.memory_space<vmem>>, vector<1x2x16xf32>,
    %469 = vector.extract_strided_slice %463 {offsets = [1, 0], sizes = [1, 16], strides = [1, 1]} : vector<2x16xf32> to vector<1x16xf32>
    %c9_190 = arith.constant 9 : index
    %c0_191 = arith.constant 0 : index
    %470 = vector.load %arg12[%c9_190, %c0_191] : memref<28x16xf32, #tpu.memory_space<vmem>>, vector<1x16xf32>
    tpu.vector_store %arg12[%c9_190, %c0_191], %469 {strides = array<i32>} : memref<28x16xf32, #tpu.memory_space<vmem>>, vector<1x16xf32>,
    %cst_192 = arith.constant dense<0.000000e+00> : vector<2x48xf32>
    %471 = tpu.matmul %463, %1, %cst_192 {dimension_numbers = #tpu.dot_dimension_numbers<[1], [0], [0], [1], [0, 0, 1, 1], [], []>} : vector<2x16xf32>, vector<16x48xf32>, vector<2x48xf32> -> vector<2x48xf32>
    %472 = arith.addf %471, %7 : vector<2x48xf32>
    %473 = vector.extract_strided_slice %51 {offsets = [0, 0], sizes = [2, 16], strides = [1, 1]} : vector<2x48xf32> to vector<2x16xf32>
    %474 = vector.extract_strided_slice %472 {offsets = [0, 0], sizes = [2, 16], strides = [1, 1]} : vector<2x48xf32> to vector<2x16xf32>
    %475 = arith.addf %473, %474 : vector<2x16xf32>
    %476 = arith.negf %475 : vector<2x16xf32>
    %477 = math.exp %476 : vector<2x16xf32>
    %cst_193 = arith.constant 1.000000e+00 : f32
    %478 = vector.broadcast %cst_193 : f32 to vector<2x16xf32>
    %479 = arith.addf %478, %477 : vector<2x16xf32>
    %480 = arith.divf %478, %479 : vector<2x16xf32>
    %481 = vector.extract_strided_slice %51 {offsets = [0, 16], sizes = [2, 16], strides = [1, 1]} : vector<2x48xf32> to vector<2x16xf32>
    %482 = vector.extract_strided_slice %472 {offsets = [0, 16], sizes = [2, 16], strides = [1, 1]} : vector<2x48xf32> to vector<2x16xf32>
    %483 = arith.addf %481, %482 : vector<2x16xf32>
    %484 = arith.negf %483 : vector<2x16xf32>
    %485 = math.exp %484 : vector<2x16xf32>
    %cst_194 = arith.constant 1.000000e+00 : f32
    %486 = vector.broadcast %cst_194 : f32 to vector<2x16xf32>
    %487 = arith.addf %486, %485 : vector<2x16xf32>
    %488 = arith.divf %486, %487 : vector<2x16xf32>
    %489 = vector.extract_strided_slice %51 {offsets = [0, 32], sizes = [2, 16], strides = [1, 1]} : vector<2x48xf32> to vector<2x16xf32>
    %490 = vector.extract_strided_slice %472 {offsets = [0, 32], sizes = [2, 16], strides = [1, 1]} : vector<2x48xf32> to vector<2x16xf32>
    %491 = arith.mulf %480, %490 : vector<2x16xf32>
    %492 = arith.addf %489, %491 : vector<2x16xf32>
    %493 = math.tanh %492 : vector<2x16xf32>
    %cst_195 = arith.constant 1.000000e+00 : f32
    %494 = vector.broadcast %cst_195 : f32 to vector<2x16xf32>
    %495 = arith.subf %494, %488 : vector<2x16xf32>
    %496 = arith.mulf %495, %493 : vector<2x16xf32>
    %497 = arith.mulf %488, %463 : vector<2x16xf32>
    %498 = arith.addf %496, %497 : vector<2x16xf32>
    %cst_196 = arith.constant 0.000000e+00 : f32
    %499 = vector.broadcast %cst_196 : f32 to vector<2x16xf32>
    %500 = arith.maximumf %498, %499 : vector<2x16xf32>
    %c10_197 = arith.constant 10 : index
    %c0_198 = arith.constant 0 : index
    %c0_199 = arith.constant 0 : index
    %501 = vector.load %arg14[%c10_197, %c0_198, %c0_199] : memref<28x2x16xf32, #tpu.memory_space<vmem>>, vector<1x2x16xf32>
    %502 = vector.shape_cast %501 : vector<1x2x16xf32> to vector<2x16xf32>
    %503 = vector.shape_cast %500 : vector<2x16xf32> to vector<1x2x16xf32>
    tpu.vector_store %arg14[%c10_197, %c0_198, %c0_199], %503 {strides = array<i32>} : memref<28x2x16xf32, #tpu.memory_space<vmem>>, vector<1x2x16xf32>,
    %504 = vector.extract_strided_slice %498 {offsets = [1, 0], sizes = [1, 16], strides = [1, 1]} : vector<2x16xf32> to vector<1x16xf32>
    %c10_200 = arith.constant 10 : index
    %c0_201 = arith.constant 0 : index
    %505 = vector.load %arg12[%c10_200, %c0_201] : memref<28x16xf32, #tpu.memory_space<vmem>>, vector<1x16xf32>
    tpu.vector_store %arg12[%c10_200, %c0_201], %504 {strides = array<i32>} : memref<28x16xf32, #tpu.memory_space<vmem>>, vector<1x16xf32>,
    %cst_202 = arith.constant dense<0.000000e+00> : vector<2x48xf32>
    %506 = tpu.matmul %498, %1, %cst_202 {dimension_numbers = #tpu.dot_dimension_numbers<[1], [0], [0], [1], [0, 0, 1, 1], [], []>} : vector<2x16xf32>, vector<16x48xf32>, vector<2x48xf32> -> vector<2x48xf32>
    %507 = arith.addf %506, %7 : vector<2x48xf32>
    %508 = vector.extract_strided_slice %55 {offsets = [0, 0], sizes = [2, 16], strides = [1, 1]} : vector<2x48xf32> to vector<2x16xf32>
    %509 = vector.extract_strided_slice %507 {offsets = [0, 0], sizes = [2, 16], strides = [1, 1]} : vector<2x48xf32> to vector<2x16xf32>
    %510 = arith.addf %508, %509 : vector<2x16xf32>
    %511 = arith.negf %510 : vector<2x16xf32>
    %512 = math.exp %511 : vector<2x16xf32>
    %cst_203 = arith.constant 1.000000e+00 : f32
    %513 = vector.broadcast %cst_203 : f32 to vector<2x16xf32>
    %514 = arith.addf %513, %512 : vector<2x16xf32>
    %515 = arith.divf %513, %514 : vector<2x16xf32>
    %516 = vector.extract_strided_slice %55 {offsets = [0, 16], sizes = [2, 16], strides = [1, 1]} : vector<2x48xf32> to vector<2x16xf32>
    %517 = vector.extract_strided_slice %507 {offsets = [0, 16], sizes = [2, 16], strides = [1, 1]} : vector<2x48xf32> to vector<2x16xf32>
    %518 = arith.addf %516, %517 : vector<2x16xf32>
    %519 = arith.negf %518 : vector<2x16xf32>
    %520 = math.exp %519 : vector<2x16xf32>
    %cst_204 = arith.constant 1.000000e+00 : f32
    %521 = vector.broadcast %cst_204 : f32 to vector<2x16xf32>
    %522 = arith.addf %521, %520 : vector<2x16xf32>
    %523 = arith.divf %521, %522 : vector<2x16xf32>
    %524 = vector.extract_strided_slice %55 {offsets = [0, 32], sizes = [2, 16], strides = [1, 1]} : vector<2x48xf32> to vector<2x16xf32>
    %525 = vector.extract_strided_slice %507 {offsets = [0, 32], sizes = [2, 16], strides = [1, 1]} : vector<2x48xf32> to vector<2x16xf32>
    %526 = arith.mulf %515, %525 : vector<2x16xf32>
    %527 = arith.addf %524, %526 : vector<2x16xf32>
    %528 = math.tanh %527 : vector<2x16xf32>
    %cst_205 = arith.constant 1.000000e+00 : f32
    %529 = vector.broadcast %cst_205 : f32 to vector<2x16xf32>
    %530 = arith.subf %529, %523 : vector<2x16xf32>
    %531 = arith.mulf %530, %528 : vector<2x16xf32>
    %532 = arith.mulf %523, %498 : vector<2x16xf32>
    %533 = arith.addf %531, %532 : vector<2x16xf32>
    %cst_206 = arith.constant 0.000000e+00 : f32
    %534 = vector.broadcast %cst_206 : f32 to vector<2x16xf32>
    %535 = arith.maximumf %533, %534 : vector<2x16xf32>
    %c11_207 = arith.constant 11 : index
    %c0_208 = arith.constant 0 : index
    %c0_209 = arith.constant 0 : index
    %536 = vector.load %arg14[%c11_207, %c0_208, %c0_209] : memref<28x2x16xf32, #tpu.memory_space<vmem>>, vector<1x2x16xf32>
    %537 = vector.shape_cast %536 : vector<1x2x16xf32> to vector<2x16xf32>
    %538 = vector.shape_cast %535 : vector<2x16xf32> to vector<1x2x16xf32>
    tpu.vector_store %arg14[%c11_207, %c0_208, %c0_209], %538 {strides = array<i32>} : memref<28x2x16xf32, #tpu.memory_space<vmem>>, vector<1x2x16xf32>,
    %539 = vector.extract_strided_slice %533 {offsets = [1, 0], sizes = [1, 16], strides = [1, 1]} : vector<2x16xf32> to vector<1x16xf32>
    %c11_210 = arith.constant 11 : index
    %c0_211 = arith.constant 0 : index
    %540 = vector.load %arg12[%c11_210, %c0_211] : memref<28x16xf32, #tpu.memory_space<vmem>>, vector<1x16xf32>
    tpu.vector_store %arg12[%c11_210, %c0_211], %539 {strides = array<i32>} : memref<28x16xf32, #tpu.memory_space<vmem>>, vector<1x16xf32>,
    %cst_212 = arith.constant dense<0.000000e+00> : vector<2x48xf32>
    %541 = tpu.matmul %533, %1, %cst_212 {dimension_numbers = #tpu.dot_dimension_numbers<[1], [0], [0], [1], [0, 0, 1, 1], [], []>} : vector<2x16xf32>, vector<16x48xf32>, vector<2x48xf32> -> vector<2x48xf32>
    %542 = arith.addf %541, %7 : vector<2x48xf32>
    %543 = vector.extract_strided_slice %59 {offsets = [0, 0], sizes = [2, 16], strides = [1, 1]} : vector<2x48xf32> to vector<2x16xf32>
    %544 = vector.extract_strided_slice %542 {offsets = [0, 0], sizes = [2, 16], strides = [1, 1]} : vector<2x48xf32> to vector<2x16xf32>
    %545 = arith.addf %543, %544 : vector<2x16xf32>
    %546 = arith.negf %545 : vector<2x16xf32>
    %547 = math.exp %546 : vector<2x16xf32>
    %cst_213 = arith.constant 1.000000e+00 : f32
    %548 = vector.broadcast %cst_213 : f32 to vector<2x16xf32>
    %549 = arith.addf %548, %547 : vector<2x16xf32>
    %550 = arith.divf %548, %549 : vector<2x16xf32>
    %551 = vector.extract_strided_slice %59 {offsets = [0, 16], sizes = [2, 16], strides = [1, 1]} : vector<2x48xf32> to vector<2x16xf32>
    %552 = vector.extract_strided_slice %542 {offsets = [0, 16], sizes = [2, 16], strides = [1, 1]} : vector<2x48xf32> to vector<2x16xf32>
    %553 = arith.addf %551, %552 : vector<2x16xf32>
    %554 = arith.negf %553 : vector<2x16xf32>
    %555 = math.exp %554 : vector<2x16xf32>
    %cst_214 = arith.constant 1.000000e+00 : f32
    %556 = vector.broadcast %cst_214 : f32 to vector<2x16xf32>
    %557 = arith.addf %556, %555 : vector<2x16xf32>
    %558 = arith.divf %556, %557 : vector<2x16xf32>
    %559 = vector.extract_strided_slice %59 {offsets = [0, 32], sizes = [2, 16], strides = [1, 1]} : vector<2x48xf32> to vector<2x16xf32>
    %560 = vector.extract_strided_slice %542 {offsets = [0, 32], sizes = [2, 16], strides = [1, 1]} : vector<2x48xf32> to vector<2x16xf32>
    %561 = arith.mulf %550, %560 : vector<2x16xf32>
    %562 = arith.addf %559, %561 : vector<2x16xf32>
    %563 = math.tanh %562 : vector<2x16xf32>
    %cst_215 = arith.constant 1.000000e+00 : f32
    %564 = vector.broadcast %cst_215 : f32 to vector<2x16xf32>
    %565 = arith.subf %564, %558 : vector<2x16xf32>
    %566 = arith.mulf %565, %563 : vector<2x16xf32>
    %567 = arith.mulf %558, %533 : vector<2x16xf32>
    %568 = arith.addf %566, %567 : vector<2x16xf32>
    %cst_216 = arith.constant 0.000000e+00 : f32
    %569 = vector.broadcast %cst_216 : f32 to vector<2x16xf32>
    %570 = arith.maximumf %568, %569 : vector<2x16xf32>
    %c12_217 = arith.constant 12 : index
    %c0_218 = arith.constant 0 : index
    %c0_219 = arith.constant 0 : index
    %571 = vector.load %arg14[%c12_217, %c0_218, %c0_219] : memref<28x2x16xf32, #tpu.memory_space<vmem>>, vector<1x2x16xf32>
    %572 = vector.shape_cast %571 : vector<1x2x16xf32> to vector<2x16xf32>
    %573 = vector.shape_cast %570 : vector<2x16xf32> to vector<1x2x16xf32>
    tpu.vector_store %arg14[%c12_217, %c0_218, %c0_219], %573 {strides = array<i32>} : memref<28x2x16xf32, #tpu.memory_space<vmem>>, vector<1x2x16xf32>,
    %574 = vector.extract_strided_slice %568 {offsets = [1, 0], sizes = [1, 16], strides = [1, 1]} : vector<2x16xf32> to vector<1x16xf32>
    %c12_220 = arith.constant 12 : index
    %c0_221 = arith.constant 0 : index
    %575 = vector.load %arg12[%c12_220, %c0_221] : memref<28x16xf32, #tpu.memory_space<vmem>>, vector<1x16xf32>
    tpu.vector_store %arg12[%c12_220, %c0_221], %574 {strides = array<i32>} : memref<28x16xf32, #tpu.memory_space<vmem>>, vector<1x16xf32>,
    %cst_222 = arith.constant dense<0.000000e+00> : vector<2x48xf32>
    %576 = tpu.matmul %568, %1, %cst_222 {dimension_numbers = #tpu.dot_dimension_numbers<[1], [0], [0], [1], [0, 0, 1, 1], [], []>} : vector<2x16xf32>, vector<16x48xf32>, vector<2x48xf32> -> vector<2x48xf32>
    %577 = arith.addf %576, %7 : vector<2x48xf32>
    %578 = vector.extract_strided_slice %63 {offsets = [0, 0], sizes = [2, 16], strides = [1, 1]} : vector<2x48xf32> to vector<2x16xf32>
    %579 = vector.extract_strided_slice %577 {offsets = [0, 0], sizes = [2, 16], strides = [1, 1]} : vector<2x48xf32> to vector<2x16xf32>
    %580 = arith.addf %578, %579 : vector<2x16xf32>
    %581 = arith.negf %580 : vector<2x16xf32>
    %582 = math.exp %581 : vector<2x16xf32>
    %cst_223 = arith.constant 1.000000e+00 : f32
    %583 = vector.broadcast %cst_223 : f32 to vector<2x16xf32>
    %584 = arith.addf %583, %582 : vector<2x16xf32>
    %585 = arith.divf %583, %584 : vector<2x16xf32>
    %586 = vector.extract_strided_slice %63 {offsets = [0, 16], sizes = [2, 16], strides = [1, 1]} : vector<2x48xf32> to vector<2x16xf32>
    %587 = vector.extract_strided_slice %577 {offsets = [0, 16], sizes = [2, 16], strides = [1, 1]} : vector<2x48xf32> to vector<2x16xf32>
    %588 = arith.addf %586, %587 : vector<2x16xf32>
    %589 = arith.negf %588 : vector<2x16xf32>
    %590 = math.exp %589 : vector<2x16xf32>
    %cst_224 = arith.constant 1.000000e+00 : f32
    %591 = vector.broadcast %cst_224 : f32 to vector<2x16xf32>
    %592 = arith.addf %591, %590 : vector<2x16xf32>
    %593 = arith.divf %591, %592 : vector<2x16xf32>
    %594 = vector.extract_strided_slice %63 {offsets = [0, 32], sizes = [2, 16], strides = [1, 1]} : vector<2x48xf32> to vector<2x16xf32>
    %595 = vector.extract_strided_slice %577 {offsets = [0, 32], sizes = [2, 16], strides = [1, 1]} : vector<2x48xf32> to vector<2x16xf32>
    %596 = arith.mulf %585, %595 : vector<2x16xf32>
    %597 = arith.addf %594, %596 : vector<2x16xf32>
    %598 = math.tanh %597 : vector<2x16xf32>
    %cst_225 = arith.constant 1.000000e+00 : f32
    %599 = vector.broadcast %cst_225 : f32 to vector<2x16xf32>
    %600 = arith.subf %599, %593 : vector<2x16xf32>
    %601 = arith.mulf %600, %598 : vector<2x16xf32>
    %602 = arith.mulf %593, %568 : vector<2x16xf32>
    %603 = arith.addf %601, %602 : vector<2x16xf32>
    %cst_226 = arith.constant 0.000000e+00 : f32
    %604 = vector.broadcast %cst_226 : f32 to vector<2x16xf32>
    %605 = arith.maximumf %603, %604 : vector<2x16xf32>
    %c13_227 = arith.constant 13 : index
    %c0_228 = arith.constant 0 : index
    %c0_229 = arith.constant 0 : index
    %606 = vector.load %arg14[%c13_227, %c0_228, %c0_229] : memref<28x2x16xf32, #tpu.memory_space<vmem>>, vector<1x2x16xf32>
    %607 = vector.shape_cast %606 : vector<1x2x16xf32> to vector<2x16xf32>
    %608 = vector.shape_cast %605 : vector<2x16xf32> to vector<1x2x16xf32>
    tpu.vector_store %arg14[%c13_227, %c0_228, %c0_229], %608 {strides = array<i32>} : memref<28x2x16xf32, #tpu.memory_space<vmem>>, vector<1x2x16xf32>,
    %609 = vector.extract_strided_slice %603 {offsets = [1, 0], sizes = [1, 16], strides = [1, 1]} : vector<2x16xf32> to vector<1x16xf32>
    %c13_230 = arith.constant 13 : index
    %c0_231 = arith.constant 0 : index
    %610 = vector.load %arg12[%c13_230, %c0_231] : memref<28x16xf32, #tpu.memory_space<vmem>>, vector<1x16xf32>
    tpu.vector_store %arg12[%c13_230, %c0_231], %609 {strides = array<i32>} : memref<28x16xf32, #tpu.memory_space<vmem>>, vector<1x16xf32>,
    %cst_232 = arith.constant dense<0.000000e+00> : vector<2x48xf32>
    %611 = tpu.matmul %603, %1, %cst_232 {dimension_numbers = #tpu.dot_dimension_numbers<[1], [0], [0], [1], [0, 0, 1, 1], [], []>} : vector<2x16xf32>, vector<16x48xf32>, vector<2x48xf32> -> vector<2x48xf32>
    %612 = arith.addf %611, %7 : vector<2x48xf32>
    %613 = vector.extract_strided_slice %67 {offsets = [0, 0], sizes = [2, 16], strides = [1, 1]} : vector<2x48xf32> to vector<2x16xf32>
    %614 = vector.extract_strided_slice %612 {offsets = [0, 0], sizes = [2, 16], strides = [1, 1]} : vector<2x48xf32> to vector<2x16xf32>
    %615 = arith.addf %613, %614 : vector<2x16xf32>
    %616 = arith.negf %615 : vector<2x16xf32>
    %617 = math.exp %616 : vector<2x16xf32>
    %cst_233 = arith.constant 1.000000e+00 : f32
    %618 = vector.broadcast %cst_233 : f32 to vector<2x16xf32>
    %619 = arith.addf %618, %617 : vector<2x16xf32>
    %620 = arith.divf %618, %619 : vector<2x16xf32>
    %621 = vector.extract_strided_slice %67 {offsets = [0, 16], sizes = [2, 16], strides = [1, 1]} : vector<2x48xf32> to vector<2x16xf32>
    %622 = vector.extract_strided_slice %612 {offsets = [0, 16], sizes = [2, 16], strides = [1, 1]} : vector<2x48xf32> to vector<2x16xf32>
    %623 = arith.addf %621, %622 : vector<2x16xf32>
    %624 = arith.negf %623 : vector<2x16xf32>
    %625 = math.exp %624 : vector<2x16xf32>
    %cst_234 = arith.constant 1.000000e+00 : f32
    %626 = vector.broadcast %cst_234 : f32 to vector<2x16xf32>
    %627 = arith.addf %626, %625 : vector<2x16xf32>
    %628 = arith.divf %626, %627 : vector<2x16xf32>
    %629 = vector.extract_strided_slice %67 {offsets = [0, 32], sizes = [2, 16], strides = [1, 1]} : vector<2x48xf32> to vector<2x16xf32>
    %630 = vector.extract_strided_slice %612 {offsets = [0, 32], sizes = [2, 16], strides = [1, 1]} : vector<2x48xf32> to vector<2x16xf32>
    %631 = arith.mulf %620, %630 : vector<2x16xf32>
    %632 = arith.addf %629, %631 : vector<2x16xf32>
    %633 = math.tanh %632 : vector<2x16xf32>
    %cst_235 = arith.constant 1.000000e+00 : f32
    %634 = vector.broadcast %cst_235 : f32 to vector<2x16xf32>
    %635 = arith.subf %634, %628 : vector<2x16xf32>
    %636 = arith.mulf %635, %633 : vector<2x16xf32>
    %637 = arith.mulf %628, %603 : vector<2x16xf32>
    %638 = arith.addf %636, %637 : vector<2x16xf32>
    %cst_236 = arith.constant 0.000000e+00 : f32
    %639 = vector.broadcast %cst_236 : f32 to vector<2x16xf32>
    %640 = arith.maximumf %638, %639 : vector<2x16xf32>
    %c14_237 = arith.constant 14 : index
    %c0_238 = arith.constant 0 : index
    %c0_239 = arith.constant 0 : index
    %641 = vector.load %arg14[%c14_237, %c0_238, %c0_239] : memref<28x2x16xf32, #tpu.memory_space<vmem>>, vector<1x2x16xf32>
    %642 = vector.shape_cast %641 : vector<1x2x16xf32> to vector<2x16xf32>
    %643 = vector.shape_cast %640 : vector<2x16xf32> to vector<1x2x16xf32>
    tpu.vector_store %arg14[%c14_237, %c0_238, %c0_239], %643 {strides = array<i32>} : memref<28x2x16xf32, #tpu.memory_space<vmem>>, vector<1x2x16xf32>,
    %644 = vector.extract_strided_slice %638 {offsets = [1, 0], sizes = [1, 16], strides = [1, 1]} : vector<2x16xf32> to vector<1x16xf32>
    %c14_240 = arith.constant 14 : index
    %c0_241 = arith.constant 0 : index
    %645 = vector.load %arg12[%c14_240, %c0_241] : memref<28x16xf32, #tpu.memory_space<vmem>>, vector<1x16xf32>
    tpu.vector_store %arg12[%c14_240, %c0_241], %644 {strides = array<i32>} : memref<28x16xf32, #tpu.memory_space<vmem>>, vector<1x16xf32>,
    %cst_242 = arith.constant dense<0.000000e+00> : vector<2x48xf32>
    %646 = tpu.matmul %638, %1, %cst_242 {dimension_numbers = #tpu.dot_dimension_numbers<[1], [0], [0], [1], [0, 0, 1, 1], [], []>} : vector<2x16xf32>, vector<16x48xf32>, vector<2x48xf32> -> vector<2x48xf32>
    %647 = arith.addf %646, %7 : vector<2x48xf32>
    %648 = vector.extract_strided_slice %71 {offsets = [0, 0], sizes = [2, 16], strides = [1, 1]} : vector<2x48xf32> to vector<2x16xf32>
    %649 = vector.extract_strided_slice %647 {offsets = [0, 0], sizes = [2, 16], strides = [1, 1]} : vector<2x48xf32> to vector<2x16xf32>
    %650 = arith.addf %648, %649 : vector<2x16xf32>
    %651 = arith.negf %650 : vector<2x16xf32>
    %652 = math.exp %651 : vector<2x16xf32>
    %cst_243 = arith.constant 1.000000e+00 : f32
    %653 = vector.broadcast %cst_243 : f32 to vector<2x16xf32>
    %654 = arith.addf %653, %652 : vector<2x16xf32>
    %655 = arith.divf %653, %654 : vector<2x16xf32>
    %656 = vector.extract_strided_slice %71 {offsets = [0, 16], sizes = [2, 16], strides = [1, 1]} : vector<2x48xf32> to vector<2x16xf32>
    %657 = vector.extract_strided_slice %647 {offsets = [0, 16], sizes = [2, 16], strides = [1, 1]} : vector<2x48xf32> to vector<2x16xf32>
    %658 = arith.addf %656, %657 : vector<2x16xf32>
    %659 = arith.negf %658 : vector<2x16xf32>
    %660 = math.exp %659 : vector<2x16xf32>
    %cst_244 = arith.constant 1.000000e+00 : f32
    %661 = vector.broadcast %cst_244 : f32 to vector<2x16xf32>
    %662 = arith.addf %661, %660 : vector<2x16xf32>
    %663 = arith.divf %661, %662 : vector<2x16xf32>
    %664 = vector.extract_strided_slice %71 {offsets = [0, 32], sizes = [2, 16], strides = [1, 1]} : vector<2x48xf32> to vector<2x16xf32>
    %665 = vector.extract_strided_slice %647 {offsets = [0, 32], sizes = [2, 16], strides = [1, 1]} : vector<2x48xf32> to vector<2x16xf32>
    %666 = arith.mulf %655, %665 : vector<2x16xf32>
    %667 = arith.addf %664, %666 : vector<2x16xf32>
    %668 = math.tanh %667 : vector<2x16xf32>
    %cst_245 = arith.constant 1.000000e+00 : f32
    %669 = vector.broadcast %cst_245 : f32 to vector<2x16xf32>
    %670 = arith.subf %669, %663 : vector<2x16xf32>
    %671 = arith.mulf %670, %668 : vector<2x16xf32>
    %672 = arith.mulf %663, %638 : vector<2x16xf32>
    %673 = arith.addf %671, %672 : vector<2x16xf32>
    %cst_246 = arith.constant 0.000000e+00 : f32
    %674 = vector.broadcast %cst_246 : f32 to vector<2x16xf32>
    %675 = arith.maximumf %673, %674 : vector<2x16xf32>
    %c15_247 = arith.constant 15 : index
    %c0_248 = arith.constant 0 : index
    %c0_249 = arith.constant 0 : index
    %676 = vector.load %arg14[%c15_247, %c0_248, %c0_249] : memref<28x2x16xf32, #tpu.memory_space<vmem>>, vector<1x2x16xf32>
    %677 = vector.shape_cast %676 : vector<1x2x16xf32> to vector<2x16xf32>
    %678 = vector.shape_cast %675 : vector<2x16xf32> to vector<1x2x16xf32>
    tpu.vector_store %arg14[%c15_247, %c0_248, %c0_249], %678 {strides = array<i32>} : memref<28x2x16xf32, #tpu.memory_space<vmem>>, vector<1x2x16xf32>,
    %679 = vector.extract_strided_slice %673 {offsets = [1, 0], sizes = [1, 16], strides = [1, 1]} : vector<2x16xf32> to vector<1x16xf32>
    %c15_250 = arith.constant 15 : index
    %c0_251 = arith.constant 0 : index
    %680 = vector.load %arg12[%c15_250, %c0_251] : memref<28x16xf32, #tpu.memory_space<vmem>>, vector<1x16xf32>
    tpu.vector_store %arg12[%c15_250, %c0_251], %679 {strides = array<i32>} : memref<28x16xf32, #tpu.memory_space<vmem>>, vector<1x16xf32>,
    %cst_252 = arith.constant dense<0.000000e+00> : vector<2x48xf32>
    %681 = tpu.matmul %673, %1, %cst_252 {dimension_numbers = #tpu.dot_dimension_numbers<[1], [0], [0], [1], [0, 0, 1, 1], [], []>} : vector<2x16xf32>, vector<16x48xf32>, vector<2x48xf32> -> vector<2x48xf32>
    %682 = arith.addf %681, %7 : vector<2x48xf32>
    %683 = vector.extract_strided_slice %75 {offsets = [0, 0], sizes = [2, 16], strides = [1, 1]} : vector<2x48xf32> to vector<2x16xf32>
    %684 = vector.extract_strided_slice %682 {offsets = [0, 0], sizes = [2, 16], strides = [1, 1]} : vector<2x48xf32> to vector<2x16xf32>
    %685 = arith.addf %683, %684 : vector<2x16xf32>
    %686 = arith.negf %685 : vector<2x16xf32>
    %687 = math.exp %686 : vector<2x16xf32>
    %cst_253 = arith.constant 1.000000e+00 : f32
    %688 = vector.broadcast %cst_253 : f32 to vector<2x16xf32>
    %689 = arith.addf %688, %687 : vector<2x16xf32>
    %690 = arith.divf %688, %689 : vector<2x16xf32>
    %691 = vector.extract_strided_slice %75 {offsets = [0, 16], sizes = [2, 16], strides = [1, 1]} : vector<2x48xf32> to vector<2x16xf32>
    %692 = vector.extract_strided_slice %682 {offsets = [0, 16], sizes = [2, 16], strides = [1, 1]} : vector<2x48xf32> to vector<2x16xf32>
    %693 = arith.addf %691, %692 : vector<2x16xf32>
    %694 = arith.negf %693 : vector<2x16xf32>
    %695 = math.exp %694 : vector<2x16xf32>
    %cst_254 = arith.constant 1.000000e+00 : f32
    %696 = vector.broadcast %cst_254 : f32 to vector<2x16xf32>
    %697 = arith.addf %696, %695 : vector<2x16xf32>
    %698 = arith.divf %696, %697 : vector<2x16xf32>
    %699 = vector.extract_strided_slice %75 {offsets = [0, 32], sizes = [2, 16], strides = [1, 1]} : vector<2x48xf32> to vector<2x16xf32>
    %700 = vector.extract_strided_slice %682 {offsets = [0, 32], sizes = [2, 16], strides = [1, 1]} : vector<2x48xf32> to vector<2x16xf32>
    %701 = arith.mulf %690, %700 : vector<2x16xf32>
    %702 = arith.addf %699, %701 : vector<2x16xf32>
    %703 = math.tanh %702 : vector<2x16xf32>
    %cst_255 = arith.constant 1.000000e+00 : f32
    %704 = vector.broadcast %cst_255 : f32 to vector<2x16xf32>
    %705 = arith.subf %704, %698 : vector<2x16xf32>
    %706 = arith.mulf %705, %703 : vector<2x16xf32>
    %707 = arith.mulf %698, %673 : vector<2x16xf32>
    %708 = arith.addf %706, %707 : vector<2x16xf32>
    %cst_256 = arith.constant 0.000000e+00 : f32
    %709 = vector.broadcast %cst_256 : f32 to vector<2x16xf32>
    %710 = arith.maximumf %708, %709 : vector<2x16xf32>
    %c16_257 = arith.constant 16 : index
    %c0_258 = arith.constant 0 : index
    %c0_259 = arith.constant 0 : index
    %711 = vector.load %arg14[%c16_257, %c0_258, %c0_259] : memref<28x2x16xf32, #tpu.memory_space<vmem>>, vector<1x2x16xf32>
    %712 = vector.shape_cast %711 : vector<1x2x16xf32> to vector<2x16xf32>
    %713 = vector.shape_cast %710 : vector<2x16xf32> to vector<1x2x16xf32>
    tpu.vector_store %arg14[%c16_257, %c0_258, %c0_259], %713 {strides = array<i32>} : memref<28x2x16xf32, #tpu.memory_space<vmem>>, vector<1x2x16xf32>,
    %714 = vector.extract_strided_slice %708 {offsets = [1, 0], sizes = [1, 16], strides = [1, 1]} : vector<2x16xf32> to vector<1x16xf32>
    %c16_260 = arith.constant 16 : index
    %c0_261 = arith.constant 0 : index
    %715 = vector.load %arg12[%c16_260, %c0_261] : memref<28x16xf32, #tpu.memory_space<vmem>>, vector<1x16xf32>
    tpu.vector_store %arg12[%c16_260, %c0_261], %714 {strides = array<i32>} : memref<28x16xf32, #tpu.memory_space<vmem>>, vector<1x16xf32>,
    %cst_262 = arith.constant dense<0.000000e+00> : vector<2x48xf32>
    %716 = tpu.matmul %708, %1, %cst_262 {dimension_numbers = #tpu.dot_dimension_numbers<[1], [0], [0], [1], [0, 0, 1, 1], [], []>} : vector<2x16xf32>, vector<16x48xf32>, vector<2x48xf32> -> vector<2x48xf32>
    %717 = arith.addf %716, %7 : vector<2x48xf32>
    %718 = vector.extract_strided_slice %79 {offsets = [0, 0], sizes = [2, 16], strides = [1, 1]} : vector<2x48xf32> to vector<2x16xf32>
    %719 = vector.extract_strided_slice %717 {offsets = [0, 0], sizes = [2, 16], strides = [1, 1]} : vector<2x48xf32> to vector<2x16xf32>
    %720 = arith.addf %718, %719 : vector<2x16xf32>
    %721 = arith.negf %720 : vector<2x16xf32>
    %722 = math.exp %721 : vector<2x16xf32>
    %cst_263 = arith.constant 1.000000e+00 : f32
    %723 = vector.broadcast %cst_263 : f32 to vector<2x16xf32>
    %724 = arith.addf %723, %722 : vector<2x16xf32>
    %725 = arith.divf %723, %724 : vector<2x16xf32>
    %726 = vector.extract_strided_slice %79 {offsets = [0, 16], sizes = [2, 16], strides = [1, 1]} : vector<2x48xf32> to vector<2x16xf32>
    %727 = vector.extract_strided_slice %717 {offsets = [0, 16], sizes = [2, 16], strides = [1, 1]} : vector<2x48xf32> to vector<2x16xf32>
    %728 = arith.addf %726, %727 : vector<2x16xf32>
    %729 = arith.negf %728 : vector<2x16xf32>
    %730 = math.exp %729 : vector<2x16xf32>
    %cst_264 = arith.constant 1.000000e+00 : f32
    %731 = vector.broadcast %cst_264 : f32 to vector<2x16xf32>
    %732 = arith.addf %731, %730 : vector<2x16xf32>
    %733 = arith.divf %731, %732 : vector<2x16xf32>
    %734 = vector.extract_strided_slice %79 {offsets = [0, 32], sizes = [2, 16], strides = [1, 1]} : vector<2x48xf32> to vector<2x16xf32>
    %735 = vector.extract_strided_slice %717 {offsets = [0, 32], sizes = [2, 16], strides = [1, 1]} : vector<2x48xf32> to vector<2x16xf32>
    %736 = arith.mulf %725, %735 : vector<2x16xf32>
    %737 = arith.addf %734, %736 : vector<2x16xf32>
    %738 = math.tanh %737 : vector<2x16xf32>
    %cst_265 = arith.constant 1.000000e+00 : f32
    %739 = vector.broadcast %cst_265 : f32 to vector<2x16xf32>
    %740 = arith.subf %739, %733 : vector<2x16xf32>
    %741 = arith.mulf %740, %738 : vector<2x16xf32>
    %742 = arith.mulf %733, %708 : vector<2x16xf32>
    %743 = arith.addf %741, %742 : vector<2x16xf32>
    %cst_266 = arith.constant 0.000000e+00 : f32
    %744 = vector.broadcast %cst_266 : f32 to vector<2x16xf32>
    %745 = arith.maximumf %743, %744 : vector<2x16xf32>
    %c17_267 = arith.constant 17 : index
    %c0_268 = arith.constant 0 : index
    %c0_269 = arith.constant 0 : index
    %746 = vector.load %arg14[%c17_267, %c0_268, %c0_269] : memref<28x2x16xf32, #tpu.memory_space<vmem>>, vector<1x2x16xf32>
    %747 = vector.shape_cast %746 : vector<1x2x16xf32> to vector<2x16xf32>
    %748 = vector.shape_cast %745 : vector<2x16xf32> to vector<1x2x16xf32>
    tpu.vector_store %arg14[%c17_267, %c0_268, %c0_269], %748 {strides = array<i32>} : memref<28x2x16xf32, #tpu.memory_space<vmem>>, vector<1x2x16xf32>,
    %749 = vector.extract_strided_slice %743 {offsets = [1, 0], sizes = [1, 16], strides = [1, 1]} : vector<2x16xf32> to vector<1x16xf32>
    %c17_270 = arith.constant 17 : index
    %c0_271 = arith.constant 0 : index
    %750 = vector.load %arg12[%c17_270, %c0_271] : memref<28x16xf32, #tpu.memory_space<vmem>>, vector<1x16xf32>
    tpu.vector_store %arg12[%c17_270, %c0_271], %749 {strides = array<i32>} : memref<28x16xf32, #tpu.memory_space<vmem>>, vector<1x16xf32>,
    %cst_272 = arith.constant dense<0.000000e+00> : vector<2x48xf32>
    %751 = tpu.matmul %743, %1, %cst_272 {dimension_numbers = #tpu.dot_dimension_numbers<[1], [0], [0], [1], [0, 0, 1, 1], [], []>} : vector<2x16xf32>, vector<16x48xf32>, vector<2x48xf32> -> vector<2x48xf32>
    %752 = arith.addf %751, %7 : vector<2x48xf32>
    %753 = vector.extract_strided_slice %83 {offsets = [0, 0], sizes = [2, 16], strides = [1, 1]} : vector<2x48xf32> to vector<2x16xf32>
    %754 = vector.extract_strided_slice %752 {offsets = [0, 0], sizes = [2, 16], strides = [1, 1]} : vector<2x48xf32> to vector<2x16xf32>
    %755 = arith.addf %753, %754 : vector<2x16xf32>
    %756 = arith.negf %755 : vector<2x16xf32>
    %757 = math.exp %756 : vector<2x16xf32>
    %cst_273 = arith.constant 1.000000e+00 : f32
    %758 = vector.broadcast %cst_273 : f32 to vector<2x16xf32>
    %759 = arith.addf %758, %757 : vector<2x16xf32>
    %760 = arith.divf %758, %759 : vector<2x16xf32>
    %761 = vector.extract_strided_slice %83 {offsets = [0, 16], sizes = [2, 16], strides = [1, 1]} : vector<2x48xf32> to vector<2x16xf32>
    %762 = vector.extract_strided_slice %752 {offsets = [0, 16], sizes = [2, 16], strides = [1, 1]} : vector<2x48xf32> to vector<2x16xf32>
    %763 = arith.addf %761, %762 : vector<2x16xf32>
    %764 = arith.negf %763 : vector<2x16xf32>
    %765 = math.exp %764 : vector<2x16xf32>
    %cst_274 = arith.constant 1.000000e+00 : f32
    %766 = vector.broadcast %cst_274 : f32 to vector<2x16xf32>
    %767 = arith.addf %766, %765 : vector<2x16xf32>
    %768 = arith.divf %766, %767 : vector<2x16xf32>
    %769 = vector.extract_strided_slice %83 {offsets = [0, 32], sizes = [2, 16], strides = [1, 1]} : vector<2x48xf32> to vector<2x16xf32>
    %770 = vector.extract_strided_slice %752 {offsets = [0, 32], sizes = [2, 16], strides = [1, 1]} : vector<2x48xf32> to vector<2x16xf32>
    %771 = arith.mulf %760, %770 : vector<2x16xf32>
    %772 = arith.addf %769, %771 : vector<2x16xf32>
    %773 = math.tanh %772 : vector<2x16xf32>
    %cst_275 = arith.constant 1.000000e+00 : f32
    %774 = vector.broadcast %cst_275 : f32 to vector<2x16xf32>
    %775 = arith.subf %774, %768 : vector<2x16xf32>
    %776 = arith.mulf %775, %773 : vector<2x16xf32>
    %777 = arith.mulf %768, %743 : vector<2x16xf32>
    %778 = arith.addf %776, %777 : vector<2x16xf32>
    %cst_276 = arith.constant 0.000000e+00 : f32
    %779 = vector.broadcast %cst_276 : f32 to vector<2x16xf32>
    %780 = arith.maximumf %778, %779 : vector<2x16xf32>
    %c18_277 = arith.constant 18 : index
    %c0_278 = arith.constant 0 : index
    %c0_279 = arith.constant 0 : index
    %781 = vector.load %arg14[%c18_277, %c0_278, %c0_279] : memref<28x2x16xf32, #tpu.memory_space<vmem>>, vector<1x2x16xf32>
    %782 = vector.shape_cast %781 : vector<1x2x16xf32> to vector<2x16xf32>
    %783 = vector.shape_cast %780 : vector<2x16xf32> to vector<1x2x16xf32>
    tpu.vector_store %arg14[%c18_277, %c0_278, %c0_279], %783 {strides = array<i32>} : memref<28x2x16xf32, #tpu.memory_space<vmem>>, vector<1x2x16xf32>,
    %784 = vector.extract_strided_slice %778 {offsets = [1, 0], sizes = [1, 16], strides = [1, 1]} : vector<2x16xf32> to vector<1x16xf32>
    %c18_280 = arith.constant 18 : index
    %c0_281 = arith.constant 0 : index
    %785 = vector.load %arg12[%c18_280, %c0_281] : memref<28x16xf32, #tpu.memory_space<vmem>>, vector<1x16xf32>
    tpu.vector_store %arg12[%c18_280, %c0_281], %784 {strides = array<i32>} : memref<28x16xf32, #tpu.memory_space<vmem>>, vector<1x16xf32>,
    %cst_282 = arith.constant dense<0.000000e+00> : vector<2x48xf32>
    %786 = tpu.matmul %778, %1, %cst_282 {dimension_numbers = #tpu.dot_dimension_numbers<[1], [0], [0], [1], [0, 0, 1, 1], [], []>} : vector<2x16xf32>, vector<16x48xf32>, vector<2x48xf32> -> vector<2x48xf32>
    %787 = arith.addf %786, %7 : vector<2x48xf32>
    %788 = vector.extract_strided_slice %87 {offsets = [0, 0], sizes = [2, 16], strides = [1, 1]} : vector<2x48xf32> to vector<2x16xf32>
    %789 = vector.extract_strided_slice %787 {offsets = [0, 0], sizes = [2, 16], strides = [1, 1]} : vector<2x48xf32> to vector<2x16xf32>
    %790 = arith.addf %788, %789 : vector<2x16xf32>
    %791 = arith.negf %790 : vector<2x16xf32>
    %792 = math.exp %791 : vector<2x16xf32>
    %cst_283 = arith.constant 1.000000e+00 : f32
    %793 = vector.broadcast %cst_283 : f32 to vector<2x16xf32>
    %794 = arith.addf %793, %792 : vector<2x16xf32>
    %795 = arith.divf %793, %794 : vector<2x16xf32>
    %796 = vector.extract_strided_slice %87 {offsets = [0, 16], sizes = [2, 16], strides = [1, 1]} : vector<2x48xf32> to vector<2x16xf32>
    %797 = vector.extract_strided_slice %787 {offsets = [0, 16], sizes = [2, 16], strides = [1, 1]} : vector<2x48xf32> to vector<2x16xf32>
    %798 = arith.addf %796, %797 : vector<2x16xf32>
    %799 = arith.negf %798 : vector<2x16xf32>
    %800 = math.exp %799 : vector<2x16xf32>
    %cst_284 = arith.constant 1.000000e+00 : f32
    %801 = vector.broadcast %cst_284 : f32 to vector<2x16xf32>
    %802 = arith.addf %801, %800 : vector<2x16xf32>
    %803 = arith.divf %801, %802 : vector<2x16xf32>
    %804 = vector.extract_strided_slice %87 {offsets = [0, 32], sizes = [2, 16], strides = [1, 1]} : vector<2x48xf32> to vector<2x16xf32>
    %805 = vector.extract_strided_slice %787 {offsets = [0, 32], sizes = [2, 16], strides = [1, 1]} : vector<2x48xf32> to vector<2x16xf32>
    %806 = arith.mulf %795, %805 : vector<2x16xf32>
    %807 = arith.addf %804, %806 : vector<2x16xf32>
    %808 = math.tanh %807 : vector<2x16xf32>
    %cst_285 = arith.constant 1.000000e+00 : f32
    %809 = vector.broadcast %cst_285 : f32 to vector<2x16xf32>
    %810 = arith.subf %809, %803 : vector<2x16xf32>
    %811 = arith.mulf %810, %808 : vector<2x16xf32>
    %812 = arith.mulf %803, %778 : vector<2x16xf32>
    %813 = arith.addf %811, %812 : vector<2x16xf32>
    %cst_286 = arith.constant 0.000000e+00 : f32
    %814 = vector.broadcast %cst_286 : f32 to vector<2x16xf32>
    %815 = arith.maximumf %813, %814 : vector<2x16xf32>
    %c19_287 = arith.constant 19 : index
    %c0_288 = arith.constant 0 : index
    %c0_289 = arith.constant 0 : index
    %816 = vector.load %arg14[%c19_287, %c0_288, %c0_289] : memref<28x2x16xf32, #tpu.memory_space<vmem>>, vector<1x2x16xf32>
    %817 = vector.shape_cast %816 : vector<1x2x16xf32> to vector<2x16xf32>
    %818 = vector.shape_cast %815 : vector<2x16xf32> to vector<1x2x16xf32>
    tpu.vector_store %arg14[%c19_287, %c0_288, %c0_289], %818 {strides = array<i32>} : memref<28x2x16xf32, #tpu.memory_space<vmem>>, vector<1x2x16xf32>,
    %819 = vector.extract_strided_slice %813 {offsets = [1, 0], sizes = [1, 16], strides = [1, 1]} : vector<2x16xf32> to vector<1x16xf32>
    %c19_290 = arith.constant 19 : index
    %c0_291 = arith.constant 0 : index
    %820 = vector.load %arg12[%c19_290, %c0_291] : memref<28x16xf32, #tpu.memory_space<vmem>>, vector<1x16xf32>
    tpu.vector_store %arg12[%c19_290, %c0_291], %819 {strides = array<i32>} : memref<28x16xf32, #tpu.memory_space<vmem>>, vector<1x16xf32>,
    %cst_292 = arith.constant dense<0.000000e+00> : vector<2x48xf32>
    %821 = tpu.matmul %813, %1, %cst_292 {dimension_numbers = #tpu.dot_dimension_numbers<[1], [0], [0], [1], [0, 0, 1, 1], [], []>} : vector<2x16xf32>, vector<16x48xf32>, vector<2x48xf32> -> vector<2x48xf32>
    %822 = arith.addf %821, %7 : vector<2x48xf32>
    %823 = vector.extract_strided_slice %91 {offsets = [0, 0], sizes = [2, 16], strides = [1, 1]} : vector<2x48xf32> to vector<2x16xf32>
    %824 = vector.extract_strided_slice %822 {offsets = [0, 0], sizes = [2, 16], strides = [1, 1]} : vector<2x48xf32> to vector<2x16xf32>
    %825 = arith.addf %823, %824 : vector<2x16xf32>
    %826 = arith.negf %825 : vector<2x16xf32>
    %827 = math.exp %826 : vector<2x16xf32>
    %cst_293 = arith.constant 1.000000e+00 : f32
    %828 = vector.broadcast %cst_293 : f32 to vector<2x16xf32>
    %829 = arith.addf %828, %827 : vector<2x16xf32>
    %830 = arith.divf %828, %829 : vector<2x16xf32>
    %831 = vector.extract_strided_slice %91 {offsets = [0, 16], sizes = [2, 16], strides = [1, 1]} : vector<2x48xf32> to vector<2x16xf32>
    %832 = vector.extract_strided_slice %822 {offsets = [0, 16], sizes = [2, 16], strides = [1, 1]} : vector<2x48xf32> to vector<2x16xf32>
    %833 = arith.addf %831, %832 : vector<2x16xf32>
    %834 = arith.negf %833 : vector<2x16xf32>
    %835 = math.exp %834 : vector<2x16xf32>
    %cst_294 = arith.constant 1.000000e+00 : f32
    %836 = vector.broadcast %cst_294 : f32 to vector<2x16xf32>
    %837 = arith.addf %836, %835 : vector<2x16xf32>
    %838 = arith.divf %836, %837 : vector<2x16xf32>
    %839 = vector.extract_strided_slice %91 {offsets = [0, 32], sizes = [2, 16], strides = [1, 1]} : vector<2x48xf32> to vector<2x16xf32>
    %840 = vector.extract_strided_slice %822 {offsets = [0, 32], sizes = [2, 16], strides = [1, 1]} : vector<2x48xf32> to vector<2x16xf32>
    %841 = arith.mulf %830, %840 : vector<2x16xf32>
    %842 = arith.addf %839, %841 : vector<2x16xf32>
    %843 = math.tanh %842 : vector<2x16xf32>
    %cst_295 = arith.constant 1.000000e+00 : f32
    %844 = vector.broadcast %cst_295 : f32 to vector<2x16xf32>
    %845 = arith.subf %844, %838 : vector<2x16xf32>
    %846 = arith.mulf %845, %843 : vector<2x16xf32>
    %847 = arith.mulf %838, %813 : vector<2x16xf32>
    %848 = arith.addf %846, %847 : vector<2x16xf32>
    %cst_296 = arith.constant 0.000000e+00 : f32
    %849 = vector.broadcast %cst_296 : f32 to vector<2x16xf32>
    %850 = arith.maximumf %848, %849 : vector<2x16xf32>
    %c20_297 = arith.constant 20 : index
    %c0_298 = arith.constant 0 : index
    %c0_299 = arith.constant 0 : index
    %851 = vector.load %arg14[%c20_297, %c0_298, %c0_299] : memref<28x2x16xf32, #tpu.memory_space<vmem>>, vector<1x2x16xf32>
    %852 = vector.shape_cast %851 : vector<1x2x16xf32> to vector<2x16xf32>
    %853 = vector.shape_cast %850 : vector<2x16xf32> to vector<1x2x16xf32>
    tpu.vector_store %arg14[%c20_297, %c0_298, %c0_299], %853 {strides = array<i32>} : memref<28x2x16xf32, #tpu.memory_space<vmem>>, vector<1x2x16xf32>,
    %854 = vector.extract_strided_slice %848 {offsets = [1, 0], sizes = [1, 16], strides = [1, 1]} : vector<2x16xf32> to vector<1x16xf32>
    %c20_300 = arith.constant 20 : index
    %c0_301 = arith.constant 0 : index
    %855 = vector.load %arg12[%c20_300, %c0_301] : memref<28x16xf32, #tpu.memory_space<vmem>>, vector<1x16xf32>
    tpu.vector_store %arg12[%c20_300, %c0_301], %854 {strides = array<i32>} : memref<28x16xf32, #tpu.memory_space<vmem>>, vector<1x16xf32>,
    %cst_302 = arith.constant dense<0.000000e+00> : vector<2x48xf32>
    %856 = tpu.matmul %848, %1, %cst_302 {dimension_numbers = #tpu.dot_dimension_numbers<[1], [0], [0], [1], [0, 0, 1, 1], [], []>} : vector<2x16xf32>, vector<16x48xf32>, vector<2x48xf32> -> vector<2x48xf32>
    %857 = arith.addf %856, %7 : vector<2x48xf32>
    %858 = vector.extract_strided_slice %95 {offsets = [0, 0], sizes = [2, 16], strides = [1, 1]} : vector<2x48xf32> to vector<2x16xf32>
    %859 = vector.extract_strided_slice %857 {offsets = [0, 0], sizes = [2, 16], strides = [1, 1]} : vector<2x48xf32> to vector<2x16xf32>
    %860 = arith.addf %858, %859 : vector<2x16xf32>
    %861 = arith.negf %860 : vector<2x16xf32>
    %862 = math.exp %861 : vector<2x16xf32>
    %cst_303 = arith.constant 1.000000e+00 : f32
    %863 = vector.broadcast %cst_303 : f32 to vector<2x16xf32>
    %864 = arith.addf %863, %862 : vector<2x16xf32>
    %865 = arith.divf %863, %864 : vector<2x16xf32>
    %866 = vector.extract_strided_slice %95 {offsets = [0, 16], sizes = [2, 16], strides = [1, 1]} : vector<2x48xf32> to vector<2x16xf32>
    %867 = vector.extract_strided_slice %857 {offsets = [0, 16], sizes = [2, 16], strides = [1, 1]} : vector<2x48xf32> to vector<2x16xf32>
    %868 = arith.addf %866, %867 : vector<2x16xf32>
    %869 = arith.negf %868 : vector<2x16xf32>
    %870 = math.exp %869 : vector<2x16xf32>
    %cst_304 = arith.constant 1.000000e+00 : f32
    %871 = vector.broadcast %cst_304 : f32 to vector<2x16xf32>
    %872 = arith.addf %871, %870 : vector<2x16xf32>
    %873 = arith.divf %871, %872 : vector<2x16xf32>
    %874 = vector.extract_strided_slice %95 {offsets = [0, 32], sizes = [2, 16], strides = [1, 1]} : vector<2x48xf32> to vector<2x16xf32>
    %875 = vector.extract_strided_slice %857 {offsets = [0, 32], sizes = [2, 16], strides = [1, 1]} : vector<2x48xf32> to vector<2x16xf32>
    %876 = arith.mulf %865, %875 : vector<2x16xf32>
    %877 = arith.addf %874, %876 : vector<2x16xf32>
    %878 = math.tanh %877 : vector<2x16xf32>
    %cst_305 = arith.constant 1.000000e+00 : f32
    %879 = vector.broadcast %cst_305 : f32 to vector<2x16xf32>
    %880 = arith.subf %879, %873 : vector<2x16xf32>
    %881 = arith.mulf %880, %878 : vector<2x16xf32>
    %882 = arith.mulf %873, %848 : vector<2x16xf32>
    %883 = arith.addf %881, %882 : vector<2x16xf32>
    %cst_306 = arith.constant 0.000000e+00 : f32
    %884 = vector.broadcast %cst_306 : f32 to vector<2x16xf32>
    %885 = arith.maximumf %883, %884 : vector<2x16xf32>
    %c21_307 = arith.constant 21 : index
    %c0_308 = arith.constant 0 : index
    %c0_309 = arith.constant 0 : index
    %886 = vector.load %arg14[%c21_307, %c0_308, %c0_309] : memref<28x2x16xf32, #tpu.memory_space<vmem>>, vector<1x2x16xf32>
    %887 = vector.shape_cast %886 : vector<1x2x16xf32> to vector<2x16xf32>
    %888 = vector.shape_cast %885 : vector<2x16xf32> to vector<1x2x16xf32>
    tpu.vector_store %arg14[%c21_307, %c0_308, %c0_309], %888 {strides = array<i32>} : memref<28x2x16xf32, #tpu.memory_space<vmem>>, vector<1x2x16xf32>,
    %889 = vector.extract_strided_slice %883 {offsets = [1, 0], sizes = [1, 16], strides = [1, 1]} : vector<2x16xf32> to vector<1x16xf32>
    %c21_310 = arith.constant 21 : index
    %c0_311 = arith.constant 0 : index
    %890 = vector.load %arg12[%c21_310, %c0_311] : memref<28x16xf32, #tpu.memory_space<vmem>>, vector<1x16xf32>
    tpu.vector_store %arg12[%c21_310, %c0_311], %889 {strides = array<i32>} : memref<28x16xf32, #tpu.memory_space<vmem>>, vector<1x16xf32>,
    %cst_312 = arith.constant dense<0.000000e+00> : vector<2x48xf32>
    %891 = tpu.matmul %883, %1, %cst_312 {dimension_numbers = #tpu.dot_dimension_numbers<[1], [0], [0], [1], [0, 0, 1, 1], [], []>} : vector<2x16xf32>, vector<16x48xf32>, vector<2x48xf32> -> vector<2x48xf32>
    %892 = arith.addf %891, %7 : vector<2x48xf32>
    %893 = vector.extract_strided_slice %99 {offsets = [0, 0], sizes = [2, 16], strides = [1, 1]} : vector<2x48xf32> to vector<2x16xf32>
    %894 = vector.extract_strided_slice %892 {offsets = [0, 0], sizes = [2, 16], strides = [1, 1]} : vector<2x48xf32> to vector<2x16xf32>
    %895 = arith.addf %893, %894 : vector<2x16xf32>
    %896 = arith.negf %895 : vector<2x16xf32>
    %897 = math.exp %896 : vector<2x16xf32>
    %cst_313 = arith.constant 1.000000e+00 : f32
    %898 = vector.broadcast %cst_313 : f32 to vector<2x16xf32>
    %899 = arith.addf %898, %897 : vector<2x16xf32>
    %900 = arith.divf %898, %899 : vector<2x16xf32>
    %901 = vector.extract_strided_slice %99 {offsets = [0, 16], sizes = [2, 16], strides = [1, 1]} : vector<2x48xf32> to vector<2x16xf32>
    %902 = vector.extract_strided_slice %892 {offsets = [0, 16], sizes = [2, 16], strides = [1, 1]} : vector<2x48xf32> to vector<2x16xf32>
    %903 = arith.addf %901, %902 : vector<2x16xf32>
    %904 = arith.negf %903 : vector<2x16xf32>
    %905 = math.exp %904 : vector<2x16xf32>
    %cst_314 = arith.constant 1.000000e+00 : f32
    %906 = vector.broadcast %cst_314 : f32 to vector<2x16xf32>
    %907 = arith.addf %906, %905 : vector<2x16xf32>
    %908 = arith.divf %906, %907 : vector<2x16xf32>
    %909 = vector.extract_strided_slice %99 {offsets = [0, 32], sizes = [2, 16], strides = [1, 1]} : vector<2x48xf32> to vector<2x16xf32>
    %910 = vector.extract_strided_slice %892 {offsets = [0, 32], sizes = [2, 16], strides = [1, 1]} : vector<2x48xf32> to vector<2x16xf32>
    %911 = arith.mulf %900, %910 : vector<2x16xf32>
    %912 = arith.addf %909, %911 : vector<2x16xf32>
    %913 = math.tanh %912 : vector<2x16xf32>
    %cst_315 = arith.constant 1.000000e+00 : f32
    %914 = vector.broadcast %cst_315 : f32 to vector<2x16xf32>
    %915 = arith.subf %914, %908 : vector<2x16xf32>
    %916 = arith.mulf %915, %913 : vector<2x16xf32>
    %917 = arith.mulf %908, %883 : vector<2x16xf32>
    %918 = arith.addf %916, %917 : vector<2x16xf32>
    %cst_316 = arith.constant 0.000000e+00 : f32
    %919 = vector.broadcast %cst_316 : f32 to vector<2x16xf32>
    %920 = arith.maximumf %918, %919 : vector<2x16xf32>
    %c22_317 = arith.constant 22 : index
    %c0_318 = arith.constant 0 : index
    %c0_319 = arith.constant 0 : index
    %921 = vector.load %arg14[%c22_317, %c0_318, %c0_319] : memref<28x2x16xf32, #tpu.memory_space<vmem>>, vector<1x2x16xf32>
    %922 = vector.shape_cast %921 : vector<1x2x16xf32> to vector<2x16xf32>
    %923 = vector.shape_cast %920 : vector<2x16xf32> to vector<1x2x16xf32>
    tpu.vector_store %arg14[%c22_317, %c0_318, %c0_319], %923 {strides = array<i32>} : memref<28x2x16xf32, #tpu.memory_space<vmem>>, vector<1x2x16xf32>,
    %924 = vector.extract_strided_slice %918 {offsets = [1, 0], sizes = [1, 16], strides = [1, 1]} : vector<2x16xf32> to vector<1x16xf32>
    %c22_320 = arith.constant 22 : index
    %c0_321 = arith.constant 0 : index
    %925 = vector.load %arg12[%c22_320, %c0_321] : memref<28x16xf32, #tpu.memory_space<vmem>>, vector<1x16xf32>
    tpu.vector_store %arg12[%c22_320, %c0_321], %924 {strides = array<i32>} : memref<28x16xf32, #tpu.memory_space<vmem>>, vector<1x16xf32>,
    %cst_322 = arith.constant dense<0.000000e+00> : vector<2x48xf32>
    %926 = tpu.matmul %918, %1, %cst_322 {dimension_numbers = #tpu.dot_dimension_numbers<[1], [0], [0], [1], [0, 0, 1, 1], [], []>} : vector<2x16xf32>, vector<16x48xf32>, vector<2x48xf32> -> vector<2x48xf32>
    %927 = arith.addf %926, %7 : vector<2x48xf32>
    %928 = vector.extract_strided_slice %103 {offsets = [0, 0], sizes = [2, 16], strides = [1, 1]} : vector<2x48xf32> to vector<2x16xf32>
    %929 = vector.extract_strided_slice %927 {offsets = [0, 0], sizes = [2, 16], strides = [1, 1]} : vector<2x48xf32> to vector<2x16xf32>
    %930 = arith.addf %928, %929 : vector<2x16xf32>
    %931 = arith.negf %930 : vector<2x16xf32>
    %932 = math.exp %931 : vector<2x16xf32>
    %cst_323 = arith.constant 1.000000e+00 : f32
    %933 = vector.broadcast %cst_323 : f32 to vector<2x16xf32>
    %934 = arith.addf %933, %932 : vector<2x16xf32>
    %935 = arith.divf %933, %934 : vector<2x16xf32>
    %936 = vector.extract_strided_slice %103 {offsets = [0, 16], sizes = [2, 16], strides = [1, 1]} : vector<2x48xf32> to vector<2x16xf32>
    %937 = vector.extract_strided_slice %927 {offsets = [0, 16], sizes = [2, 16], strides = [1, 1]} : vector<2x48xf32> to vector<2x16xf32>
    %938 = arith.addf %936, %937 : vector<2x16xf32>
    %939 = arith.negf %938 : vector<2x16xf32>
    %940 = math.exp %939 : vector<2x16xf32>
    %cst_324 = arith.constant 1.000000e+00 : f32
    %941 = vector.broadcast %cst_324 : f32 to vector<2x16xf32>
    %942 = arith.addf %941, %940 : vector<2x16xf32>
    %943 = arith.divf %941, %942 : vector<2x16xf32>
    %944 = vector.extract_strided_slice %103 {offsets = [0, 32], sizes = [2, 16], strides = [1, 1]} : vector<2x48xf32> to vector<2x16xf32>
    %945 = vector.extract_strided_slice %927 {offsets = [0, 32], sizes = [2, 16], strides = [1, 1]} : vector<2x48xf32> to vector<2x16xf32>
    %946 = arith.mulf %935, %945 : vector<2x16xf32>
    %947 = arith.addf %944, %946 : vector<2x16xf32>
    %948 = math.tanh %947 : vector<2x16xf32>
    %cst_325 = arith.constant 1.000000e+00 : f32
    %949 = vector.broadcast %cst_325 : f32 to vector<2x16xf32>
    %950 = arith.subf %949, %943 : vector<2x16xf32>
    %951 = arith.mulf %950, %948 : vector<2x16xf32>
    %952 = arith.mulf %943, %918 : vector<2x16xf32>
    %953 = arith.addf %951, %952 : vector<2x16xf32>
    %cst_326 = arith.constant 0.000000e+00 : f32
    %954 = vector.broadcast %cst_326 : f32 to vector<2x16xf32>
    %955 = arith.maximumf %953, %954 : vector<2x16xf32>
    %c23_327 = arith.constant 23 : index
    %c0_328 = arith.constant 0 : index
    %c0_329 = arith.constant 0 : index
    %956 = vector.load %arg14[%c23_327, %c0_328, %c0_329] : memref<28x2x16xf32, #tpu.memory_space<vmem>>, vector<1x2x16xf32>
    %957 = vector.shape_cast %956 : vector<1x2x16xf32> to vector<2x16xf32>
    %958 = vector.shape_cast %955 : vector<2x16xf32> to vector<1x2x16xf32>
    tpu.vector_store %arg14[%c23_327, %c0_328, %c0_329], %958 {strides = array<i32>} : memref<28x2x16xf32, #tpu.memory_space<vmem>>, vector<1x2x16xf32>,
    %959 = vector.extract_strided_slice %953 {offsets = [1, 0], sizes = [1, 16], strides = [1, 1]} : vector<2x16xf32> to vector<1x16xf32>
    %c23_330 = arith.constant 23 : index
    %c0_331 = arith.constant 0 : index
    %960 = vector.load %arg12[%c23_330, %c0_331] : memref<28x16xf32, #tpu.memory_space<vmem>>, vector<1x16xf32>
    tpu.vector_store %arg12[%c23_330, %c0_331], %959 {strides = array<i32>} : memref<28x16xf32, #tpu.memory_space<vmem>>, vector<1x16xf32>,
    %cst_332 = arith.constant dense<0.000000e+00> : vector<2x48xf32>
    %961 = tpu.matmul %953, %1, %cst_332 {dimension_numbers = #tpu.dot_dimension_numbers<[1], [0], [0], [1], [0, 0, 1, 1], [], []>} : vector<2x16xf32>, vector<16x48xf32>, vector<2x48xf32> -> vector<2x48xf32>
    %962 = arith.addf %961, %7 : vector<2x48xf32>
    %963 = vector.extract_strided_slice %107 {offsets = [0, 0], sizes = [2, 16], strides = [1, 1]} : vector<2x48xf32> to vector<2x16xf32>
    %964 = vector.extract_strided_slice %962 {offsets = [0, 0], sizes = [2, 16], strides = [1, 1]} : vector<2x48xf32> to vector<2x16xf32>
    %965 = arith.addf %963, %964 : vector<2x16xf32>
    %966 = arith.negf %965 : vector<2x16xf32>
    %967 = math.exp %966 : vector<2x16xf32>
    %cst_333 = arith.constant 1.000000e+00 : f32
    %968 = vector.broadcast %cst_333 : f32 to vector<2x16xf32>
    %969 = arith.addf %968, %967 : vector<2x16xf32>
    %970 = arith.divf %968, %969 : vector<2x16xf32>
    %971 = vector.extract_strided_slice %107 {offsets = [0, 16], sizes = [2, 16], strides = [1, 1]} : vector<2x48xf32> to vector<2x16xf32>
    %972 = vector.extract_strided_slice %962 {offsets = [0, 16], sizes = [2, 16], strides = [1, 1]} : vector<2x48xf32> to vector<2x16xf32>
    %973 = arith.addf %971, %972 : vector<2x16xf32>
    %974 = arith.negf %973 : vector<2x16xf32>
    %975 = math.exp %974 : vector<2x16xf32>
    %cst_334 = arith.constant 1.000000e+00 : f32
    %976 = vector.broadcast %cst_334 : f32 to vector<2x16xf32>
    %977 = arith.addf %976, %975 : vector<2x16xf32>
    %978 = arith.divf %976, %977 : vector<2x16xf32>
    %979 = vector.extract_strided_slice %107 {offsets = [0, 32], sizes = [2, 16], strides = [1, 1]} : vector<2x48xf32> to vector<2x16xf32>
    %980 = vector.extract_strided_slice %962 {offsets = [0, 32], sizes = [2, 16], strides = [1, 1]} : vector<2x48xf32> to vector<2x16xf32>
    %981 = arith.mulf %970, %980 : vector<2x16xf32>
    %982 = arith.addf %979, %981 : vector<2x16xf32>
    %983 = math.tanh %982 : vector<2x16xf32>
    %cst_335 = arith.constant 1.000000e+00 : f32
    %984 = vector.broadcast %cst_335 : f32 to vector<2x16xf32>
    %985 = arith.subf %984, %978 : vector<2x16xf32>
    %986 = arith.mulf %985, %983 : vector<2x16xf32>
    %987 = arith.mulf %978, %953 : vector<2x16xf32>
    %988 = arith.addf %986, %987 : vector<2x16xf32>
    %cst_336 = arith.constant 0.000000e+00 : f32
    %989 = vector.broadcast %cst_336 : f32 to vector<2x16xf32>
    %990 = arith.maximumf %988, %989 : vector<2x16xf32>
    %c24_337 = arith.constant 24 : index
    %c0_338 = arith.constant 0 : index
    %c0_339 = arith.constant 0 : index
    %991 = vector.load %arg14[%c24_337, %c0_338, %c0_339] : memref<28x2x16xf32, #tpu.memory_space<vmem>>, vector<1x2x16xf32>
    %992 = vector.shape_cast %991 : vector<1x2x16xf32> to vector<2x16xf32>
    %993 = vector.shape_cast %990 : vector<2x16xf32> to vector<1x2x16xf32>
    tpu.vector_store %arg14[%c24_337, %c0_338, %c0_339], %993 {strides = array<i32>} : memref<28x2x16xf32, #tpu.memory_space<vmem>>, vector<1x2x16xf32>,
    %994 = vector.extract_strided_slice %988 {offsets = [1, 0], sizes = [1, 16], strides = [1, 1]} : vector<2x16xf32> to vector<1x16xf32>
    %c24_340 = arith.constant 24 : index
    %c0_341 = arith.constant 0 : index
    %995 = vector.load %arg12[%c24_340, %c0_341] : memref<28x16xf32, #tpu.memory_space<vmem>>, vector<1x16xf32>
    tpu.vector_store %arg12[%c24_340, %c0_341], %994 {strides = array<i32>} : memref<28x16xf32, #tpu.memory_space<vmem>>, vector<1x16xf32>,
    %cst_342 = arith.constant dense<0.000000e+00> : vector<2x48xf32>
    %996 = tpu.matmul %988, %1, %cst_342 {dimension_numbers = #tpu.dot_dimension_numbers<[1], [0], [0], [1], [0, 0, 1, 1], [], []>} : vector<2x16xf32>, vector<16x48xf32>, vector<2x48xf32> -> vector<2x48xf32>
    %997 = arith.addf %996, %7 : vector<2x48xf32>
    %998 = vector.extract_strided_slice %111 {offsets = [0, 0], sizes = [2, 16], strides = [1, 1]} : vector<2x48xf32> to vector<2x16xf32>
    %999 = vector.extract_strided_slice %997 {offsets = [0, 0], sizes = [2, 16], strides = [1, 1]} : vector<2x48xf32> to vector<2x16xf32>
    %1000 = arith.addf %998, %999 : vector<2x16xf32>
    %1001 = arith.negf %1000 : vector<2x16xf32>
    %1002 = math.exp %1001 : vector<2x16xf32>
    %cst_343 = arith.constant 1.000000e+00 : f32
    %1003 = vector.broadcast %cst_343 : f32 to vector<2x16xf32>
    %1004 = arith.addf %1003, %1002 : vector<2x16xf32>
    %1005 = arith.divf %1003, %1004 : vector<2x16xf32>
    %1006 = vector.extract_strided_slice %111 {offsets = [0, 16], sizes = [2, 16], strides = [1, 1]} : vector<2x48xf32> to vector<2x16xf32>
    %1007 = vector.extract_strided_slice %997 {offsets = [0, 16], sizes = [2, 16], strides = [1, 1]} : vector<2x48xf32> to vector<2x16xf32>
    %1008 = arith.addf %1006, %1007 : vector<2x16xf32>
    %1009 = arith.negf %1008 : vector<2x16xf32>
    %1010 = math.exp %1009 : vector<2x16xf32>
    %cst_344 = arith.constant 1.000000e+00 : f32
    %1011 = vector.broadcast %cst_344 : f32 to vector<2x16xf32>
    %1012 = arith.addf %1011, %1010 : vector<2x16xf32>
    %1013 = arith.divf %1011, %1012 : vector<2x16xf32>
    %1014 = vector.extract_strided_slice %111 {offsets = [0, 32], sizes = [2, 16], strides = [1, 1]} : vector<2x48xf32> to vector<2x16xf32>
    %1015 = vector.extract_strided_slice %997 {offsets = [0, 32], sizes = [2, 16], strides = [1, 1]} : vector<2x48xf32> to vector<2x16xf32>
    %1016 = arith.mulf %1005, %1015 : vector<2x16xf32>
    %1017 = arith.addf %1014, %1016 : vector<2x16xf32>
    %1018 = math.tanh %1017 : vector<2x16xf32>
    %cst_345 = arith.constant 1.000000e+00 : f32
    %1019 = vector.broadcast %cst_345 : f32 to vector<2x16xf32>
    %1020 = arith.subf %1019, %1013 : vector<2x16xf32>
    %1021 = arith.mulf %1020, %1018 : vector<2x16xf32>
    %1022 = arith.mulf %1013, %988 : vector<2x16xf32>
    %1023 = arith.addf %1021, %1022 : vector<2x16xf32>
    %cst_346 = arith.constant 0.000000e+00 : f32
    %1024 = vector.broadcast %cst_346 : f32 to vector<2x16xf32>
    %1025 = arith.maximumf %1023, %1024 : vector<2x16xf32>
    %c25_347 = arith.constant 25 : index
    %c0_348 = arith.constant 0 : index
    %c0_349 = arith.constant 0 : index
    %1026 = vector.load %arg14[%c25_347, %c0_348, %c0_349] : memref<28x2x16xf32, #tpu.memory_space<vmem>>, vector<1x2x16xf32>
    %1027 = vector.shape_cast %1026 : vector<1x2x16xf32> to vector<2x16xf32>
    %1028 = vector.shape_cast %1025 : vector<2x16xf32> to vector<1x2x16xf32>
    tpu.vector_store %arg14[%c25_347, %c0_348, %c0_349], %1028 {strides = array<i32>} : memref<28x2x16xf32, #tpu.memory_space<vmem>>, vector<1x2x16xf32>,
    %1029 = vector.extract_strided_slice %1023 {offsets = [1, 0], sizes = [1, 16], strides = [1, 1]} : vector<2x16xf32> to vector<1x16xf32>
    %c25_350 = arith.constant 25 : index
    %c0_351 = arith.constant 0 : index
    %1030 = vector.load %arg12[%c25_350, %c0_351] : memref<28x16xf32, #tpu.memory_space<vmem>>, vector<1x16xf32>
    tpu.vector_store %arg12[%c25_350, %c0_351], %1029 {strides = array<i32>} : memref<28x16xf32, #tpu.memory_space<vmem>>, vector<1x16xf32>,
    %cst_352 = arith.constant dense<0.000000e+00> : vector<2x48xf32>
    %1031 = tpu.matmul %1023, %1, %cst_352 {dimension_numbers = #tpu.dot_dimension_numbers<[1], [0], [0], [1], [0, 0, 1, 1], [], []>} : vector<2x16xf32>, vector<16x48xf32>, vector<2x48xf32> -> vector<2x48xf32>
    %1032 = arith.addf %1031, %7 : vector<2x48xf32>
    %1033 = vector.extract_strided_slice %115 {offsets = [0, 0], sizes = [2, 16], strides = [1, 1]} : vector<2x48xf32> to vector<2x16xf32>
    %1034 = vector.extract_strided_slice %1032 {offsets = [0, 0], sizes = [2, 16], strides = [1, 1]} : vector<2x48xf32> to vector<2x16xf32>
    %1035 = arith.addf %1033, %1034 : vector<2x16xf32>
    %1036 = arith.negf %1035 : vector<2x16xf32>
    %1037 = math.exp %1036 : vector<2x16xf32>
    %cst_353 = arith.constant 1.000000e+00 : f32
    %1038 = vector.broadcast %cst_353 : f32 to vector<2x16xf32>
    %1039 = arith.addf %1038, %1037 : vector<2x16xf32>
    %1040 = arith.divf %1038, %1039 : vector<2x16xf32>
    %1041 = vector.extract_strided_slice %115 {offsets = [0, 16], sizes = [2, 16], strides = [1, 1]} : vector<2x48xf32> to vector<2x16xf32>
    %1042 = vector.extract_strided_slice %1032 {offsets = [0, 16], sizes = [2, 16], strides = [1, 1]} : vector<2x48xf32> to vector<2x16xf32>
    %1043 = arith.addf %1041, %1042 : vector<2x16xf32>
    %1044 = arith.negf %1043 : vector<2x16xf32>
    %1045 = math.exp %1044 : vector<2x16xf32>
    %cst_354 = arith.constant 1.000000e+00 : f32
    %1046 = vector.broadcast %cst_354 : f32 to vector<2x16xf32>
    %1047 = arith.addf %1046, %1045 : vector<2x16xf32>
    %1048 = arith.divf %1046, %1047 : vector<2x16xf32>
    %1049 = vector.extract_strided_slice %115 {offsets = [0, 32], sizes = [2, 16], strides = [1, 1]} : vector<2x48xf32> to vector<2x16xf32>
    %1050 = vector.extract_strided_slice %1032 {offsets = [0, 32], sizes = [2, 16], strides = [1, 1]} : vector<2x48xf32> to vector<2x16xf32>
    %1051 = arith.mulf %1040, %1050 : vector<2x16xf32>
    %1052 = arith.addf %1049, %1051 : vector<2x16xf32>
    %1053 = math.tanh %1052 : vector<2x16xf32>
    %cst_355 = arith.constant 1.000000e+00 : f32
    %1054 = vector.broadcast %cst_355 : f32 to vector<2x16xf32>
    %1055 = arith.subf %1054, %1048 : vector<2x16xf32>
    %1056 = arith.mulf %1055, %1053 : vector<2x16xf32>
    %1057 = arith.mulf %1048, %1023 : vector<2x16xf32>
    %1058 = arith.addf %1056, %1057 : vector<2x16xf32>
    %cst_356 = arith.constant 0.000000e+00 : f32
    %1059 = vector.broadcast %cst_356 : f32 to vector<2x16xf32>
    %1060 = arith.maximumf %1058, %1059 : vector<2x16xf32>
    %c26_357 = arith.constant 26 : index
    %c0_358 = arith.constant 0 : index
    %c0_359 = arith.constant 0 : index
    %1061 = vector.load %arg14[%c26_357, %c0_358, %c0_359] : memref<28x2x16xf32, #tpu.memory_space<vmem>>, vector<1x2x16xf32>
    %1062 = vector.shape_cast %1061 : vector<1x2x16xf32> to vector<2x16xf32>
    %1063 = vector.shape_cast %1060 : vector<2x16xf32> to vector<1x2x16xf32>
    tpu.vector_store %arg14[%c26_357, %c0_358, %c0_359], %1063 {strides = array<i32>} : memref<28x2x16xf32, #tpu.memory_space<vmem>>, vector<1x2x16xf32>,
    %1064 = vector.extract_strided_slice %1058 {offsets = [1, 0], sizes = [1, 16], strides = [1, 1]} : vector<2x16xf32> to vector<1x16xf32>
    %c26_360 = arith.constant 26 : index
    %c0_361 = arith.constant 0 : index
    %1065 = vector.load %arg12[%c26_360, %c0_361] : memref<28x16xf32, #tpu.memory_space<vmem>>, vector<1x16xf32>
    tpu.vector_store %arg12[%c26_360, %c0_361], %1064 {strides = array<i32>} : memref<28x16xf32, #tpu.memory_space<vmem>>, vector<1x16xf32>,
    %cst_362 = arith.constant dense<0.000000e+00> : vector<2x48xf32>
    %1066 = tpu.matmul %1058, %1, %cst_362 {dimension_numbers = #tpu.dot_dimension_numbers<[1], [0], [0], [1], [0, 0, 1, 1], [], []>} : vector<2x16xf32>, vector<16x48xf32>, vector<2x48xf32> -> vector<2x48xf32>
    %1067 = arith.addf %1066, %7 : vector<2x48xf32>
    %1068 = vector.extract_strided_slice %119 {offsets = [0, 0], sizes = [2, 16], strides = [1, 1]} : vector<2x48xf32> to vector<2x16xf32>
    %1069 = vector.extract_strided_slice %1067 {offsets = [0, 0], sizes = [2, 16], strides = [1, 1]} : vector<2x48xf32> to vector<2x16xf32>
    %1070 = arith.addf %1068, %1069 : vector<2x16xf32>
    %1071 = arith.negf %1070 : vector<2x16xf32>
    %1072 = math.exp %1071 : vector<2x16xf32>
    %cst_363 = arith.constant 1.000000e+00 : f32
    %1073 = vector.broadcast %cst_363 : f32 to vector<2x16xf32>
    %1074 = arith.addf %1073, %1072 : vector<2x16xf32>
    %1075 = arith.divf %1073, %1074 : vector<2x16xf32>
    %1076 = vector.extract_strided_slice %119 {offsets = [0, 16], sizes = [2, 16], strides = [1, 1]} : vector<2x48xf32> to vector<2x16xf32>
    %1077 = vector.extract_strided_slice %1067 {offsets = [0, 16], sizes = [2, 16], strides = [1, 1]} : vector<2x48xf32> to vector<2x16xf32>
    %1078 = arith.addf %1076, %1077 : vector<2x16xf32>
    %1079 = arith.negf %1078 : vector<2x16xf32>
    %1080 = math.exp %1079 : vector<2x16xf32>
    %cst_364 = arith.constant 1.000000e+00 : f32
    %1081 = vector.broadcast %cst_364 : f32 to vector<2x16xf32>
    %1082 = arith.addf %1081, %1080 : vector<2x16xf32>
    %1083 = arith.divf %1081, %1082 : vector<2x16xf32>
    %1084 = vector.extract_strided_slice %119 {offsets = [0, 32], sizes = [2, 16], strides = [1, 1]} : vector<2x48xf32> to vector<2x16xf32>
    %1085 = vector.extract_strided_slice %1067 {offsets = [0, 32], sizes = [2, 16], strides = [1, 1]} : vector<2x48xf32> to vector<2x16xf32>
    %1086 = arith.mulf %1075, %1085 : vector<2x16xf32>
    %1087 = arith.addf %1084, %1086 : vector<2x16xf32>
    %1088 = math.tanh %1087 : vector<2x16xf32>
    %cst_365 = arith.constant 1.000000e+00 : f32
    %1089 = vector.broadcast %cst_365 : f32 to vector<2x16xf32>
    %1090 = arith.subf %1089, %1083 : vector<2x16xf32>
    %1091 = arith.mulf %1090, %1088 : vector<2x16xf32>
    %1092 = arith.mulf %1083, %1058 : vector<2x16xf32>
    %1093 = arith.addf %1091, %1092 : vector<2x16xf32>
    %cst_366 = arith.constant 0.000000e+00 : f32
    %1094 = vector.broadcast %cst_366 : f32 to vector<2x16xf32>
    %1095 = arith.maximumf %1093, %1094 : vector<2x16xf32>
    %c27_367 = arith.constant 27 : index
    %c0_368 = arith.constant 0 : index
    %c0_369 = arith.constant 0 : index
    %1096 = vector.load %arg14[%c27_367, %c0_368, %c0_369] : memref<28x2x16xf32, #tpu.memory_space<vmem>>, vector<1x2x16xf32>
    %1097 = vector.shape_cast %1096 : vector<1x2x16xf32> to vector<2x16xf32>
    %1098 = vector.shape_cast %1095 : vector<2x16xf32> to vector<1x2x16xf32>
    tpu.vector_store %arg14[%c27_367, %c0_368, %c0_369], %1098 {strides = array<i32>} : memref<28x2x16xf32, #tpu.memory_space<vmem>>, vector<1x2x16xf32>,
    %1099 = vector.extract_strided_slice %1093 {offsets = [1, 0], sizes = [1, 16], strides = [1, 1]} : vector<2x16xf32> to vector<1x16xf32>
    %c27_370 = arith.constant 27 : index
    %c0_371 = arith.constant 0 : index
    %1100 = vector.load %arg12[%c27_370, %c0_371] : memref<28x16xf32, #tpu.memory_space<vmem>>, vector<1x16xf32>
    tpu.vector_store %arg12[%c27_370, %c0_371], %1099 {strides = array<i32>} : memref<28x16xf32, #tpu.memory_space<vmem>>, vector<1x16xf32>,
    %c0_372 = arith.constant 0 : index
    %c0_373 = arith.constant 0 : index
    %1101 = vector.load %arg12[%c0_372, %c0_373] : memref<28x16xf32, #tpu.memory_space<vmem>>, vector<28x16xf32>
    %1102 = arith.negf %1101 : vector<28x16xf32>
    %1103 = math.exp %1102 : vector<28x16xf32>
    %cst_374 = arith.constant 1.000000e+00 : f32
    %1104 = vector.broadcast %cst_374 : f32 to vector<28x16xf32>
    %1105 = arith.addf %1104, %1103 : vector<28x16xf32>
    %1106 = arith.divf %1104, %1105 : vector<28x16xf32>
    %c0_375 = arith.constant 0 : index
    %c0_376 = arith.constant 0 : index
    %1107 = vector.load %arg12[%c0_375, %c0_376] : memref<28x16xf32, #tpu.memory_space<vmem>>, vector<28x16xf32>
    tpu.vector_store %arg12[%c0_375, %c0_376], %1106 {strides = array<i32>} : memref<28x16xf32, #tpu.memory_space<vmem>>, vector<28x16xf32>,
    %c0_377 = arith.constant 0 : index
    %c0_378 = arith.constant 0 : index
    %1108 = vector.load %arg7[%c0_377, %c0_378] : memref<1x64xf32, #tpu.memory_space<vmem>>, vector<1x64xf32>
    %1109 = vector.shape_cast %1108 : vector<1x64xf32> to vector<1x64xf32>
    %1110 = vector.broadcast %1109 : vector<1x64xf32> to vector<2x64xf32>
    %c0_379 = arith.constant 0 : index
    %c0_380 = arith.constant 0 : index
    %c0_381 = arith.constant 0 : index
    %1111 = vector.load %arg14[%c0_379, %c0_380, %c0_381] : memref<28x2x16xf32, #tpu.memory_space<vmem>>, vector<1x2x16xf32>
    %1112 = vector.shape_cast %1111 : vector<1x2x16xf32> to vector<2x16xf32>
    %c0_382 = arith.constant 0 : index
    %c0_383 = arith.constant 0 : index
    %c0_384 = arith.constant 0 : index
    %1113 = vector.load %arg6[%c0_382, %c0_383, %c0_384] : memref<28x16x64xf32, #tpu.memory_space<vmem>>, vector<1x16x64xf32>
    %1114 = vector.shape_cast %1113 : vector<1x16x64xf32> to vector<16x64xf32>
    %cst_385 = arith.constant dense<0.000000e+00> : vector<2x64xf32>
    %1115 = tpu.matmul %1112, %1114, %cst_385 {dimension_numbers = #tpu.dot_dimension_numbers<[1], [0], [0], [1], [0, 0, 1, 1], [], []>} : vector<2x16xf32>, vector<16x64xf32>, vector<2x64xf32> -> vector<2x64xf32>
    %1116 = arith.addf %1110, %1115 : vector<2x64xf32>
    %c1_386 = arith.constant 1 : index
    %c0_387 = arith.constant 0 : index
    %c0_388 = arith.constant 0 : index
    %1117 = vector.load %arg14[%c1_386, %c0_387, %c0_388] : memref<28x2x16xf32, #tpu.memory_space<vmem>>, vector<1x2x16xf32>
    %1118 = vector.shape_cast %1117 : vector<1x2x16xf32> to vector<2x16xf32>
    %c1_389 = arith.constant 1 : index
    %c0_390 = arith.constant 0 : index
    %c0_391 = arith.constant 0 : index
    %1119 = vector.load %arg6[%c1_389, %c0_390, %c0_391] : memref<28x16x64xf32, #tpu.memory_space<vmem>>, vector<1x16x64xf32>
    %1120 = vector.shape_cast %1119 : vector<1x16x64xf32> to vector<16x64xf32>
    %cst_392 = arith.constant dense<0.000000e+00> : vector<2x64xf32>
    %1121 = tpu.matmul %1118, %1120, %cst_392 {dimension_numbers = #tpu.dot_dimension_numbers<[1], [0], [0], [1], [0, 0, 1, 1], [], []>} : vector<2x16xf32>, vector<16x64xf32>, vector<2x64xf32> -> vector<2x64xf32>
    %1122 = arith.addf %1116, %1121 : vector<2x64xf32>
    %c2_393 = arith.constant 2 : index
    %c0_394 = arith.constant 0 : index
    %c0_395 = arith.constant 0 : index
    %1123 = vector.load %arg14[%c2_393, %c0_394, %c0_395] : memref<28x2x16xf32, #tpu.memory_space<vmem>>, vector<1x2x16xf32>
    %1124 = vector.shape_cast %1123 : vector<1x2x16xf32> to vector<2x16xf32>
    %c2_396 = arith.constant 2 : index
    %c0_397 = arith.constant 0 : index
    %c0_398 = arith.constant 0 : index
    %1125 = vector.load %arg6[%c2_396, %c0_397, %c0_398] : memref<28x16x64xf32, #tpu.memory_space<vmem>>, vector<1x16x64xf32>
    %1126 = vector.shape_cast %1125 : vector<1x16x64xf32> to vector<16x64xf32>
    %cst_399 = arith.constant dense<0.000000e+00> : vector<2x64xf32>
    %1127 = tpu.matmul %1124, %1126, %cst_399 {dimension_numbers = #tpu.dot_dimension_numbers<[1], [0], [0], [1], [0, 0, 1, 1], [], []>} : vector<2x16xf32>, vector<16x64xf32>, vector<2x64xf32> -> vector<2x64xf32>
    %1128 = arith.addf %1122, %1127 : vector<2x64xf32>
    %c3_400 = arith.constant 3 : index
    %c0_401 = arith.constant 0 : index
    %c0_402 = arith.constant 0 : index
    %1129 = vector.load %arg14[%c3_400, %c0_401, %c0_402] : memref<28x2x16xf32, #tpu.memory_space<vmem>>, vector<1x2x16xf32>
    %1130 = vector.shape_cast %1129 : vector<1x2x16xf32> to vector<2x16xf32>
    %c3_403 = arith.constant 3 : index
    %c0_404 = arith.constant 0 : index
    %c0_405 = arith.constant 0 : index
    %1131 = vector.load %arg6[%c3_403, %c0_404, %c0_405] : memref<28x16x64xf32, #tpu.memory_space<vmem>>, vector<1x16x64xf32>
    %1132 = vector.shape_cast %1131 : vector<1x16x64xf32> to vector<16x64xf32>
    %cst_406 = arith.constant dense<0.000000e+00> : vector<2x64xf32>
    %1133 = tpu.matmul %1130, %1132, %cst_406 {dimension_numbers = #tpu.dot_dimension_numbers<[1], [0], [0], [1], [0, 0, 1, 1], [], []>} : vector<2x16xf32>, vector<16x64xf32>, vector<2x64xf32> -> vector<2x64xf32>
    %1134 = arith.addf %1128, %1133 : vector<2x64xf32>
    %c4_407 = arith.constant 4 : index
    %c0_408 = arith.constant 0 : index
    %c0_409 = arith.constant 0 : index
    %1135 = vector.load %arg14[%c4_407, %c0_408, %c0_409] : memref<28x2x16xf32, #tpu.memory_space<vmem>>, vector<1x2x16xf32>
    %1136 = vector.shape_cast %1135 : vector<1x2x16xf32> to vector<2x16xf32>
    %c4_410 = arith.constant 4 : index
    %c0_411 = arith.constant 0 : index
    %c0_412 = arith.constant 0 : index
    %1137 = vector.load %arg6[%c4_410, %c0_411, %c0_412] : memref<28x16x64xf32, #tpu.memory_space<vmem>>, vector<1x16x64xf32>
    %1138 = vector.shape_cast %1137 : vector<1x16x64xf32> to vector<16x64xf32>
    %cst_413 = arith.constant dense<0.000000e+00> : vector<2x64xf32>
    %1139 = tpu.matmul %1136, %1138, %cst_413 {dimension_numbers = #tpu.dot_dimension_numbers<[1], [0], [0], [1], [0, 0, 1, 1], [], []>} : vector<2x16xf32>, vector<16x64xf32>, vector<2x64xf32> -> vector<2x64xf32>
    %1140 = arith.addf %1134, %1139 : vector<2x64xf32>
    %c5_414 = arith.constant 5 : index
    %c0_415 = arith.constant 0 : index
    %c0_416 = arith.constant 0 : index
    %1141 = vector.load %arg14[%c5_414, %c0_415, %c0_416] : memref<28x2x16xf32, #tpu.memory_space<vmem>>, vector<1x2x16xf32>
    %1142 = vector.shape_cast %1141 : vector<1x2x16xf32> to vector<2x16xf32>
    %c5_417 = arith.constant 5 : index
    %c0_418 = arith.constant 0 : index
    %c0_419 = arith.constant 0 : index
    %1143 = vector.load %arg6[%c5_417, %c0_418, %c0_419] : memref<28x16x64xf32, #tpu.memory_space<vmem>>, vector<1x16x64xf32>
    %1144 = vector.shape_cast %1143 : vector<1x16x64xf32> to vector<16x64xf32>
    %cst_420 = arith.constant dense<0.000000e+00> : vector<2x64xf32>
    %1145 = tpu.matmul %1142, %1144, %cst_420 {dimension_numbers = #tpu.dot_dimension_numbers<[1], [0], [0], [1], [0, 0, 1, 1], [], []>} : vector<2x16xf32>, vector<16x64xf32>, vector<2x64xf32> -> vector<2x64xf32>
    %1146 = arith.addf %1140, %1145 : vector<2x64xf32>
    %c6_421 = arith.constant 6 : index
    %c0_422 = arith.constant 0 : index
    %c0_423 = arith.constant 0 : index
    %1147 = vector.load %arg14[%c6_421, %c0_422, %c0_423] : memref<28x2x16xf32, #tpu.memory_space<vmem>>, vector<1x2x16xf32>
    %1148 = vector.shape_cast %1147 : vector<1x2x16xf32> to vector<2x16xf32>
    %c6_424 = arith.constant 6 : index
    %c0_425 = arith.constant 0 : index
    %c0_426 = arith.constant 0 : index
    %1149 = vector.load %arg6[%c6_424, %c0_425, %c0_426] : memref<28x16x64xf32, #tpu.memory_space<vmem>>, vector<1x16x64xf32>
    %1150 = vector.shape_cast %1149 : vector<1x16x64xf32> to vector<16x64xf32>
    %cst_427 = arith.constant dense<0.000000e+00> : vector<2x64xf32>
    %1151 = tpu.matmul %1148, %1150, %cst_427 {dimension_numbers = #tpu.dot_dimension_numbers<[1], [0], [0], [1], [0, 0, 1, 1], [], []>} : vector<2x16xf32>, vector<16x64xf32>, vector<2x64xf32> -> vector<2x64xf32>
    %1152 = arith.addf %1146, %1151 : vector<2x64xf32>
    %c7_428 = arith.constant 7 : index
    %c0_429 = arith.constant 0 : index
    %c0_430 = arith.constant 0 : index
    %1153 = vector.load %arg14[%c7_428, %c0_429, %c0_430] : memref<28x2x16xf32, #tpu.memory_space<vmem>>, vector<1x2x16xf32>
    %1154 = vector.shape_cast %1153 : vector<1x2x16xf32> to vector<2x16xf32>
    %c7_431 = arith.constant 7 : index
    %c0_432 = arith.constant 0 : index
    %c0_433 = arith.constant 0 : index
    %1155 = vector.load %arg6[%c7_431, %c0_432, %c0_433] : memref<28x16x64xf32, #tpu.memory_space<vmem>>, vector<1x16x64xf32>
    %1156 = vector.shape_cast %1155 : vector<1x16x64xf32> to vector<16x64xf32>
    %cst_434 = arith.constant dense<0.000000e+00> : vector<2x64xf32>
    %1157 = tpu.matmul %1154, %1156, %cst_434 {dimension_numbers = #tpu.dot_dimension_numbers<[1], [0], [0], [1], [0, 0, 1, 1], [], []>} : vector<2x16xf32>, vector<16x64xf32>, vector<2x64xf32> -> vector<2x64xf32>
    %1158 = arith.addf %1152, %1157 : vector<2x64xf32>
    %c8_435 = arith.constant 8 : index
    %c0_436 = arith.constant 0 : index
    %c0_437 = arith.constant 0 : index
    %1159 = vector.load %arg14[%c8_435, %c0_436, %c0_437] : memref<28x2x16xf32, #tpu.memory_space<vmem>>, vector<1x2x16xf32>
    %1160 = vector.shape_cast %1159 : vector<1x2x16xf32> to vector<2x16xf32>
    %c8_438 = arith.constant 8 : index
    %c0_439 = arith.constant 0 : index
    %c0_440 = arith.constant 0 : index
    %1161 = vector.load %arg6[%c8_438, %c0_439, %c0_440] : memref<28x16x64xf32, #tpu.memory_space<vmem>>, vector<1x16x64xf32>
    %1162 = vector.shape_cast %1161 : vector<1x16x64xf32> to vector<16x64xf32>
    %cst_441 = arith.constant dense<0.000000e+00> : vector<2x64xf32>
    %1163 = tpu.matmul %1160, %1162, %cst_441 {dimension_numbers = #tpu.dot_dimension_numbers<[1], [0], [0], [1], [0, 0, 1, 1], [], []>} : vector<2x16xf32>, vector<16x64xf32>, vector<2x64xf32> -> vector<2x64xf32>
    %1164 = arith.addf %1158, %1163 : vector<2x64xf32>
    %c9_442 = arith.constant 9 : index
    %c0_443 = arith.constant 0 : index
    %c0_444 = arith.constant 0 : index
    %1165 = vector.load %arg14[%c9_442, %c0_443, %c0_444] : memref<28x2x16xf32, #tpu.memory_space<vmem>>, vector<1x2x16xf32>
    %1166 = vector.shape_cast %1165 : vector<1x2x16xf32> to vector<2x16xf32>
    %c9_445 = arith.constant 9 : index
    %c0_446 = arith.constant 0 : index
    %c0_447 = arith.constant 0 : index
    %1167 = vector.load %arg6[%c9_445, %c0_446, %c0_447] : memref<28x16x64xf32, #tpu.memory_space<vmem>>, vector<1x16x64xf32>
    %1168 = vector.shape_cast %1167 : vector<1x16x64xf32> to vector<16x64xf32>
    %cst_448 = arith.constant dense<0.000000e+00> : vector<2x64xf32>
    %1169 = tpu.matmul %1166, %1168, %cst_448 {dimension_numbers = #tpu.dot_dimension_numbers<[1], [0], [0], [1], [0, 0, 1, 1], [], []>} : vector<2x16xf32>, vector<16x64xf32>, vector<2x64xf32> -> vector<2x64xf32>
    %1170 = arith.addf %1164, %1169 : vector<2x64xf32>
    %c10_449 = arith.constant 10 : index
    %c0_450 = arith.constant 0 : index
    %c0_451 = arith.constant 0 : index
    %1171 = vector.load %arg14[%c10_449, %c0_450, %c0_451] : memref<28x2x16xf32, #tpu.memory_space<vmem>>, vector<1x2x16xf32>
    %1172 = vector.shape_cast %1171 : vector<1x2x16xf32> to vector<2x16xf32>
    %c10_452 = arith.constant 10 : index
    %c0_453 = arith.constant 0 : index
    %c0_454 = arith.constant 0 : index
    %1173 = vector.load %arg6[%c10_452, %c0_453, %c0_454] : memref<28x16x64xf32, #tpu.memory_space<vmem>>, vector<1x16x64xf32>
    %1174 = vector.shape_cast %1173 : vector<1x16x64xf32> to vector<16x64xf32>
    %cst_455 = arith.constant dense<0.000000e+00> : vector<2x64xf32>
    %1175 = tpu.matmul %1172, %1174, %cst_455 {dimension_numbers = #tpu.dot_dimension_numbers<[1], [0], [0], [1], [0, 0, 1, 1], [], []>} : vector<2x16xf32>, vector<16x64xf32>, vector<2x64xf32> -> vector<2x64xf32>
    %1176 = arith.addf %1170, %1175 : vector<2x64xf32>
    %c11_456 = arith.constant 11 : index
    %c0_457 = arith.constant 0 : index
    %c0_458 = arith.constant 0 : index
    %1177 = vector.load %arg14[%c11_456, %c0_457, %c0_458] : memref<28x2x16xf32, #tpu.memory_space<vmem>>, vector<1x2x16xf32>
    %1178 = vector.shape_cast %1177 : vector<1x2x16xf32> to vector<2x16xf32>
    %c11_459 = arith.constant 11 : index
    %c0_460 = arith.constant 0 : index
    %c0_461 = arith.constant 0 : index
    %1179 = vector.load %arg6[%c11_459, %c0_460, %c0_461] : memref<28x16x64xf32, #tpu.memory_space<vmem>>, vector<1x16x64xf32>
    %1180 = vector.shape_cast %1179 : vector<1x16x64xf32> to vector<16x64xf32>
    %cst_462 = arith.constant dense<0.000000e+00> : vector<2x64xf32>
    %1181 = tpu.matmul %1178, %1180, %cst_462 {dimension_numbers = #tpu.dot_dimension_numbers<[1], [0], [0], [1], [0, 0, 1, 1], [], []>} : vector<2x16xf32>, vector<16x64xf32>, vector<2x64xf32> -> vector<2x64xf32>
    %1182 = arith.addf %1176, %1181 : vector<2x64xf32>
    %c12_463 = arith.constant 12 : index
    %c0_464 = arith.constant 0 : index
    %c0_465 = arith.constant 0 : index
    %1183 = vector.load %arg14[%c12_463, %c0_464, %c0_465] : memref<28x2x16xf32, #tpu.memory_space<vmem>>, vector<1x2x16xf32>
    %1184 = vector.shape_cast %1183 : vector<1x2x16xf32> to vector<2x16xf32>
    %c12_466 = arith.constant 12 : index
    %c0_467 = arith.constant 0 : index
    %c0_468 = arith.constant 0 : index
    %1185 = vector.load %arg6[%c12_466, %c0_467, %c0_468] : memref<28x16x64xf32, #tpu.memory_space<vmem>>, vector<1x16x64xf32>
    %1186 = vector.shape_cast %1185 : vector<1x16x64xf32> to vector<16x64xf32>
    %cst_469 = arith.constant dense<0.000000e+00> : vector<2x64xf32>
    %1187 = tpu.matmul %1184, %1186, %cst_469 {dimension_numbers = #tpu.dot_dimension_numbers<[1], [0], [0], [1], [0, 0, 1, 1], [], []>} : vector<2x16xf32>, vector<16x64xf32>, vector<2x64xf32> -> vector<2x64xf32>
    %1188 = arith.addf %1182, %1187 : vector<2x64xf32>
    %c13_470 = arith.constant 13 : index
    %c0_471 = arith.constant 0 : index
    %c0_472 = arith.constant 0 : index
    %1189 = vector.load %arg14[%c13_470, %c0_471, %c0_472] : memref<28x2x16xf32, #tpu.memory_space<vmem>>, vector<1x2x16xf32>
    %1190 = vector.shape_cast %1189 : vector<1x2x16xf32> to vector<2x16xf32>
    %c13_473 = arith.constant 13 : index
    %c0_474 = arith.constant 0 : index
    %c0_475 = arith.constant 0 : index
    %1191 = vector.load %arg6[%c13_473, %c0_474, %c0_475] : memref<28x16x64xf32, #tpu.memory_space<vmem>>, vector<1x16x64xf32>
    %1192 = vector.shape_cast %1191 : vector<1x16x64xf32> to vector<16x64xf32>
    %cst_476 = arith.constant dense<0.000000e+00> : vector<2x64xf32>
    %1193 = tpu.matmul %1190, %1192, %cst_476 {dimension_numbers = #tpu.dot_dimension_numbers<[1], [0], [0], [1], [0, 0, 1, 1], [], []>} : vector<2x16xf32>, vector<16x64xf32>, vector<2x64xf32> -> vector<2x64xf32>
    %1194 = arith.addf %1188, %1193 : vector<2x64xf32>
    %c14_477 = arith.constant 14 : index
    %c0_478 = arith.constant 0 : index
    %c0_479 = arith.constant 0 : index
    %1195 = vector.load %arg14[%c14_477, %c0_478, %c0_479] : memref<28x2x16xf32, #tpu.memory_space<vmem>>, vector<1x2x16xf32>
    %1196 = vector.shape_cast %1195 : vector<1x2x16xf32> to vector<2x16xf32>
    %c14_480 = arith.constant 14 : index
    %c0_481 = arith.constant 0 : index
    %c0_482 = arith.constant 0 : index
    %1197 = vector.load %arg6[%c14_480, %c0_481, %c0_482] : memref<28x16x64xf32, #tpu.memory_space<vmem>>, vector<1x16x64xf32>
    %1198 = vector.shape_cast %1197 : vector<1x16x64xf32> to vector<16x64xf32>
    %cst_483 = arith.constant dense<0.000000e+00> : vector<2x64xf32>
    %1199 = tpu.matmul %1196, %1198, %cst_483 {dimension_numbers = #tpu.dot_dimension_numbers<[1], [0], [0], [1], [0, 0, 1, 1], [], []>} : vector<2x16xf32>, vector<16x64xf32>, vector<2x64xf32> -> vector<2x64xf32>
    %1200 = arith.addf %1194, %1199 : vector<2x64xf32>
    %c15_484 = arith.constant 15 : index
    %c0_485 = arith.constant 0 : index
    %c0_486 = arith.constant 0 : index
    %1201 = vector.load %arg14[%c15_484, %c0_485, %c0_486] : memref<28x2x16xf32, #tpu.memory_space<vmem>>, vector<1x2x16xf32>
    %1202 = vector.shape_cast %1201 : vector<1x2x16xf32> to vector<2x16xf32>
    %c15_487 = arith.constant 15 : index
    %c0_488 = arith.constant 0 : index
    %c0_489 = arith.constant 0 : index
    %1203 = vector.load %arg6[%c15_487, %c0_488, %c0_489] : memref<28x16x64xf32, #tpu.memory_space<vmem>>, vector<1x16x64xf32>
    %1204 = vector.shape_cast %1203 : vector<1x16x64xf32> to vector<16x64xf32>
    %cst_490 = arith.constant dense<0.000000e+00> : vector<2x64xf32>
    %1205 = tpu.matmul %1202, %1204, %cst_490 {dimension_numbers = #tpu.dot_dimension_numbers<[1], [0], [0], [1], [0, 0, 1, 1], [], []>} : vector<2x16xf32>, vector<16x64xf32>, vector<2x64xf32> -> vector<2x64xf32>
    %1206 = arith.addf %1200, %1205 : vector<2x64xf32>
    %c16_491 = arith.constant 16 : index
    %c0_492 = arith.constant 0 : index
    %c0_493 = arith.constant 0 : index
    %1207 = vector.load %arg14[%c16_491, %c0_492, %c0_493] : memref<28x2x16xf32, #tpu.memory_space<vmem>>, vector<1x2x16xf32>
    %1208 = vector.shape_cast %1207 : vector<1x2x16xf32> to vector<2x16xf32>
    %c16_494 = arith.constant 16 : index
    %c0_495 = arith.constant 0 : index
    %c0_496 = arith.constant 0 : index
    %1209 = vector.load %arg6[%c16_494, %c0_495, %c0_496] : memref<28x16x64xf32, #tpu.memory_space<vmem>>, vector<1x16x64xf32>
    %1210 = vector.shape_cast %1209 : vector<1x16x64xf32> to vector<16x64xf32>
    %cst_497 = arith.constant dense<0.000000e+00> : vector<2x64xf32>
    %1211 = tpu.matmul %1208, %1210, %cst_497 {dimension_numbers = #tpu.dot_dimension_numbers<[1], [0], [0], [1], [0, 0, 1, 1], [], []>} : vector<2x16xf32>, vector<16x64xf32>, vector<2x64xf32> -> vector<2x64xf32>
    %1212 = arith.addf %1206, %1211 : vector<2x64xf32>
    %c17_498 = arith.constant 17 : index
    %c0_499 = arith.constant 0 : index
    %c0_500 = arith.constant 0 : index
    %1213 = vector.load %arg14[%c17_498, %c0_499, %c0_500] : memref<28x2x16xf32, #tpu.memory_space<vmem>>, vector<1x2x16xf32>
    %1214 = vector.shape_cast %1213 : vector<1x2x16xf32> to vector<2x16xf32>
    %c17_501 = arith.constant 17 : index
    %c0_502 = arith.constant 0 : index
    %c0_503 = arith.constant 0 : index
    %1215 = vector.load %arg6[%c17_501, %c0_502, %c0_503] : memref<28x16x64xf32, #tpu.memory_space<vmem>>, vector<1x16x64xf32>
    %1216 = vector.shape_cast %1215 : vector<1x16x64xf32> to vector<16x64xf32>
    %cst_504 = arith.constant dense<0.000000e+00> : vector<2x64xf32>
    %1217 = tpu.matmul %1214, %1216, %cst_504 {dimension_numbers = #tpu.dot_dimension_numbers<[1], [0], [0], [1], [0, 0, 1, 1], [], []>} : vector<2x16xf32>, vector<16x64xf32>, vector<2x64xf32> -> vector<2x64xf32>
    %1218 = arith.addf %1212, %1217 : vector<2x64xf32>
    %c18_505 = arith.constant 18 : index
    %c0_506 = arith.constant 0 : index
    %c0_507 = arith.constant 0 : index
    %1219 = vector.load %arg14[%c18_505, %c0_506, %c0_507] : memref<28x2x16xf32, #tpu.memory_space<vmem>>, vector<1x2x16xf32>
    %1220 = vector.shape_cast %1219 : vector<1x2x16xf32> to vector<2x16xf32>
    %c18_508 = arith.constant 18 : index
    %c0_509 = arith.constant 0 : index
    %c0_510 = arith.constant 0 : index
    %1221 = vector.load %arg6[%c18_508, %c0_509, %c0_510] : memref<28x16x64xf32, #tpu.memory_space<vmem>>, vector<1x16x64xf32>
    %1222 = vector.shape_cast %1221 : vector<1x16x64xf32> to vector<16x64xf32>
    %cst_511 = arith.constant dense<0.000000e+00> : vector<2x64xf32>
    %1223 = tpu.matmul %1220, %1222, %cst_511 {dimension_numbers = #tpu.dot_dimension_numbers<[1], [0], [0], [1], [0, 0, 1, 1], [], []>} : vector<2x16xf32>, vector<16x64xf32>, vector<2x64xf32> -> vector<2x64xf32>
    %1224 = arith.addf %1218, %1223 : vector<2x64xf32>
    %c19_512 = arith.constant 19 : index
    %c0_513 = arith.constant 0 : index
    %c0_514 = arith.constant 0 : index
    %1225 = vector.load %arg14[%c19_512, %c0_513, %c0_514] : memref<28x2x16xf32, #tpu.memory_space<vmem>>, vector<1x2x16xf32>
    %1226 = vector.shape_cast %1225 : vector<1x2x16xf32> to vector<2x16xf32>
    %c19_515 = arith.constant 19 : index
    %c0_516 = arith.constant 0 : index
    %c0_517 = arith.constant 0 : index
    %1227 = vector.load %arg6[%c19_515, %c0_516, %c0_517] : memref<28x16x64xf32, #tpu.memory_space<vmem>>, vector<1x16x64xf32>
    %1228 = vector.shape_cast %1227 : vector<1x16x64xf32> to vector<16x64xf32>
    %cst_518 = arith.constant dense<0.000000e+00> : vector<2x64xf32>
    %1229 = tpu.matmul %1226, %1228, %cst_518 {dimension_numbers = #tpu.dot_dimension_numbers<[1], [0], [0], [1], [0, 0, 1, 1], [], []>} : vector<2x16xf32>, vector<16x64xf32>, vector<2x64xf32> -> vector<2x64xf32>
    %1230 = arith.addf %1224, %1229 : vector<2x64xf32>
    %c20_519 = arith.constant 20 : index
    %c0_520 = arith.constant 0 : index
    %c0_521 = arith.constant 0 : index
    %1231 = vector.load %arg14[%c20_519, %c0_520, %c0_521] : memref<28x2x16xf32, #tpu.memory_space<vmem>>, vector<1x2x16xf32>
    %1232 = vector.shape_cast %1231 : vector<1x2x16xf32> to vector<2x16xf32>
    %c20_522 = arith.constant 20 : index
    %c0_523 = arith.constant 0 : index
    %c0_524 = arith.constant 0 : index
    %1233 = vector.load %arg6[%c20_522, %c0_523, %c0_524] : memref<28x16x64xf32, #tpu.memory_space<vmem>>, vector<1x16x64xf32>
    %1234 = vector.shape_cast %1233 : vector<1x16x64xf32> to vector<16x64xf32>
    %cst_525 = arith.constant dense<0.000000e+00> : vector<2x64xf32>
    %1235 = tpu.matmul %1232, %1234, %cst_525 {dimension_numbers = #tpu.dot_dimension_numbers<[1], [0], [0], [1], [0, 0, 1, 1], [], []>} : vector<2x16xf32>, vector<16x64xf32>, vector<2x64xf32> -> vector<2x64xf32>
    %1236 = arith.addf %1230, %1235 : vector<2x64xf32>
    %c21_526 = arith.constant 21 : index
    %c0_527 = arith.constant 0 : index
    %c0_528 = arith.constant 0 : index
    %1237 = vector.load %arg14[%c21_526, %c0_527, %c0_528] : memref<28x2x16xf32, #tpu.memory_space<vmem>>, vector<1x2x16xf32>
    %1238 = vector.shape_cast %1237 : vector<1x2x16xf32> to vector<2x16xf32>
    %c21_529 = arith.constant 21 : index
    %c0_530 = arith.constant 0 : index
    %c0_531 = arith.constant 0 : index
    %1239 = vector.load %arg6[%c21_529, %c0_530, %c0_531] : memref<28x16x64xf32, #tpu.memory_space<vmem>>, vector<1x16x64xf32>
    %1240 = vector.shape_cast %1239 : vector<1x16x64xf32> to vector<16x64xf32>
    %cst_532 = arith.constant dense<0.000000e+00> : vector<2x64xf32>
    %1241 = tpu.matmul %1238, %1240, %cst_532 {dimension_numbers = #tpu.dot_dimension_numbers<[1], [0], [0], [1], [0, 0, 1, 1], [], []>} : vector<2x16xf32>, vector<16x64xf32>, vector<2x64xf32> -> vector<2x64xf32>
    %1242 = arith.addf %1236, %1241 : vector<2x64xf32>
    %c22_533 = arith.constant 22 : index
    %c0_534 = arith.constant 0 : index
    %c0_535 = arith.constant 0 : index
    %1243 = vector.load %arg14[%c22_533, %c0_534, %c0_535] : memref<28x2x16xf32, #tpu.memory_space<vmem>>, vector<1x2x16xf32>
    %1244 = vector.shape_cast %1243 : vector<1x2x16xf32> to vector<2x16xf32>
    %c22_536 = arith.constant 22 : index
    %c0_537 = arith.constant 0 : index
    %c0_538 = arith.constant 0 : index
    %1245 = vector.load %arg6[%c22_536, %c0_537, %c0_538] : memref<28x16x64xf32, #tpu.memory_space<vmem>>, vector<1x16x64xf32>
    %1246 = vector.shape_cast %1245 : vector<1x16x64xf32> to vector<16x64xf32>
    %cst_539 = arith.constant dense<0.000000e+00> : vector<2x64xf32>
    %1247 = tpu.matmul %1244, %1246, %cst_539 {dimension_numbers = #tpu.dot_dimension_numbers<[1], [0], [0], [1], [0, 0, 1, 1], [], []>} : vector<2x16xf32>, vector<16x64xf32>, vector<2x64xf32> -> vector<2x64xf32>
    %1248 = arith.addf %1242, %1247 : vector<2x64xf32>
    %c23_540 = arith.constant 23 : index
    %c0_541 = arith.constant 0 : index
    %c0_542 = arith.constant 0 : index
    %1249 = vector.load %arg14[%c23_540, %c0_541, %c0_542] : memref<28x2x16xf32, #tpu.memory_space<vmem>>, vector<1x2x16xf32>
    %1250 = vector.shape_cast %1249 : vector<1x2x16xf32> to vector<2x16xf32>
    %c23_543 = arith.constant 23 : index
    %c0_544 = arith.constant 0 : index
    %c0_545 = arith.constant 0 : index
    %1251 = vector.load %arg6[%c23_543, %c0_544, %c0_545] : memref<28x16x64xf32, #tpu.memory_space<vmem>>, vector<1x16x64xf32>
    %1252 = vector.shape_cast %1251 : vector<1x16x64xf32> to vector<16x64xf32>
    %cst_546 = arith.constant dense<0.000000e+00> : vector<2x64xf32>
    %1253 = tpu.matmul %1250, %1252, %cst_546 {dimension_numbers = #tpu.dot_dimension_numbers<[1], [0], [0], [1], [0, 0, 1, 1], [], []>} : vector<2x16xf32>, vector<16x64xf32>, vector<2x64xf32> -> vector<2x64xf32>
    %1254 = arith.addf %1248, %1253 : vector<2x64xf32>
    %c24_547 = arith.constant 24 : index
    %c0_548 = arith.constant 0 : index
    %c0_549 = arith.constant 0 : index
    %1255 = vector.load %arg14[%c24_547, %c0_548, %c0_549] : memref<28x2x16xf32, #tpu.memory_space<vmem>>, vector<1x2x16xf32>
    %1256 = vector.shape_cast %1255 : vector<1x2x16xf32> to vector<2x16xf32>
    %c24_550 = arith.constant 24 : index
    %c0_551 = arith.constant 0 : index
    %c0_552 = arith.constant 0 : index
    %1257 = vector.load %arg6[%c24_550, %c0_551, %c0_552] : memref<28x16x64xf32, #tpu.memory_space<vmem>>, vector<1x16x64xf32>
    %1258 = vector.shape_cast %1257 : vector<1x16x64xf32> to vector<16x64xf32>
    %cst_553 = arith.constant dense<0.000000e+00> : vector<2x64xf32>
    %1259 = tpu.matmul %1256, %1258, %cst_553 {dimension_numbers = #tpu.dot_dimension_numbers<[1], [0], [0], [1], [0, 0, 1, 1], [], []>} : vector<2x16xf32>, vector<16x64xf32>, vector<2x64xf32> -> vector<2x64xf32>
    %1260 = arith.addf %1254, %1259 : vector<2x64xf32>
    %c25_554 = arith.constant 25 : index
    %c0_555 = arith.constant 0 : index
    %c0_556 = arith.constant 0 : index
    %1261 = vector.load %arg14[%c25_554, %c0_555, %c0_556] : memref<28x2x16xf32, #tpu.memory_space<vmem>>, vector<1x2x16xf32>
    %1262 = vector.shape_cast %1261 : vector<1x2x16xf32> to vector<2x16xf32>
    %c25_557 = arith.constant 25 : index
    %c0_558 = arith.constant 0 : index
    %c0_559 = arith.constant 0 : index
    %1263 = vector.load %arg6[%c25_557, %c0_558, %c0_559] : memref<28x16x64xf32, #tpu.memory_space<vmem>>, vector<1x16x64xf32>
    %1264 = vector.shape_cast %1263 : vector<1x16x64xf32> to vector<16x64xf32>
    %cst_560 = arith.constant dense<0.000000e+00> : vector<2x64xf32>
    %1265 = tpu.matmul %1262, %1264, %cst_560 {dimension_numbers = #tpu.dot_dimension_numbers<[1], [0], [0], [1], [0, 0, 1, 1], [], []>} : vector<2x16xf32>, vector<16x64xf32>, vector<2x64xf32> -> vector<2x64xf32>
    %1266 = arith.addf %1260, %1265 : vector<2x64xf32>
    %c26_561 = arith.constant 26 : index
    %c0_562 = arith.constant 0 : index
    %c0_563 = arith.constant 0 : index
    %1267 = vector.load %arg14[%c26_561, %c0_562, %c0_563] : memref<28x2x16xf32, #tpu.memory_space<vmem>>, vector<1x2x16xf32>
    %1268 = vector.shape_cast %1267 : vector<1x2x16xf32> to vector<2x16xf32>
    %c26_564 = arith.constant 26 : index
    %c0_565 = arith.constant 0 : index
    %c0_566 = arith.constant 0 : index
    %1269 = vector.load %arg6[%c26_564, %c0_565, %c0_566] : memref<28x16x64xf32, #tpu.memory_space<vmem>>, vector<1x16x64xf32>
    %1270 = vector.shape_cast %1269 : vector<1x16x64xf32> to vector<16x64xf32>
    %cst_567 = arith.constant dense<0.000000e+00> : vector<2x64xf32>
    %1271 = tpu.matmul %1268, %1270, %cst_567 {dimension_numbers = #tpu.dot_dimension_numbers<[1], [0], [0], [1], [0, 0, 1, 1], [], []>} : vector<2x16xf32>, vector<16x64xf32>, vector<2x64xf32> -> vector<2x64xf32>
    %1272 = arith.addf %1266, %1271 : vector<2x64xf32>
    %c27_568 = arith.constant 27 : index
    %c0_569 = arith.constant 0 : index
    %c0_570 = arith.constant 0 : index
    %1273 = vector.load %arg14[%c27_568, %c0_569, %c0_570] : memref<28x2x16xf32, #tpu.memory_space<vmem>>, vector<1x2x16xf32>
    %1274 = vector.shape_cast %1273 : vector<1x2x16xf32> to vector<2x16xf32>
    %c27_571 = arith.constant 27 : index
    %c0_572 = arith.constant 0 : index
    %c0_573 = arith.constant 0 : index
    %1275 = vector.load %arg6[%c27_571, %c0_572, %c0_573] : memref<28x16x64xf32, #tpu.memory_space<vmem>>, vector<1x16x64xf32>
    %1276 = vector.shape_cast %1275 : vector<1x16x64xf32> to vector<16x64xf32>
    %cst_574 = arith.constant dense<0.000000e+00> : vector<2x64xf32>
    %1277 = tpu.matmul %1274, %1276, %cst_574 {dimension_numbers = #tpu.dot_dimension_numbers<[1], [0], [0], [1], [0, 0, 1, 1], [], []>} : vector<2x16xf32>, vector<16x64xf32>, vector<2x64xf32> -> vector<2x64xf32>
    %1278 = arith.addf %1272, %1277 : vector<2x64xf32>
    %cst_575 = arith.constant 0.000000e+00 : f32
    %1279 = vector.broadcast %cst_575 : f32 to vector<2x64xf32>
    %1280 = arith.maximumf %1278, %1279 : vector<2x64xf32>
    %c0_576 = arith.constant 0 : index
    %c0_577 = arith.constant 0 : index
    %1281 = vector.load %arg1[%c0_576, %c0_577] : memref<2x16xf32, #tpu.memory_space<vmem>>, vector<2x16xf32>
    %c0_578 = arith.constant 0 : index
    %c0_579 = arith.constant 0 : index
    %1282 = vector.load %arg8[%c0_578, %c0_579] : memref<16x64xf32, #tpu.memory_space<vmem>>, vector<16x64xf32>
    %cst_580 = arith.constant dense<0.000000e+00> : vector<2x64xf32>
    %1283 = tpu.matmul %1281, %1282, %cst_580 {dimension_numbers = #tpu.dot_dimension_numbers<[1], [0], [0], [1], [0, 0, 1, 1], [], []>} : vector<2x16xf32>, vector<16x64xf32>, vector<2x64xf32> -> vector<2x64xf32>
    %c0_581 = arith.constant 0 : index
    %c0_582 = arith.constant 0 : index
    %1284 = vector.load %arg9[%c0_581, %c0_582] : memref<1x64xf32, #tpu.memory_space<vmem>>, vector<1x64xf32>
    %1285 = vector.broadcast %1284 : vector<1x64xf32> to vector<2x64xf32>
    %1286 = arith.addf %1283, %1285 : vector<2x64xf32>
    %cst_583 = arith.constant 0.000000e+00 : f32
    %1287 = vector.broadcast %cst_583 : f32 to vector<2x64xf32>
    %1288 = arith.maximumf %1286, %1287 : vector<2x64xf32>
    %1289 = arith.addf %1280, %1288 : vector<2x64xf32>
    %c0_584 = arith.constant 0 : index
    %c0_585 = arith.constant 0 : index
    %1290 = vector.load %arg10[%c0_584, %c0_585] : memref<64x16xf32, #tpu.memory_space<vmem>>, vector<64x16xf32>
    %cst_586 = arith.constant dense<0.000000e+00> : vector<2x16xf32>
    %1291 = tpu.matmul %1289, %1290, %cst_586 {dimension_numbers = #tpu.dot_dimension_numbers<[1], [0], [0], [1], [0, 0, 1, 1], [], []>} : vector<2x64xf32>, vector<64x16xf32>, vector<2x16xf32> -> vector<2x16xf32>
    %c0_587 = arith.constant 0 : index
    %c0_588 = arith.constant 0 : index
    %1292 = vector.load %arg11[%c0_587, %c0_588] : memref<1x16xf32, #tpu.memory_space<vmem>>, vector<1x16xf32>
    %1293 = vector.broadcast %1292 : vector<1x16xf32> to vector<2x16xf32>
    %1294 = arith.addf %1291, %1293 : vector<2x16xf32>
    %cst_589 = arith.constant 0.000000e+00 : f32
    %1295 = vector.broadcast %cst_589 : f32 to vector<2x16xf32>
    %1296 = arith.maximumf %1294, %1295 : vector<2x16xf32>
    %1297 = math.tanh %1296 : vector<2x16xf32>
    %c0_590 = arith.constant 0 : index
    %c0_591 = arith.constant 0 : index
    %1298 = vector.load %arg13[%c0_590, %c0_591] : memref<2x16xf32, #tpu.memory_space<vmem>>, vector<2x16xf32>
    tpu.vector_store %arg13[%c0_590, %c0_591], %1297 {strides = array<i32>} : memref<2x16xf32, #tpu.memory_space<vmem>>, vector<2x16xf32>,
    return
  }
}

</mosaic_0001>

<bundles_post_ra>
// kernel: actor_forward.1
= control target key start
LH: loop header
LB: loop body
LE: loop exit
PB: predicated region body
PF: predicated region fallthrough
CT: control target
= control target key end

     0   :  { %19 = vsyncpa [#allocation4], 0  ;;  %s5230_s0 = inlined_call_operand.vmem [shape: f32[28,2,16], index: 0, kind: input, shape index: {}]   ;;  %s5231_s1 = inlined_call_operand.vmem [shape: f32[2,16], index: 1, kind: input, shape index: {}]   ;;  %s5232_s2 = inlined_call_operand.vmem [shape: f32[16,48], index: 2, kind: input, shape index: {}]   ;;  %s5233_s3 = inlined_call_operand.vmem [shape: f32[16,48], index: 3, kind: input, shape index: {}]   ;;  %s5234_s4 = inlined_call_operand.vmem [shape: f32[1,48], index: 4, kind: input, shape index: {}]   ;;  %s5235_s5 = inlined_call_operand.vmem [shape: f32[1,48], index: 5, kind: input, shape index: {}]   ;;  %s5236_s6 = inlined_call_operand.hbm [shape: f32[28,16,64], index: 6, kind: input, shape index: {}]   ;;  %s5237_s7 = inlined_call_operand.vmem [shape: f32[1,64], index: 7, kind: input, shape index: {}]   ;;  %s5238_s8 = inlined_call_operand.vmem [shape: f32[16,64], index: 8, kind: input, shape index: {}]   ;;  %s5239_s9 = inlined_call_operand.vmem [shape: f32[1,64], index: 9, kind: input, shape index: {}]   ;;  %s5240_s10 = inlined_call_operand.vmem [shape: f32[64,16], index: 10, kind: input, shape index: {}]   ;;  %s5241_s11 = inlined_call_operand.vmem [shape: f32[1,16], index: 11, kind: input, shape index: {}]   ;;  %s5242_s12 = inlined_call_operand.vmem [shape: f32[28,16], index: 12, kind: output, shape index: {0}]   ;;  %s5243_s13 = inlined_call_operand.hbm [shape: f32[2,16], index: 13, kind: output, shape index: {1}]  }
   0x1   :  { %20 = vsyncpa [#allocation5], 0  ;;  %s37_s27 = sshll.u32 %s5236_s6, 4  ;;  %s4184_s28 = smov [#allocation3]   ;;  %s38_s27 = int_to_ptr.hbm [resolvable:$true] %s37_s27 }
   0x2   :  { %s39_s29 = sshll.u32 %s4184_s28, 4  ;;  %s4185_s30 = smov 128   ;;  %s40_s29 = int_to_ptr.vmem [resolvable:$true] %s39_s29 }
   0x3   :  { %s4186_s14 = smov 8  }
   0x4   :  { %45 = dma.hbm_to_vmem [thread:$0]  %s38_s27, 7168, %s40_s29, [#allocation4], %s4185_s30, %s4185_s30, %s4186_s14  }
   0x5   :  { %4180 = dma.done.wait [#allocation4], 7168  }
   0x6   :  { %4181 = vsyncadd [#allocation4], 4294960128  ;;  %v4268_v0 = vld [vmem:[%s5232_s2 + $0x8] sm:$0xff]  ;;  %v4273_v1 = vld [vmem:[%s5232_s2] sm:$0xff]  ;;  %vm73_vm0 = vcmask 130048   ;;  %v4187_v11 = vmov 0.0  }
   0x7   :  { %91 = vmatpush.msra.mxu0 %v4268_v0  ;;  %v72_v2 = vld [vmem:[%s5230_s0] sm:$0x3]  ;;  %216 = vmatpush.msra.mxu1 %v4268_v0  ;;  %v3790_v3 = vld [vmem:[%s5230_s0 + $0x8] sm:$0x3]  ;;  %v3798_v4 = vld [vmem:[%s5230_s0 + $0x10] sm:$0x3] }
   0x8   :  { %116 = vmatpush.msra.mxu2 %v4268_v0  ;;  %166 = vmatpush.msra.mxu3 %v4268_v0  ;;  %v3806_v5 = vld [vmem:[%s5230_s0 + $0x18] sm:$0x3]  ;;  %v3814_v6 = vld [vmem:[%s5230_s0 + $0x20] sm:$0x3]  ;;  %v3822_v7 = vld [vmem:[%s5230_s0 + $0x28] sm:$0x3] }
   0x9   :  { %92 = vmatpush.msra.mxu0 %v4273_v1  ;;  %217 = vmatpush.msra.mxu1 %v4273_v1  ;;  %v4327_v8 = vld [vmem:[%s5233_s3 + $0x8] sm:$0xff]  ;;  %v4333_v9 = vld [vmem:[%s5233_s3] sm:$0xff]  ;;  %v3830_v10 = vld [vmem:[%s5230_s0 + $0x30] sm:$0x3]  ;;  %s4188_s19 = smov 96   ;;  %s4189_s21 = smov 32  }
   0xa   :  { %3783 = vmatmul.msk.f32.vlgmr.msra.gmra.mxu0 %vm73_vm0, %v72_v2  ;;  %117 = vmatpush.msra.mxu2 %v4273_v1  ;;  %v4360_v19 = vld [vmem:[%s5235_s5] ss:$0 sm:$0xff]  ;;  %s4190_s22 = smov 112   ;;  %v3792_v43 = vld [vmem:[%s5230_s0 + $0xa] sm:$0x3]  ;;  %vm845_vm5 = vcmask 123905  }
   0xb   :  { %316 = vmatpush.msrb.mxu1 %v4268_v0  ;;  %191 = vmatpush.msrb.mxu0 %v4268_v0  ;;  %v4367_v22 = vld [vmem:[%s5234_s4] ss:$0 sm:$0xff]  ;;  %v3800_v44 = vld [vmem:[%s5230_s0 + $0x12] sm:$0x3]  ;;  %v3784_v45 = vld [vmem:[%s5230_s0 + $0x2] sm:$0x3] }
   0xc   :  { %141 = vmatpush.msrb.mxu2 %v4268_v0  ;;  %167 = vmatpush.msra.mxu3 %v4273_v1  ;;  %v3808_v46 = vld [vmem:[%s5230_s0 + $0x1a] sm:$0x3]  ;;  %v3816_v47 = vld [vmem:[%s5230_s0 + $0x22] sm:$0x3]  ;;  %v3824_v53 = vld [vmem:[%s5230_s0 + $0x2a] sm:$0x3] }
   0xd   :  { %317 = vmatpush.msrb.mxu1 %v4273_v1  ;;  %192 = vmatpush.msrb.mxu0 %v4273_v1  ;;  %v3832_v54 = vld [vmem:[%s5230_s0 + $0x32] sm:$0x3] }
   0xe   :  { %142 = vmatpush.msrb.mxu2 %v4273_v1  ;;  %266 = vmatpush.msrb.mxu3 %v4268_v0 }
   0xf   :  { %291 = vmatpush.msra.mxu0 %v4268_v0  ;;  %3793 = vmatmul.msk.f32.vlgmr.msra.gmra.mxu1 %vm73_vm0, %v3792_v43  ;;  %v3826_v43 = vld [vmem:[%s5230_s0 + $0x2c] sm:$0x3] }
  0x10   :  { %267 = vmatpush.msrb.mxu3 %v4273_v1  ;;  %416 = vmatpush.msra.mxu1 %v4268_v0 }
  0x11   :  { %292 = vmatpush.msra.mxu0 %v4273_v1  ;;  %3785 = vmatmul.msk.f32.vlgmr.msra.gmra.mxu2 %vm73_vm0, %v3784_v45 }
  0x12   :  { %3791 = vmatmul.msk.f32.vlgmr.msrb.gmra.mxu0 %vm73_vm0, %v3790_v3  ;;  %417 = vmatpush.msra.mxu1 %v4273_v1 }
  0x13   :  { %391 = vmatpush.msrb.mxu0 %v4268_v0  ;;  %241 = vmatpush.msra.mxu2 %v4268_v0 }
  0x15   :  { %392 = vmatpush.msrb.mxu0 %v4273_v1  ;;  %242 = vmatpush.msra.mxu2 %v4273_v1 }
  0x17   :  { %3801 = vmatmul.msk.f32.vlgmr.msrb.gmra.mxu1 %vm73_vm0, %v3800_v44  ;;  %v3834_v44 = vld [vmem:[%s5230_s0 + $0x34] sm:$0x3] }
  0x18   :  { %516 = vmatpush.msrb.mxu1 %v4268_v0 }
  0x1a   :  { %3799 = vmatmul.msk.f32.vlgmr.msra.gmra.mxu0 %vm73_vm0, %v3798_v4  ;;  %517 = vmatpush.msrb.mxu1 %v4273_v1 }
  0x1b   :  { %491 = vmatpush.msra.mxu0 %v4268_v0 }
  0x1d   :  { %492 = vmatpush.msra.mxu0 %v4273_v1 }
  0x1f   :  { %3809 = vmatmul.msk.f32.vlgmr.msra.gmra.mxu1 %vm73_vm0, %v3808_v46 }
  0x20   :  { %616 = vmatpush.msra.mxu1 %v4268_v0 }
  0x22   :  { %3807 = vmatmul.msk.f32.vlgmr.msrb.gmra.mxu0 %vm73_vm0, %v3806_v5  ;;  %617 = vmatpush.msra.mxu1 %v4273_v1 }
  0x23   :  { %591 = vmatpush.msrb.mxu0 %v4268_v0 }
  0x25   :  { %592 = vmatpush.msrb.mxu0 %v4273_v1 }
  0x27   :  { %3817 = vmatmul.msk.f32.vlgmr.msrb.gmra.mxu1 %vm73_vm0, %v3816_v47 }
  0x28   :  { %716 = vmatpush.msrb.mxu1 %v4268_v0 }
  0x2a   :  { %3815 = vmatmul.msk.f32.vlgmr.msra.gmra.mxu0 %vm73_vm0, %v3814_v6  ;;  %717 = vmatpush.msrb.mxu1 %v4273_v1 }
  0x2b   :  { %691 = vmatpush.msra.mxu0 %v4268_v0 }
  0x2d   :  { %692 = vmatpush.msra.mxu0 %v4273_v1 }
  0x2f   :  { %3825 = vmatmul.msk.f32.vlgmr.msra.gmra.mxu1 %vm73_vm0, %v3824_v53 }
  0x30   :  { %863 = vmatpush.msra.mxu1 %v4327_v8 }
  0x32   :  { %3823 = vmatmul.msk.f32.vlgmr.msrb.gmra.mxu0 %vm73_vm0, %v3822_v7  ;;  %864 = vmatpush.msra.mxu1 %v4333_v9 }
  0x33   :  { %789 = vmatpush.msrb.mxu0 %v4327_v8 }
  0x35   :  { %790 = vmatpush.msrb.mxu0 %v4333_v9 }
  0x37   :  { %3833 = vmatmul.msk.f32.vlgmr.msrb.gmra.mxu1 %vm73_vm0, %v3832_v54 }
  0x38   :  { %1155 = vmatpush.msrb.mxu1 %v4327_v8 }
  0x3a   :  { %3831 = vmatmul.msk.f32.vlgmr.msra.gmra.mxu0 %vm73_vm0, %v3830_v10  ;;  %1156 = vmatpush.msrb.mxu1 %v4333_v9 }
  0x3b   :  { %1082 = vmatpush.msra.mxu0 %v4327_v8 }
  0x3d   :  { %1083 = vmatpush.msra.mxu0 %v4333_v9 }
  0x42   :  { %791 = vmatmul.f32.vlgmr.msrb.gmra.mxu0 %v4187_v11 }
  0x43   :  { %1374 = vmatpush.msrb.mxu0 %v4327_v8 }
  0x45   :  { %1375 = vmatpush.msrb.mxu0 %v4333_v9 }
  0x87   :  { %v94_v12 = vpop.f32.mrf.mxu0 }
  0x88   :  { %v95_v23 = vadd.f32 %v4367_v22, %v94_v12 }
  0x8c   :  { %v4425_v56 = vpop.f32.mrf.mxu1 }
  0x8f   :  { %v4345_v13 = vpop.f32.mrf.mxu0 }
  0x94   :  { %v4427_v57 = vpop.f32.mrf.mxu1  ;;  %v119_v2 = vpop.f32.mrf.mxu2 }
  0x95   :  { %v120_v3 = vadd.f32 %v4367_v22, %v119_v2 }
  0x97   :  { %v4347_v14 = vpop.f32.mrf.mxu0 }
  0x9c   :  { %v4429_v58 = vpop.f32.mrf.mxu1 }
  0x9f   :  { %v4349_v15 = vpop.f32.mrf.mxu0 }
  0xa4   :  { %v4431_v59 = vpop.f32.mrf.mxu1 }
  0xa7   :  { %v4351_v16 = vpop.f32.mrf.mxu0 }
  0xac   :  { %v4433_v60 = vpop.f32.mrf.mxu1 }
  0xaf   :  { %v4353_v17 = vpop.f32.mrf.mxu0 }
  0xb4   :  { %v4435_v61 = vpop.f32.mrf.mxu1 }
  0xb7   :  { %v4355_v18 = vpop.f32.mrf.mxu0 }
  0xbf   :  { %v792_v20 = vpop.f32.mrf.mxu0 }
  0xc0   :  { %v793_v21 = vadd.f32 %v4360_v19, %v792_v20 }
  0xc2   :  { %816 = vrot.lane.b32.xlu0 %v793_v21, %s4188_s19  ;;  %v795_v24 = vadd.f32 %v793_v21, %v95_v23 }
  0xc4   :  { %v3838_v25 = vmul.f32 -1.442695, %v795_v24 }
  0xc6   :  { %3940 = vpow2.f32 %v3838_v25 }
  0xcc   :  { %v3941_v26 = vpop.eup %3940 }
  0xcd   :  { %v799_v27 = vadd.f32 1.0, %v3941_v26 }
  0xcf   :  { %3942 = vrcp.f32 %v799_v27  ;;  %v811_v33 = vand.u32 2147483648, %v799_v27  ;;  %vm805_vm2 = vweird.f32 %v799_v27  ;;  %v809_v34 = vand.u32 2147483647, %v799_v27 }
  0xd1   :  { %v812_v36 = vor.u32 1.1754944e-38, %v811_v33  ;;  %vm810_vm4 = vcmp.eq.f32.partialorder %v809_v34, 8.507059e+37  ;;  %v3786_v33 = vld [vmem:[%s5230_s0 + $0x4] sm:$0x3]  ;;  %v3794_v34 = vld [vmem:[%s5230_s0 + $0xc] sm:$0x3] }
  0xd2   :  { %3787 = vmatmul.msk.f32.vlgmr.msrb.gmra.mxu2 %vm73_vm0, %v3786_v33  ;;  %v3812_v33 = vld [vmem:[%s5230_s0 + $0x1e] sm:$0x3] }
  0xd3   :  { %341 = vmatpush.msrb.mxu2 %v4268_v0 }
  0xd5   :  { %v3943_v28 = vpop.eup %3942  ;;  %342 = vmatpush.msrb.mxu2 %v4273_v1 }
  0xd6   :  { %v801_v29 = vmul.f32 %v3943_v28, %v799_v27  ;;  %vm806_vm1 = vweird.f32 %v3943_v28 }
  0xd7   :  { %vm807_vm3 = vmor %vm805_vm2, %vm806_vm1 }
  0xd8   :  { %v802_v30 = vsub.f32 1.0, %v801_v29 }
  0xda   :  { %v803_v31 = vmul.f32 %v3943_v28, %v802_v30  ;;  %3795 = vmatmul.msk.f32.vlgmr.msra.gmra.mxu2 %vm73_vm0, %v3794_v34 }
  0xdb   :  { %441 = vmatpush.msra.mxu2 %v4268_v0 }
  0xdc   :  { %v804_v32 = vadd.f32 %v3943_v28, %v803_v31 }
  0xdd   :  { %442 = vmatpush.msra.mxu2 %v4273_v1 }
  0xde   :  { %v808_v35 = vsel %vm807_vm3, %v3943_v28, %v804_v32 }
  0xdf   :  { %v813_v38 = vsel %vm810_vm4, %v812_v36, %v808_v35  ;;  %v3802_v35 = vld [vmem:[%s5230_s0 + $0x14] sm:$0x3]  ;;  %v3810_v36 = vld [vmem:[%s5230_s0 + $0x1c] sm:$0x3] }
  0xe0   :  { %v826_v48 = vsub.f32 1.0, %v813_v38  ;;  %v832_v50 = vmul.f32 0.0, %v813_v38 }
  0xe2   :  { %3803 = vmatmul.msk.f32.vlgmr.msrb.gmra.mxu2 %vm73_vm0, %v3802_v35 }
  0xe3   :  { %541 = vmatpush.msrb.mxu2 %v4268_v0 }
  0xe5   :  { %542 = vmatpush.msrb.mxu2 %v4273_v1 }
  0xea   :  { %3811 = vmatmul.msk.f32.vlgmr.msra.gmra.mxu2 %vm73_vm0, %v3810_v36 }
  0xeb   :  { %641 = vmatpush.msra.mxu2 %v4268_v0 }
  0xed   :  { %642 = vmatpush.msra.mxu2 %v4273_v1 }
 0x134   :  { %v817_v37 = vpop.permute.xlu0 %816 }
 0x135   :  { %v819_v39 = vmul.f32 %v817_v37, %v813_v38 }
 0x137   :  { %821 = vrot.lane.b32.xlu0 %v819_v39, %s4189_s21 }
 0x155   :  { %v144_v46 = vpop.f32.mrf.mxu2 }
 0x15d   :  { %v4496_v47 = vpop.f32.mrf.mxu2 }
 0x1a9   :  { %v822_v40 = vpop.permute.xlu0 %821 }
 0x1aa   :  { %v824_v41 = vadd.f32 %v822_v40, %v95_v23 }
 0x1ac   :  { %3944 = vtanh.f32 %v824_v41 }
 0x1b2   :  { %v3945_v42 = vpop.eup %3944 }
 0x1b3   :  { %828 = vrot.lane.b32.xlu1 %v3945_v42, %s4190_s22  ;;  %v3818_v42 = vld [vmem:[%s5230_s0 + $0x24] sm:$0x3] }
 0x1b4   :  { %3819 = vmatmul.msk.f32.vlgmr.msrb.gmra.mxu2 %vm73_vm0, %v3818_v42  ;;  %v3836_v42 = vld [vmem:[%s5230_s0 + $0x36] sm:$0x3] }
 0x1b5   :  { %741 = vmatpush.msrb.mxu2 %v4268_v0 }
 0x1b7   :  { %742 = vmatpush.msrb.mxu2 %v4273_v1 }
 0x1bc   :  { %3827 = vmatmul.msk.f32.vlgmr.msra.gmra.mxu2 %vm73_vm0, %v3826_v43 }
 0x1bd   :  { %936 = vmatpush.msra.mxu2 %v4327_v8 }
 0x1bf   :  { %937 = vmatpush.msra.mxu2 %v4333_v9 }
 0x1c4   :  { %3835 = vmatmul.msk.f32.vlgmr.msrb.gmra.mxu2 %vm73_vm0, %v3834_v44 }
 0x1c5   :  { %1228 = vmatpush.msrb.mxu2 %v4327_v8 }
 0x1c7   :  { %1229 = vmatpush.msrb.mxu2 %v4333_v9 }
 0x225   :  { %v829_v49 = vpop.permute.xlu1 %828 }
 0x226   :  { %v831_v51 = vmul.f32 %v829_v49, %v826_v48  ;;  %v4498_v48 = vpop.f32.mrf.mxu2 }
 0x228   :  { %v4402_v52 = vadd.f32 %v832_v50, %v831_v51 }
 0x22a   :  { %842 = vrot.lane.b32.xlu1 %v4402_v52, %s4190_s22 }
 0x22e   :  { %v4500_v49 = vpop.f32.mrf.mxu2 }
 0x237   :  { %v4502_v50 = vpop.f32.mrf.mxu2 }
 0x23f   :  { %v4504_v51 = vpop.f32.mrf.mxu2 }
 0x247   :  { %v4506_v53 = vpop.f32.mrf.mxu2 }
 0x29c   :  { %v843_v55 = vpop.permute.xlu1 %842 }
 0x29d   :  { %846 = vst.msk [vmem:[%s5242_s12 - $0x1] sm:$0x2] %vm845_vm5, %v843_v55  ;;  %3839 = vmatmul.msk.f32.vlgmr.msra.gmra.mxu1 %vm73_vm0, %v843_v55 }
 0x29e   :  { %1447 = vmatpush.msra.mxu1 %v4327_v8 }
 0x2a0   :  { %1448 = vmatpush.msra.mxu1 %v4333_v9 }
 0x31a   :  { %v866_v62 = vpop.f32.mrf.mxu1 }
 0x31b   :  { %v867_v63 = vadd.f32 %v4360_v19, %v866_v62  ;;  %v145_v62 = vadd.f32 %v4367_v22, %v144_v46 }
 0x31d   :  { %890 = vrot.lane.b32.xlu2 %v867_v63, %s4188_s19  ;;  %v869_v4 = vadd.f32 %v867_v63, %v120_v3 }
 0x31f   :  { %v3840_v5 = vmul.f32 -1.442695, %v869_v4 }
 0x321   :  { %3946 = vpow2.f32 %v3840_v5 }
 0x327   :  { %v3947_v6 = vpop.eup %3946 }
 0x328   :  { %v873_v7 = vadd.f32 1.0, %v3947_v6 }
 0x32a   :  { %3948 = vrcp.f32 %v873_v7  ;;  %v885_v23 = vand.u32 2147483648, %v873_v7  ;;  %vm879_vm7 = vweird.f32 %v873_v7  ;;  %v883_v24 = vand.u32 2147483647, %v873_v7 }
 0x32c   :  { %v886_v26 = vor.u32 1.1754944e-38, %v885_v23  ;;  %vm884_vm9 = vcmp.eq.f32.partialorder %v883_v24, 8.507059e+37 }
 0x330   :  { %v3949_v10 = vpop.eup %3948 }
 0x331   :  { %v875_v11 = vmul.f32 %v3949_v10, %v873_v7  ;;  %vm880_vm6 = vweird.f32 %v3949_v10 }
 0x332   :  { %vm881_vm8 = vmor %vm879_vm7, %vm880_vm6 }
 0x333   :  { %v876_v12 = vsub.f32 1.0, %v875_v11 }
 0x335   :  { %v877_v20 = vmul.f32 %v3949_v10, %v876_v12 }
 0x337   :  { %v878_v21 = vadd.f32 %v3949_v10, %v877_v20 }
 0x339   :  { %v882_v25 = vsel %vm881_vm8, %v3949_v10, %v878_v21 }
 0x33a   :  { %v887_v28 = vsel %vm884_vm9, %v886_v26, %v882_v25 }
 0x33b   :  { %v900_v37 = vsub.f32 1.0, %v887_v28  ;;  %v906_v39 = vmul.f32 %v887_v28, %v4402_v52 }
 0x377   :  { %v891_v27 = vpop.permute.xlu2 %890 }
 0x378   :  { %v893_v29 = vmul.f32 %v891_v27, %v887_v28 }
 0x37a   :  { %895 = vrot.lane.b32.xlu2 %v893_v29, %s4189_s21 }
 0x3d4   :  { %v896_v30 = vpop.permute.xlu2 %895 }
 0x3d5   :  { %v898_v31 = vadd.f32 %v896_v30, %v120_v3  ;;  %v3788_v30 = vld [vmem:[%s5230_s0 + $0x6] sm:$0x3] }
 0x3d6   :  { %3789 = vmatmul.msk.f32.vlgmr.msra.gmra.mxu3 %vm73_vm0, %v3788_v30 }
 0x3d7   :  { %3950 = vtanh.f32 %v898_v31  ;;  %366 = vmatpush.msra.mxu3 %v4268_v0  ;;  %v3796_v31 = vld [vmem:[%s5230_s0 + $0xe] sm:$0x3] }
 0x3d9   :  { %367 = vmatpush.msra.mxu3 %v4273_v1 }
 0x3dd   :  { %v3951_v32 = vpop.eup %3950 }
 0x3de   :  { %902 = vrot.lane.b32.xlu0 %v3951_v32, %s4190_s22  ;;  %3797 = vmatmul.msk.f32.vlgmr.msrb.gmra.mxu3 %vm73_vm0, %v3796_v31  ;;  %v3804_v32 = vld [vmem:[%s5230_s0 + $0x16] sm:$0x3] }
 0x3df   :  { %466 = vmatpush.msrb.mxu3 %v4268_v0 }
 0x3e1   :  { %467 = vmatpush.msrb.mxu3 %v4273_v1 }
 0x3e6   :  { %3805 = vmatmul.msk.f32.vlgmr.msra.gmra.mxu3 %vm73_vm0, %v3804_v32 }
 0x3e7   :  { %566 = vmatpush.msra.mxu3 %v4268_v0 }
 0x3e9   :  { %567 = vmatpush.msra.mxu3 %v4273_v1 }
 0x3ee   :  { %3813 = vmatmul.msk.f32.vlgmr.msrb.gmra.mxu3 %vm73_vm0, %v3812_v33 }
 0x3ef   :  { %666 = vmatpush.msrb.mxu3 %v4268_v0 }
 0x3f1   :  { %667 = vmatpush.msrb.mxu3 %v4273_v1 }
 0x450   :  { %v903_v38 = vpop.permute.xlu0 %902 }
 0x451   :  { %v905_v40 = vmul.f32 %v903_v38, %v900_v37 }
 0x453   :  { %v4467_v41 = vadd.f32 %v906_v39, %v905_v40  ;;  %v3820_v39 = vld [vmem:[%s5230_s0 + $0x26] sm:$0x3]  ;;  %v3828_v40 = vld [vmem:[%s5230_s0 + $0x2e] sm:$0x3] }
 0x454   :  { %3821 = vmatmul.msk.f32.vlgmr.msra.gmra.mxu3 %vm73_vm0, %v3820_v39 }
 0x455   :  { %916 = vrot.lane.b32.xlu1 %v4467_v41, %s4190_s22  ;;  %766 = vmatpush.msra.mxu3 %v4268_v0 }
 0x457   :  { %767 = vmatpush.msra.mxu3 %v4273_v1 }
 0x459   :  { %v169_v1 = vpop.f32.mrf.mxu3 }
 0x45c   :  { %3829 = vmatmul.msk.f32.vlgmr.msrb.gmra.mxu3 %vm73_vm0, %v3828_v40 }
 0x45d   :  { %1009 = vmatpush.msrb.mxu3 %v4327_v8 }
 0x45f   :  { %1010 = vmatpush.msrb.mxu3 %v4333_v9 }
 0x461   :  { %v4567_v43 = vpop.f32.mrf.mxu3 }
 0x464   :  { %3837 = vmatmul.msk.f32.vlgmr.msra.gmra.mxu3 %vm73_vm0, %v3836_v42  ;;  %v195_v42 = vadd.f32 %v4367_v22, %v4345_v13 }
 0x465   :  { %1301 = vmatpush.msra.mxu3 %v4327_v8 }
 0x467   :  { %1302 = vmatpush.msra.mxu3 %v4333_v9 }
 0x469   :  { %v4569_v44 = vpop.f32.mrf.mxu3 }
 0x4c7   :  { %v917_v45 = vpop.permute.xlu1 %916 }
 0x4c8   :  { %919 = vst.msk [vmem:[%s5242_s12] sm:$0x2] %vm845_vm5, %v917_v45  ;;  %3841 = vmatmul.msk.f32.vlgmr.msra.gmra.mxu2 %vm73_vm0, %v917_v45  ;;  %v4571_v45 = vpop.f32.mrf.mxu3 }
 0x4c9   :  { %1520 = vmatpush.msra.mxu2 %v4327_v8 }
 0x4cb   :  { %1521 = vmatpush.msra.mxu2 %v4333_v9 }
 0x4d7   :  { %v4573_v46 = vpop.f32.mrf.mxu3 }
 0x54b   :  { %v939_v54 = vpop.f32.mrf.mxu2 }
 0x54c   :  { %v940_v55 = vadd.f32 %v4360_v19, %v939_v54  ;;  %v4575_v54 = vpop.f32.mrf.mxu3 }
 0x54e   :  { %963 = vrot.lane.b32.xlu2 %v940_v55, %s4188_s19  ;;  %v942_v63 = vadd.f32 %v940_v55, %v145_v62 }
 0x550   :  { %v3842_v2 = vmul.f32 -1.442695, %v942_v63 }
 0x552   :  { %3952 = vpow2.f32 %v3842_v2  ;;  %v170_v2 = vadd.f32 %v4367_v22, %v169_v1 }
 0x554   :  { %v4577_v55 = vpop.f32.mrf.mxu3 }
 0x558   :  { %v3953_v3 = vpop.eup %3952 }
 0x559   :  { %v946_v4 = vadd.f32 1.0, %v3953_v3 }
 0x55b   :  { %3954 = vrcp.f32 %v946_v4  ;;  %v958_v12 = vand.u32 2147483648, %v946_v4  ;;  %vm952_vm11 = vweird.f32 %v946_v4  ;;  %v956_v20 = vand.u32 2147483647, %v946_v4 }
 0x55d   :  { %v959_v23 = vor.u32 1.1754944e-38, %v958_v12  ;;  %vm957_vm13 = vcmp.eq.f32.partialorder %v956_v20, 8.507059e+37 }
 0x561   :  { %v3955_v5 = vpop.eup %3954 }
 0x562   :  { %v948_v6 = vmul.f32 %v3955_v5, %v946_v4  ;;  %vm953_vm10 = vweird.f32 %v3955_v5 }
 0x563   :  { %vm954_vm12 = vmor %vm952_vm11, %vm953_vm10 }
 0x564   :  { %v949_v7 = vsub.f32 1.0, %v948_v6 }
 0x566   :  { %v950_v10 = vmul.f32 %v3955_v5, %v949_v7 }
 0x568   :  { %v951_v11 = vadd.f32 %v3955_v5, %v950_v10 }
 0x56a   :  { %v955_v21 = vsel %vm954_vm12, %v3955_v5, %v951_v11 }
 0x56b   :  { %v960_v25 = vsel %vm957_vm13, %v959_v23, %v955_v21 }
 0x56c   :  { %v973_v34 = vsub.f32 1.0, %v960_v25  ;;  %v979_v36 = vmul.f32 %v960_v25, %v4467_v41 }
 0x5a8   :  { %v964_v24 = vpop.permute.xlu2 %963 }
 0x5a9   :  { %v966_v26 = vmul.f32 %v964_v24, %v960_v25 }
 0x5ab   :  { %968 = vrot.lane.b32.xlu0 %v966_v26, %s4189_s21 }
 0x61d   :  { %v969_v27 = vpop.permute.xlu0 %968 }
 0x61e   :  { %v971_v28 = vadd.f32 %v969_v27, %v145_v62 }
 0x620   :  { %3956 = vtanh.f32 %v971_v28 }
 0x626   :  { %v3957_v29 = vpop.eup %3956 }
 0x627   :  { %975 = vrot.lane.b32.xlu1 %v3957_v29, %s4190_s22 }
 0x699   :  { %v976_v35 = vpop.permute.xlu1 %975 }
 0x69a   :  { %v978_v37 = vmul.f32 %v976_v35, %v973_v34 }
 0x69c   :  { %v4538_v38 = vadd.f32 %v979_v36, %v978_v37 }
 0x69e   :  { %989 = vrot.lane.b32.xlu2 %v4538_v38, %s4190_s22 }
 0x6f8   :  { %v990_v0 = vpop.permute.xlu2 %989 }
 0x6f9   :  { %992 = vst.msk [vmem:[%s5242_s12 + $0x1] sm:$0x2] %vm845_vm5, %v990_v0  ;;  %3843 = vmatmul.msk.f32.vlgmr.msrb.gmra.mxu3 %vm73_vm0, %v990_v0 }
 0x6fa   :  { %1593 = vmatpush.msrb.mxu3 %v4327_v8 }
 0x6fc   :  { %1594 = vmatpush.msrb.mxu3 %v4333_v9 }
 0x77c   :  { %v1012_v62 = vpop.f32.mrf.mxu3 }
 0x77d   :  { %v1013_v63 = vadd.f32 %v4360_v19, %v1012_v62 }
 0x77f   :  { %1036 = vrot.lane.b32.xlu0 %v1013_v63, %s4188_s19  ;;  %v1015_v3 = vadd.f32 %v1013_v63, %v170_v2 }
 0x781   :  { %v3844_v4 = vmul.f32 -1.442695, %v1015_v3 }
 0x783   :  { %3958 = vpow2.f32 %v3844_v4 }
 0x789   :  { %v3959_v5 = vpop.eup %3958 }
 0x78a   :  { %v1019_v6 = vadd.f32 1.0, %v3959_v5 }
 0x78c   :  { %3960 = vrcp.f32 %v1019_v6  ;;  %v1031_v21 = vand.u32 2147483648, %v1019_v6  ;;  %vm1025_vm15 = vweird.f32 %v1019_v6  ;;  %v1029_v23 = vand.u32 2147483647, %v1019_v6 }
 0x78e   :  { %v1032_v25 = vor.u32 1.1754944e-38, %v1031_v21  ;;  %vm1030_vm2 = vcmp.eq.f32.partialorder %v1029_v23, 8.507059e+37 }
 0x792   :  { %v3961_v7 = vpop.eup %3960 }
 0x793   :  { %v1021_v10 = vmul.f32 %v3961_v7, %v1019_v6  ;;  %vm1026_vm14 = vweird.f32 %v3961_v7 }
 0x794   :  { %vm1027_vm1 = vmor %vm1025_vm15, %vm1026_vm14 }
 0x795   :  { %v1022_v11 = vsub.f32 1.0, %v1021_v10 }
 0x797   :  { %v1023_v12 = vmul.f32 %v3961_v7, %v1022_v11 }
 0x799   :  { %v1024_v20 = vadd.f32 %v3961_v7, %v1023_v12 }
 0x79b   :  { %v1028_v24 = vsel %vm1027_vm1, %v3961_v7, %v1024_v20 }
 0x79c   :  { %v1033_v27 = vsel %vm1030_vm2, %v1032_v25, %v1028_v24 }
 0x79d   :  { %v1046_v32 = vsub.f32 1.0, %v1033_v27  ;;  %v1052_v34 = vmul.f32 %v1033_v27, %v4538_v38 }
 0x7f1   :  { %v1037_v26 = vpop.permute.xlu0 %1036 }
 0x7f2   :  { %v1039_v28 = vmul.f32 %v1037_v26, %v1033_v27 }
 0x7f4   :  { %1041 = vrot.lane.b32.xlu1 %v1039_v28, %s4189_s21 }
 0x866   :  { %v1042_v29 = vpop.permute.xlu1 %1041 }
 0x867   :  { %v1044_v30 = vadd.f32 %v1042_v29, %v170_v2 }
 0x869   :  { %3962 = vtanh.f32 %v1044_v30 }
 0x86f   :  { %v3963_v31 = vpop.eup %3962 }
 0x870   :  { %1048 = vrot.lane.b32.xlu2 %v3963_v31, %s4190_s22 }
 0x8ca   :  { %v1049_v33 = vpop.permute.xlu2 %1048 }
 0x8cb   :  { %v1051_v35 = vmul.f32 %v1049_v33, %v1046_v32 }
 0x8cd   :  { %v4585_v36 = vadd.f32 %v1052_v34, %v1051_v35  ;;  %v220_v34 = vadd.f32 %v4367_v22, %v4425_v56 }
 0x8cf   :  { %1062 = vrot.lane.b32.xlu0 %v4585_v36, %s4190_s22 }
 0x941   :  { %v1063_v37 = vpop.permute.xlu0 %1062 }
 0x942   :  { %1065 = vst.msk [vmem:[%s5242_s12 + $0x2] sm:$0x2] %vm845_vm5, %v1063_v37  ;;  %3845 = vmatmul.msk.f32.vlgmr.msra.gmra.mxu0 %vm73_vm0, %v1063_v37 }
 0x943   :  { %1666 = vmatpush.msra.mxu0 %v4327_v8 }
 0x945   :  { %1667 = vmatpush.msra.mxu0 %v4333_v9 }
 0x9bf   :  { %v1085_v39 = vpop.f32.mrf.mxu0 }
 0x9c0   :  { %v1086_v40 = vadd.f32 %v4360_v19, %v1085_v39 }
 0x9c2   :  { %1109 = vrot.lane.b32.xlu1 %v1086_v40, %s4188_s19  ;;  %v1088_v0 = vadd.f32 %v1086_v40, %v195_v42 }
 0x9c4   :  { %v3846_v1 = vmul.f32 -1.442695, %v1088_v0 }
 0x9c6   :  { %3964 = vpow2.f32 %v3846_v1 }
 0x9cc   :  { %v3965_v62 = vpop.eup %3964 }
 0x9cd   :  { %v1092_v63 = vadd.f32 1.0, %v3965_v62 }
 0x9cf   :  { %3966 = vrcp.f32 %v1092_v63  ;;  %v1104_v7 = vand.u32 2147483648, %v1092_v63  ;;  %vm1098_vm4 = vweird.f32 %v1092_v63  ;;  %v1102_v10 = vand.u32 2147483647, %v1092_v63 }
 0x9d1   :  { %v1105_v12 = vor.u32 1.1754944e-38, %v1104_v7  ;;  %vm1103_vm7 = vcmp.eq.f32.partialorder %v1102_v10, 8.507059e+37 }
 0x9d5   :  { %v3967_v2 = vpop.eup %3966 }
 0x9d6   :  { %v1094_v3 = vmul.f32 %v3967_v2, %v1092_v63  ;;  %vm1099_vm3 = vweird.f32 %v3967_v2 }
 0x9d7   :  { %vm1100_vm6 = vmor %vm1098_vm4, %vm1099_vm3 }
 0x9d8   :  { %v1095_v4 = vsub.f32 1.0, %v1094_v3 }
 0x9da   :  { %v1096_v5 = vmul.f32 %v3967_v2, %v1095_v4 }
 0x9dc   :  { %v1097_v6 = vadd.f32 %v3967_v2, %v1096_v5 }
 0x9de   :  { %v1101_v11 = vsel %vm1100_vm6, %v3967_v2, %v1097_v6 }
 0x9df   :  { %v1106_v20 = vsel %vm1103_vm7, %v1105_v12, %v1101_v11 }
 0x9e0   :  { %v1119_v26 = vsub.f32 1.0, %v1106_v20  ;;  %v1125_v28 = vmul.f32 %v1106_v20, %v4585_v36 }
 0xa34   :  { %v1110_v13 = vpop.permute.xlu1 %1109 }
 0xa35   :  { %v1112_v21 = vmul.f32 %v1110_v13, %v1106_v20 }
 0xa37   :  { %1114 = vrot.lane.b32.xlu2 %v1112_v21, %s4189_s21 }
 0xa91   :  { %v1115_v23 = vpop.permute.xlu2 %1114 }
 0xa92   :  { %v1117_v24 = vadd.f32 %v1115_v23, %v195_v42 }
 0xa94   :  { %3968 = vtanh.f32 %v1117_v24 }
 0xa9a   :  { %v3969_v25 = vpop.eup %3968 }
 0xa9b   :  { %1121 = vrot.lane.b32.xlu0 %v3969_v25, %s4190_s22 }
 0xb0d   :  { %v1122_v27 = vpop.permute.xlu0 %1121 }
 0xb0e   :  { %v1124_v29 = vmul.f32 %v1122_v27, %v1119_v26 }
 0xb10   :  { %v4603_v30 = vadd.f32 %v1125_v28, %v1124_v29  ;;  %v245_v28 = vadd.f32 %v4367_v22, %v4496_v47 }
 0xb12   :  { %1135 = vrot.lane.b32.xlu1 %v4603_v30, %s4190_s22 }
 0xb84   :  { %v1136_v31 = vpop.permute.xlu1 %1135 }
 0xb85   :  { %1138 = vst.msk [vmem:[%s5242_s12 + $0x3] sm:$0x2] %vm845_vm5, %v1136_v31  ;;  %3847 = vmatmul.msk.f32.vlgmr.msrb.gmra.mxu1 %vm73_vm0, %v1136_v31 }
 0xb86   :  { %1739 = vmatpush.msrb.mxu1 %v4327_v8 }
 0xb88   :  { %1740 = vmatpush.msrb.mxu1 %v4333_v9 }
 0xc02   :  { %v1158_v32 = vpop.f32.mrf.mxu1 }
 0xc03   :  { %v1159_v33 = vadd.f32 %v4360_v19, %v1158_v32 }
 0xc05   :  { %1182 = vrot.lane.b32.xlu2 %v1159_v33, %s4188_s19  ;;  %v1161_v35 = vadd.f32 %v1159_v33, %v220_v34 }
 0xc07   :  { %v3848_v37 = vmul.f32 -1.442695, %v1161_v35 }
 0xc09   :  { %3970 = vpow2.f32 %v3848_v37 }
 0xc0f   :  { %v3971_v39 = vpop.eup %3970 }
 0xc10   :  { %v1165_v40 = vadd.f32 1.0, %v3971_v39 }
 0xc12   :  { %3972 = vrcp.f32 %v1165_v40  ;;  %v1177_v2 = vand.u32 2147483648, %v1165_v40  ;;  %vm1171_vm9 = vweird.f32 %v1165_v40  ;;  %v1175_v3 = vand.u32 2147483647, %v1165_v40 }
 0xc14   :  { %v1178_v5 = vor.u32 1.1754944e-38, %v1177_v2  ;;  %vm1176_vm11 = vcmp.eq.f32.partialorder %v1175_v3, 8.507059e+37 }
 0xc18   :  { %v3973_v42 = vpop.eup %3972 }
 0xc19   :  { %v1167_v0 = vmul.f32 %v3973_v42, %v1165_v40  ;;  %vm1172_vm8 = vweird.f32 %v3973_v42 }
 0xc1a   :  { %vm1173_vm10 = vmor %vm1171_vm9, %vm1172_vm8 }
 0xc1b   :  { %v1168_v1 = vsub.f32 1.0, %v1167_v0 }
 0xc1d   :  { %v1169_v62 = vmul.f32 %v3973_v42, %v1168_v1 }
 0xc1f   :  { %v1170_v63 = vadd.f32 %v3973_v42, %v1169_v62 }
 0xc21   :  { %v1174_v4 = vsel %vm1173_vm10, %v3973_v42, %v1170_v63 }
 0xc22   :  { %v1179_v6 = vsel %vm1176_vm11, %v1178_v5, %v1174_v4 }
 0xc23   :  { %v1192_v13 = vsub.f32 1.0, %v1179_v6  ;;  %v1198_v21 = vmul.f32 %v1179_v6, %v4603_v30 }
 0xc5f   :  { %v1183_v56 = vpop.permute.xlu2 %1182 }
 0xc60   :  { %v1185_v7 = vmul.f32 %v1183_v56, %v1179_v6 }
 0xc62   :  { %1187 = vrot.lane.b32.xlu0 %v1185_v7, %s4189_s21 }
 0xcd4   :  { %v1188_v10 = vpop.permute.xlu0 %1187 }
 0xcd5   :  { %v1190_v11 = vadd.f32 %v1188_v10, %v220_v34 }
 0xcd7   :  { %3974 = vtanh.f32 %v1190_v11 }
 0xcdd   :  { %v3975_v12 = vpop.eup %3974 }
 0xcde   :  { %1194 = vrot.lane.b32.xlu1 %v3975_v12, %s4190_s22 }
 0xd50   :  { %v1195_v20 = vpop.permute.xlu1 %1194 }
 0xd51   :  { %v1197_v23 = vmul.f32 %v1195_v20, %v1192_v13 }
 0xd53   :  { %v4621_v24 = vadd.f32 %v1198_v21, %v1197_v23  ;;  %v270_v21 = vadd.f32 %v4367_v22, %v4567_v43 }
 0xd55   :  { %1208 = vrot.lane.b32.xlu2 %v4621_v24, %s4190_s22 }
 0xdaf   :  { %v1209_v25 = vpop.permute.xlu2 %1208 }
 0xdb0   :  { %1211 = vst.msk [vmem:[%s5242_s12 + $0x4] sm:$0x2] %vm845_vm5, %v1209_v25  ;;  %3849 = vmatmul.msk.f32.vlgmr.msrb.gmra.mxu2 %vm73_vm0, %v1209_v25 }
 0xdb1   :  { %1812 = vmatpush.msrb.mxu2 %v4327_v8 }
 0xdb3   :  { %1813 = vmatpush.msrb.mxu2 %v4333_v9 }
 0xe33   :  { %v1231_v26 = vpop.f32.mrf.mxu2 }
 0xe34   :  { %v1232_v27 = vadd.f32 %v4360_v19, %v1231_v26 }
 0xe36   :  { %1255 = vrot.lane.b32.xlu0 %v1232_v27, %s4188_s19  ;;  %v1234_v29 = vadd.f32 %v1232_v27, %v245_v28 }
 0xe38   :  { %v3850_v31 = vmul.f32 -1.442695, %v1234_v29 }
 0xe3a   :  { %3976 = vpow2.f32 %v3850_v31 }
 0xe40   :  { %v3977_v32 = vpop.eup %3976 }
 0xe41   :  { %v1238_v33 = vadd.f32 1.0, %v3977_v32 }
 0xe43   :  { %3978 = vrcp.f32 %v1238_v33  ;;  %v1250_v42 = vand.u32 2147483648, %v1238_v33  ;;  %vm1244_vm13 = vweird.f32 %v1238_v33  ;;  %v1248_v0 = vand.u32 2147483647, %v1238_v33 }
 0xe45   :  { %v1251_v62 = vor.u32 1.1754944e-38, %v1250_v42  ;;  %vm1249_vm15 = vcmp.eq.f32.partialorder %v1248_v0, 8.507059e+37 }
 0xe49   :  { %v3979_v34 = vpop.eup %3978 }
 0xe4a   :  { %v1240_v35 = vmul.f32 %v3979_v34, %v1238_v33  ;;  %vm1245_vm12 = vweird.f32 %v3979_v34 }
 0xe4b   :  { %vm1246_vm14 = vmor %vm1244_vm13, %vm1245_vm12 }
 0xe4c   :  { %v1241_v37 = vsub.f32 1.0, %v1240_v35 }
 0xe4e   :  { %v1242_v39 = vmul.f32 %v3979_v34, %v1241_v37 }
 0xe50   :  { %v1243_v40 = vadd.f32 %v3979_v34, %v1242_v39 }
 0xe52   :  { %v1247_v1 = vsel %vm1246_vm14, %v3979_v34, %v1243_v40 }
 0xe53   :  { %v1252_v63 = vsel %vm1249_vm15, %v1251_v62, %v1247_v1 }
 0xe54   :  { %v1265_v56 = vsub.f32 1.0, %v1252_v63  ;;  %v1271_v7 = vmul.f32 %v1252_v63, %v4621_v24 }
 0xea8   :  { %v1256_v47 = vpop.permute.xlu0 %1255 }
 0xea9   :  { %v1258_v2 = vmul.f32 %v1256_v47, %v1252_v63 }
 0xeab   :  { %1260 = vrot.lane.b32.xlu1 %v1258_v2, %s4189_s21 }
 0xf1d   :  { %v1261_v3 = vpop.permute.xlu1 %1260 }
 0xf1e   :  { %v1263_v4 = vadd.f32 %v1261_v3, %v245_v28 }
 0xf20   :  { %3980 = vtanh.f32 %v1263_v4 }
 0xf26   :  { %v3981_v5 = vpop.eup %3980 }
 0xf27   :  { %1267 = vrot.lane.b32.xlu2 %v3981_v5, %s4190_s22 }
 0xf81   :  { %v1268_v6 = vpop.permute.xlu2 %1267 }
 0xf82   :  { %v1270_v10 = vmul.f32 %v1268_v6, %v1265_v56 }
 0xf84   :  { %v4639_v11 = vadd.f32 %v1271_v7, %v1270_v10 }
 0xf86   :  { %1281 = vrot.lane.b32.xlu0 %v4639_v11, %s4190_s22 }
 0xff8   :  { %v1282_v12 = vpop.permute.xlu0 %1281 }
 0xff9   :  { %1284 = vst.msk [vmem:[%s5242_s12 + $0x5] sm:$0x2] %vm845_vm5, %v1282_v12  ;;  %3851 = vmatmul.msk.f32.vlgmr.msra.gmra.mxu3 %vm73_vm0, %v1282_v12 }
 0xffa   :  { %1885 = vmatpush.msra.mxu3 %v4327_v8 }
 0xffc   :  { %1886 = vmatpush.msra.mxu3 %v4333_v9 }
0x107c   :  { %v1304_v13 = vpop.f32.mrf.mxu3 }
0x107d   :  { %v1305_v20 = vadd.f32 %v4360_v19, %v1304_v13 }
0x107f   :  { %1328 = vrot.lane.b32.xlu1 %v1305_v20, %s4188_s19  ;;  %v1307_v23 = vadd.f32 %v1305_v20, %v270_v21 }
0x1081   :  { %v3852_v25 = vmul.f32 -1.442695, %v1307_v23 }
0x1083   :  { %3982 = vpow2.f32 %v3852_v25 }
0x1089   :  { %v3983_v26 = vpop.eup %3982 }
0x108a   :  { %v1311_v27 = vadd.f32 1.0, %v3983_v26 }
0x108c   :  { %3984 = vrcp.f32 %v1311_v27  ;;  %v1323_v34 = vand.u32 2147483648, %v1311_v27  ;;  %vm1317_vm2 = vweird.f32 %v1311_v27  ;;  %v1321_v35 = vand.u32 2147483647, %v1311_v27 }
0x108e   :  { %v1324_v39 = vor.u32 1.1754944e-38, %v1323_v34  ;;  %vm1322_vm4 = vcmp.eq.f32.partialorder %v1321_v35, 8.507059e+37 }
0x1092   :  { %v3985_v28 = vpop.eup %3984 }
0x1093   :  { %v1313_v29 = vmul.f32 %v3985_v28, %v1311_v27  ;;  %vm1318_vm1 = vweird.f32 %v3985_v28 }
0x1094   :  { %vm1319_vm3 = vmor %vm1317_vm2, %vm1318_vm1 }
0x1095   :  { %v1314_v31 = vsub.f32 1.0, %v1313_v29 }
0x1097   :  { %v1315_v32 = vmul.f32 %v3985_v28, %v1314_v31  ;;  %v295_v31 = vadd.f32 %v4367_v22, %v4347_v14 }
0x1099   :  { %v1316_v33 = vadd.f32 %v3985_v28, %v1315_v32 }
0x109b   :  { %v1320_v37 = vsel %vm1319_vm3, %v3985_v28, %v1316_v33 }
0x109c   :  { %v1325_v40 = vsel %vm1322_vm4, %v1324_v39, %v1320_v37 }
0x109d   :  { %v1338_v47 = vsub.f32 1.0, %v1325_v40  ;;  %v1344_v2 = vmul.f32 %v1325_v40, %v4639_v11 }
0x10f1   :  { %v1329_v43 = vpop.permute.xlu1 %1328 }
0x10f2   :  { %v1331_v42 = vmul.f32 %v1329_v43, %v1325_v40 }
0x10f4   :  { %1333 = vrot.lane.b32.xlu2 %v1331_v42, %s4189_s21 }
0x114e   :  { %v1334_v0 = vpop.permute.xlu2 %1333 }
0x114f   :  { %v1336_v1 = vadd.f32 %v1334_v0, %v270_v21 }
0x1151   :  { %3986 = vtanh.f32 %v1336_v1 }
0x1157   :  { %v3987_v62 = vpop.eup %3986 }
0x1158   :  { %1340 = vrot.lane.b32.xlu0 %v3987_v62, %s4190_s22 }
0x11ca   :  { %v1341_v63 = vpop.permute.xlu0 %1340 }
0x11cb   :  { %v1343_v3 = vmul.f32 %v1341_v63, %v1338_v47 }
0x11cd   :  { %v4657_v4 = vadd.f32 %v1344_v2, %v1343_v3 }
0x11cf   :  { %1354 = vrot.lane.b32.xlu1 %v4657_v4, %s4190_s22 }
0x1241   :  { %v1355_v5 = vpop.permute.xlu1 %1354 }
0x1242   :  { %1357 = vst.msk [vmem:[%s5242_s12 + $0x6] sm:$0x2] %vm845_vm5, %v1355_v5  ;;  %3853 = vmatmul.msk.f32.vlgmr.msrb.gmra.mxu0 %vm73_vm0, %v1355_v5 }
0x1243   :  { %1958 = vmatpush.msrb.mxu0 %v4327_v8 }
0x1245   :  { %1959 = vmatpush.msrb.mxu0 %v4333_v9 }
0x1249   :  { %v2818_v56 = vld [vmem:[%s5242_s12] sm:$0xff] }
0x124a   :  { %v3893_v6 = vmul.f32 -1.442695, %v2818_v56 }
0x124c   :  { %3988 = vpow2.f32 %v3893_v6 }
0x1252   :  { %v3989_v7 = vpop.eup %3988 }
0x1253   :  { %v2834_v10 = vadd.f32 1.0, %v3989_v7 }
0x1255   :  { %3990 = vrcp.f32 %v2834_v10  ;;  %v2849_v21 = vand.u32 2147483648, %v2834_v10  ;;  %v2847_v25 = vand.u32 2147483647, %v2834_v10  ;;  %vm2843_vm7 = vweird.f32 %v2834_v10 }
0x1257   :  { %v2850_v8 = vor.u32 1.1754944e-38, %v2849_v21  ;;  %vm2848_vm9 = vcmp.eq.f32.partialorder %v2847_v25, 8.507059e+37 }
0x125b   :  { %v3991_v12 = vpop.eup %3990 }
0x125c   :  { %v2839_v13 = vmul.f32 %v3991_v12, %v2834_v10  ;;  %vm2844_vm6 = vweird.f32 %v3991_v12 }
0x125d   :  { %vm2845_vm8 = vmor %vm2843_vm7, %vm2844_vm6 }
0x125e   :  { %v2840_v20 = vsub.f32 1.0, %v2839_v13  ;;  %v4694_v13 = vld [vmem:[%s5233_s3 + $0x8] sm:$0xff] }
0x1260   :  { %v2841_v23 = vmul.f32 %v3991_v12, %v2840_v20  ;;  %v4700_v20 = vld [vmem:[%s5233_s3] sm:$0xff] }
0x1262   :  { %v2842_v26 = vadd.f32 %v3991_v12, %v2841_v23  ;;  %v4706_v23 = vld [vmem:[%s5235_s5] ss:$0 sm:$0xff] }
0x1264   :  { %v2846_v9 = vsel %vm2845_vm8, %v3991_v12, %v2842_v26  ;;  %v4713_v26 = vld [vmem:[%s5234_s4] ss:$0 sm:$0xff] }
0x1265   :  { %v2851_v27 = vsel %vm2848_vm9, %v2850_v8, %v2846_v9  ;;  %v320_v8 = vadd.f32 %v4713_v26, %v4427_v57 }
0x1266   :  { %2898 = vst.msk [vmem:[%s5242_s12] sm:$0xff] %vm73_vm0, %v2851_v27 }
0x12bf   :  { %v1377_v28 = vpop.f32.mrf.mxu0 }
0x12c0   :  { %v1378_v29 = vadd.f32 %v4360_v19, %v1377_v28 }
0x12c2   :  { %1401 = vrot.lane.b32.xlu2 %v1378_v29, %s4188_s19  ;;  %v1380_v32 = vadd.f32 %v1378_v29, %v295_v31 }
0x12c4   :  { %v3854_v33 = vmul.f32 -1.442695, %v1380_v32 }
0x12c6   :  { %3992 = vpow2.f32 %v3854_v33 }
0x12cc   :  { %v3993_v34 = vpop.eup %3992 }
0x12cd   :  { %v1384_v35 = vadd.f32 1.0, %v3993_v34 }
0x12cf   :  { %3994 = vrcp.f32 %v1384_v35  ;;  %v1396_v0 = vand.u32 2147483648, %v1384_v35  ;;  %vm1390_vm11 = vweird.f32 %v1384_v35  ;;  %v1394_v19 = vand.u32 2147483647, %v1384_v35 }
0x12d1   :  { %v1397_v62 = vor.u32 1.1754944e-38, %v1396_v0  ;;  %vm1395_vm13 = vcmp.eq.f32.partialorder %v1394_v19, 8.507059e+37 }
0x12d5   :  { %v3995_v37 = vpop.eup %3994 }
0x12d6   :  { %v1386_v39 = vmul.f32 %v3995_v37, %v1384_v35  ;;  %vm1391_vm10 = vweird.f32 %v3995_v37 }
0x12d7   :  { %vm1392_vm12 = vmor %vm1390_vm11, %vm1391_vm10 }
0x12d8   :  { %v1387_v43 = vsub.f32 1.0, %v1386_v39 }
0x12da   :  { %v1388_v40 = vmul.f32 %v3995_v37, %v1387_v43 }
0x12dc   :  { %v1389_v42 = vadd.f32 %v3995_v37, %v1388_v40 }
0x12de   :  { %v1393_v1 = vsel %vm1392_vm12, %v3995_v37, %v1389_v42 }
0x12df   :  { %v1398_v22 = vsel %vm1395_vm13, %v1397_v62, %v1393_v1 }
0x12e0   :  { %v1411_v5 = vsub.f32 1.0, %v1398_v22  ;;  %v1417_v6 = vmul.f32 %v1398_v22, %v4657_v4 }
0x131c   :  { %v1402_v14 = vpop.permute.xlu2 %1401 }
0x131d   :  { %v1404_v47 = vmul.f32 %v1402_v14, %v1398_v22 }
0x131f   :  { %1406 = vrot.lane.b32.xlu0 %v1404_v47, %s4189_s21 }
0x1391   :  { %v1407_v63 = vpop.permute.xlu0 %1406 }
0x1392   :  { %v1409_v2 = vadd.f32 %v1407_v63, %v295_v31 }
0x1394   :  { %3996 = vtanh.f32 %v1409_v2 }
0x139a   :  { %v3997_v3 = vpop.eup %3996 }
0x139b   :  { %1413 = vrot.lane.b32.xlu1 %v3997_v3, %s4190_s22 }
0x140d   :  { %v1414_v56 = vpop.permute.xlu1 %1413 }
0x140e   :  { %v1416_v7 = vmul.f32 %v1414_v56, %v1411_v5 }
0x1410   :  { %v4682_v10 = vadd.f32 %v1417_v6, %v1416_v7  ;;  %v345_v6 = vadd.f32 %v4713_v26, %v4498_v48 }
0x1412   :  { %1427 = vrot.lane.b32.xlu2 %v4682_v10, %s4190_s22 }
0x146c   :  { %v1428_v12 = vpop.permute.xlu2 %1427 }
0x146d   :  { %1430 = vst.msk [vmem:[%s5242_s12 + $0x7] sm:$0x2] %vm845_vm5, %v1428_v12  ;;  %3855 = vmatmul.msk.f32.vlgmr.msra.gmra.mxu1 %vm73_vm0, %v1428_v12 }
0x146e   :  { %2031 = vmatpush.msra.mxu1 %v4694_v13 }
0x1470   :  { %2032 = vmatpush.msra.mxu1 %v4700_v20 }
0x14ea   :  { %v1450_v21 = vpop.f32.mrf.mxu1 }
0x14eb   :  { %v1451_v25 = vadd.f32 %v4706_v23, %v1450_v21 }
0x14ed   :  { %1474 = vrot.lane.b32.xlu0 %v1451_v25, %s4188_s19  ;;  %v1453_v9 = vadd.f32 %v1451_v25, %v320_v8 }
0x14ef   :  { %v3856_v27 = vmul.f32 -1.442695, %v1453_v9 }
0x14f1   :  { %3998 = vpow2.f32 %v3856_v27 }
0x14f7   :  { %v3999_v28 = vpop.eup %3998 }
0x14f8   :  { %v1457_v29 = vadd.f32 1.0, %v3999_v28 }
0x14fa   :  { %4000 = vrcp.f32 %v1457_v29  ;;  %v1469_v37 = vand.u32 2147483648, %v1457_v29  ;;  %vm1463_vm15 = vweird.f32 %v1457_v29  ;;  %v1467_v39 = vand.u32 2147483647, %v1457_v29 }
0x14fc   :  { %v1470_v40 = vor.u32 1.1754944e-38, %v1469_v37  ;;  %vm1468_vm2 = vcmp.eq.f32.partialorder %v1467_v39, 8.507059e+37 }
0x1500   :  { %v4001_v31 = vpop.eup %4000 }
0x1501   :  { %v1459_v32 = vmul.f32 %v4001_v31, %v1457_v29  ;;  %vm1464_vm14 = vweird.f32 %v4001_v31 }
0x1502   :  { %vm1465_vm1 = vmor %vm1463_vm15, %vm1464_vm14 }
0x1503   :  { %v1460_v33 = vsub.f32 1.0, %v1459_v32 }
0x1505   :  { %v1461_v34 = vmul.f32 %v4001_v31, %v1460_v33 }
0x1507   :  { %v1462_v35 = vadd.f32 %v4001_v31, %v1461_v34 }
0x1509   :  { %v1466_v43 = vsel %vm1465_vm1, %v4001_v31, %v1462_v35 }
0x150a   :  { %v1471_v42 = vsel %vm1468_vm2, %v1470_v40, %v1466_v43 }
0x150b   :  { %v1484_v14 = vsub.f32 1.0, %v1471_v42  ;;  %v1490_v47 = vmul.f32 %v1471_v42, %v4682_v10 }
0x155f   :  { %v1475_v57 = vpop.permute.xlu0 %1474 }
0x1560   :  { %v1477_v0 = vmul.f32 %v1475_v57, %v1471_v42 }
0x1562   :  { %1479 = vrot.lane.b32.xlu1 %v1477_v0, %s4189_s21 }
0x15d4   :  { %v1480_v19 = vpop.permute.xlu1 %1479 }
0x15d5   :  { %v1482_v1 = vadd.f32 %v1480_v19, %v320_v8 }
0x15d7   :  { %4002 = vtanh.f32 %v1482_v1 }
0x15dd   :  { %v4003_v62 = vpop.eup %4002 }
0x15de   :  { %1486 = vrot.lane.b32.xlu2 %v4003_v62, %s4190_s22 }
0x1638   :  { %v1487_v22 = vpop.permute.xlu2 %1486 }
0x1639   :  { %v1489_v63 = vmul.f32 %v1487_v22, %v1484_v14 }
0x163b   :  { %v4720_v2 = vadd.f32 %v1490_v47, %v1489_v63  ;;  %v370_v47 = vadd.f32 %v4713_v26, %v4569_v44 }
0x163d   :  { %1500 = vrot.lane.b32.xlu0 %v4720_v2, %s4190_s22 }
0x16af   :  { %v1501_v3 = vpop.permute.xlu0 %1500 }
0x16b0   :  { %1503 = vst.msk [vmem:[%s5242_s12 + $0x8] sm:$0x2] %vm845_vm5, %v1501_v3  ;;  %3857 = vmatmul.msk.f32.vlgmr.msra.gmra.mxu2 %vm73_vm0, %v1501_v3 }
0x16b1   :  { %2104 = vmatpush.msra.mxu2 %v4694_v13 }
0x16b3   :  { %2105 = vmatpush.msra.mxu2 %v4700_v20 }
0x1733   :  { %v1523_v5 = vpop.f32.mrf.mxu2 }
0x1734   :  { %v1524_v56 = vadd.f32 %v4706_v23, %v1523_v5 }
0x1736   :  { %1547 = vrot.lane.b32.xlu1 %v1524_v56, %s4188_s19  ;;  %v1526_v7 = vadd.f32 %v1524_v56, %v345_v6 }
0x1738   :  { %v3858_v12 = vmul.f32 -1.442695, %v1526_v7 }
0x173a   :  { %4004 = vpow2.f32 %v3858_v12 }
0x1740   :  { %v4005_v21 = vpop.eup %4004 }
0x1741   :  { %v1530_v25 = vadd.f32 1.0, %v4005_v21 }
0x1743   :  { %4006 = vrcp.f32 %v1530_v25  ;;  %v1542_v31 = vand.u32 2147483648, %v1530_v25  ;;  %vm1536_vm4 = vweird.f32 %v1530_v25  ;;  %v1540_v32 = vand.u32 2147483647, %v1530_v25 }
0x1745   :  { %v1543_v34 = vor.u32 1.1754944e-38, %v1542_v31  ;;  %vm1541_vm7 = vcmp.eq.f32.partialorder %v1540_v32, 8.507059e+37 }
0x1749   :  { %v4007_v8 = vpop.eup %4006 }
0x174a   :  { %v1532_v9 = vmul.f32 %v4007_v8, %v1530_v25  ;;  %vm1537_vm3 = vweird.f32 %v4007_v8 }
0x174b   :  { %vm1538_vm6 = vmor %vm1536_vm4, %vm1537_vm3 }
0x174c   :  { %v1533_v27 = vsub.f32 1.0, %v1532_v9 }
0x174e   :  { %v1534_v28 = vmul.f32 %v4007_v8, %v1533_v27 }
0x1750   :  { %v1535_v29 = vadd.f32 %v4007_v8, %v1534_v28 }
0x1752   :  { %v1539_v33 = vsel %vm1538_vm6, %v4007_v8, %v1535_v29 }
0x1753   :  { %v1544_v35 = vsel %vm1541_vm7, %v1543_v34, %v1539_v33 }
0x1754   :  { %v1557_v57 = vsub.f32 1.0, %v1544_v35  ;;  %v1563_v0 = vmul.f32 %v1544_v35, %v4720_v2 }
0x17a8   :  { %v1548_v48 = vpop.permute.xlu1 %1547 }
0x17a9   :  { %v1550_v37 = vmul.f32 %v1548_v48, %v1544_v35 }
0x17ab   :  { %1552 = vrot.lane.b32.xlu2 %v1550_v37, %s4189_s21 }
0x1805   :  { %v1553_v39 = vpop.permute.xlu2 %1552 }
0x1806   :  { %v1555_v43 = vadd.f32 %v1553_v39, %v345_v6 }
0x1808   :  { %4008 = vtanh.f32 %v1555_v43 }
0x180e   :  { %v4009_v40 = vpop.eup %4008 }
0x180f   :  { %1559 = vrot.lane.b32.xlu0 %v4009_v40, %s4190_s22 }
0x1881   :  { %v1560_v42 = vpop.permute.xlu0 %1559 }
0x1882   :  { %v1562_v19 = vmul.f32 %v1560_v42, %v1557_v57 }
0x1884   :  { %v4738_v1 = vadd.f32 %v1563_v0, %v1562_v19  ;;  %v395_v0 = vadd.f32 %v4713_v26, %v4349_v15 }
0x1886   :  { %1573 = vrot.lane.b32.xlu1 %v4738_v1, %s4190_s22 }
0x18f8   :  { %v1574_v62 = vpop.permute.xlu1 %1573 }
0x18f9   :  { %1576 = vst.msk [vmem:[%s5242_s12 + $0x9] sm:$0x2] %vm845_vm5, %v1574_v62  ;;  %3859 = vmatmul.msk.f32.vlgmr.msrb.gmra.mxu3 %vm73_vm0, %v1574_v62 }
0x18fa   :  { %2177 = vmatpush.msrb.mxu3 %v4694_v13 }
0x18fc   :  { %2178 = vmatpush.msrb.mxu3 %v4700_v20 }
0x197c   :  { %v1596_v14 = vpop.f32.mrf.mxu3 }
0x197d   :  { %v1597_v22 = vadd.f32 %v4706_v23, %v1596_v14 }
0x197f   :  { %1620 = vrot.lane.b32.xlu2 %v1597_v22, %s4188_s19  ;;  %v1599_v63 = vadd.f32 %v1597_v22, %v370_v47 }
0x1981   :  { %v3860_v3 = vmul.f32 -1.442695, %v1599_v63 }
0x1983   :  { %4010 = vpow2.f32 %v3860_v3 }
0x1989   :  { %v4011_v5 = vpop.eup %4010 }
0x198a   :  { %v1603_v56 = vadd.f32 1.0, %v4011_v5 }
0x198c   :  { %4012 = vrcp.f32 %v1603_v56  ;;  %v1615_v8 = vand.u32 2147483648, %v1603_v56  ;;  %vm1609_vm9 = vweird.f32 %v1603_v56  ;;  %v1613_v9 = vand.u32 2147483647, %v1603_v56 }
0x198e   :  { %v1616_v28 = vor.u32 1.1754944e-38, %v1615_v8  ;;  %vm1614_vm11 = vcmp.eq.f32.partialorder %v1613_v9, 8.507059e+37 }
0x1992   :  { %v4013_v6 = vpop.eup %4012 }
0x1993   :  { %v1605_v7 = vmul.f32 %v4013_v6, %v1603_v56  ;;  %vm1610_vm8 = vweird.f32 %v4013_v6 }
0x1994   :  { %vm1611_vm10 = vmor %vm1609_vm9, %vm1610_vm8 }
0x1995   :  { %v1606_v12 = vsub.f32 1.0, %v1605_v7 }
0x1997   :  { %v1607_v21 = vmul.f32 %v4013_v6, %v1606_v12 }
0x1999   :  { %v1608_v25 = vadd.f32 %v4013_v6, %v1607_v21 }
0x199b   :  { %v1612_v27 = vsel %vm1611_vm10, %v4013_v6, %v1608_v25 }
0x199c   :  { %v1617_v29 = vsel %vm1614_vm11, %v1616_v28, %v1612_v27 }
0x199d   :  { %v1630_v48 = vsub.f32 1.0, %v1617_v29  ;;  %v1636_v37 = vmul.f32 %v1617_v29, %v4738_v1 }
0x19d9   :  { %v1621_v44 = vpop.permute.xlu2 %1620 }
0x19da   :  { %v1623_v31 = vmul.f32 %v1621_v44, %v1617_v29 }
0x19dc   :  { %1625 = vrot.lane.b32.xlu0 %v1623_v31, %s4189_s21 }
0x1a4e   :  { %v1626_v32 = vpop.permute.xlu0 %1625 }
0x1a4f   :  { %v1628_v33 = vadd.f32 %v1626_v32, %v370_v47 }
0x1a51   :  { %4014 = vtanh.f32 %v1628_v33 }
0x1a57   :  { %v4015_v34 = vpop.eup %4014 }
0x1a58   :  { %1632 = vrot.lane.b32.xlu1 %v4015_v34, %s4190_s22 }
0x1aca   :  { %v1633_v35 = vpop.permute.xlu1 %1632 }
0x1acb   :  { %v1635_v39 = vmul.f32 %v1633_v35, %v1630_v48 }
0x1acd   :  { %v4756_v43 = vadd.f32 %v1636_v37, %v1635_v39  ;;  %v420_v37 = vadd.f32 %v4713_v26, %v4429_v58 }
0x1acf   :  { %1646 = vrot.lane.b32.xlu2 %v4756_v43, %s4190_s22 }
0x1b29   :  { %v1647_v40 = vpop.permute.xlu2 %1646 }
0x1b2a   :  { %1649 = vst.msk [vmem:[%s5242_s12 + $0xa] sm:$0x2] %vm845_vm5, %v1647_v40  ;;  %3861 = vmatmul.msk.f32.vlgmr.msra.gmra.mxu0 %vm73_vm0, %v1647_v40 }
0x1b2b   :  { %2250 = vmatpush.msra.mxu0 %v4694_v13 }
0x1b2d   :  { %2251 = vmatpush.msra.mxu0 %v4700_v20 }
0x1ba7   :  { %v1669_v57 = vpop.f32.mrf.mxu0 }
0x1ba8   :  { %v1670_v42 = vadd.f32 %v4706_v23, %v1669_v57 }
0x1baa   :  { %1693 = vrot.lane.b32.xlu0 %v1670_v42, %s4188_s19  ;;  %v1672_v19 = vadd.f32 %v1670_v42, %v395_v0 }
0x1bac   :  { %v3862_v62 = vmul.f32 -1.442695, %v1672_v19 }
0x1bae   :  { %4016 = vpow2.f32 %v3862_v62 }
0x1bb4   :  { %v4017_v14 = vpop.eup %4016 }
0x1bb5   :  { %v1676_v22 = vadd.f32 1.0, %v4017_v14 }
0x1bb7   :  { %4018 = vrcp.f32 %v1676_v22  ;;  %v1688_v6 = vand.u32 2147483648, %v1676_v22  ;;  %vm1682_vm13 = vweird.f32 %v1676_v22  ;;  %v1686_v7 = vand.u32 2147483647, %v1676_v22 }
0x1bb9   :  { %v1689_v21 = vor.u32 1.1754944e-38, %v1688_v6  ;;  %vm1687_vm15 = vcmp.eq.f32.partialorder %v1686_v7, 8.507059e+37 }
0x1bbd   :  { %v4019_v47 = vpop.eup %4018 }
0x1bbe   :  { %v1678_v63 = vmul.f32 %v4019_v47, %v1676_v22  ;;  %vm1683_vm12 = vweird.f32 %v4019_v47 }
0x1bbf   :  { %vm1684_vm14 = vmor %vm1682_vm13, %vm1683_vm12 }
0x1bc0   :  { %v1679_v3 = vsub.f32 1.0, %v1678_v63 }
0x1bc2   :  { %v1680_v5 = vmul.f32 %v4019_v47, %v1679_v3 }
0x1bc4   :  { %v1681_v56 = vadd.f32 %v4019_v47, %v1680_v5 }
0x1bc6   :  { %v1685_v12 = vsel %vm1684_vm14, %v4019_v47, %v1681_v56 }
0x1bc7   :  { %v1690_v25 = vsel %vm1687_vm15, %v1689_v21, %v1685_v12 }
0x1bc8   :  { %v1703_v44 = vsub.f32 1.0, %v1690_v25  ;;  %v1709_v31 = vmul.f32 %v1690_v25, %v4756_v43 }
0x1c1c   :  { %v1694_v15 = vpop.permute.xlu0 %1693 }
0x1c1d   :  { %v1696_v8 = vmul.f32 %v1694_v15, %v1690_v25 }
0x1c1f   :  { %1698 = vrot.lane.b32.xlu1 %v1696_v8, %s4189_s21 }
0x1c91   :  { %v1699_v9 = vpop.permute.xlu1 %1698 }
0x1c92   :  { %v1701_v27 = vadd.f32 %v1699_v9, %v395_v0 }
0x1c94   :  { %4020 = vtanh.f32 %v1701_v27 }
0x1c9a   :  { %v4021_v28 = vpop.eup %4020 }
0x1c9b   :  { %1705 = vrot.lane.b32.xlu2 %v4021_v28, %s4190_s22 }
0x1cf5   :  { %v1706_v29 = vpop.permute.xlu2 %1705 }
0x1cf6   :  { %v1708_v32 = vmul.f32 %v1706_v29, %v1703_v44 }
0x1cf8   :  { %v4774_v33 = vadd.f32 %v1709_v31, %v1708_v32  ;;  %v445_v31 = vadd.f32 %v4713_v26, %v4500_v49 }
0x1cfa   :  { %1719 = vrot.lane.b32.xlu0 %v4774_v33, %s4190_s22 }
0x1d6c   :  { %v1720_v34 = vpop.permute.xlu0 %1719 }
0x1d6d   :  { %1722 = vst.msk [vmem:[%s5242_s12 + $0xb] sm:$0x2] %vm845_vm5, %v1720_v34  ;;  %3863 = vmatmul.msk.f32.vlgmr.msrb.gmra.mxu1 %vm73_vm0, %v1720_v34 }
0x1d6e   :  { %2323 = vmatpush.msrb.mxu1 %v4694_v13 }
0x1d70   :  { %2324 = vmatpush.msrb.mxu1 %v4700_v20 }
0x1dea   :  { %v1742_v48 = vpop.f32.mrf.mxu1 }
0x1deb   :  { %v1743_v35 = vadd.f32 %v4706_v23, %v1742_v48 }
0x1ded   :  { %1766 = vrot.lane.b32.xlu1 %v1743_v35, %s4188_s19  ;;  %v1745_v39 = vadd.f32 %v1743_v35, %v420_v37 }
0x1def   :  { %v3864_v40 = vmul.f32 -1.442695, %v1745_v39 }
0x1df1   :  { %4022 = vpow2.f32 %v3864_v40 }
0x1df7   :  { %v4023_v57 = vpop.eup %4022 }
0x1df8   :  { %v1749_v42 = vadd.f32 1.0, %v4023_v57 }
0x1dfa   :  { %4024 = vrcp.f32 %v1749_v42  ;;  %v1761_v47 = vand.u32 2147483648, %v1749_v42  ;;  %vm1755_vm2 = vweird.f32 %v1749_v42  ;;  %v1759_v63 = vand.u32 2147483647, %v1749_v42 }
0x1dfc   :  { %v1762_v5 = vor.u32 1.1754944e-38, %v1761_v47  ;;  %vm1760_vm4 = vcmp.eq.f32.partialorder %v1759_v63, 8.507059e+37 }
0x1e00   :  { %v4025_v0 = vpop.eup %4024 }
0x1e01   :  { %v1751_v19 = vmul.f32 %v4025_v0, %v1749_v42  ;;  %vm1756_vm1 = vweird.f32 %v4025_v0 }
0x1e02   :  { %vm1757_vm3 = vmor %vm1755_vm2, %vm1756_vm1 }
0x1e03   :  { %v1752_v62 = vsub.f32 1.0, %v1751_v19 }
0x1e05   :  { %v1753_v14 = vmul.f32 %v4025_v0, %v1752_v62 }
0x1e07   :  { %v1754_v22 = vadd.f32 %v4025_v0, %v1753_v14 }
0x1e09   :  { %v1758_v3 = vsel %vm1757_vm3, %v4025_v0, %v1754_v22 }
0x1e0a   :  { %v1763_v56 = vsel %vm1760_vm4, %v1762_v5, %v1758_v3 }
0x1e0b   :  { %v1776_v15 = vsub.f32 1.0, %v1763_v56  ;;  %v1782_v8 = vmul.f32 %v1763_v56, %v4774_v33 }
0x1e5f   :  { %v1767_v58 = vpop.permute.xlu1 %1766 }
0x1e60   :  { %v1769_v6 = vmul.f32 %v1767_v58, %v1763_v56 }
0x1e62   :  { %1771 = vrot.lane.b32.xlu2 %v1769_v6, %s4189_s21 }
0x1ebc   :  { %v1772_v7 = vpop.permute.xlu2 %1771 }
0x1ebd   :  { %v1774_v12 = vadd.f32 %v1772_v7, %v420_v37 }
0x1ebf   :  { %4026 = vtanh.f32 %v1774_v12 }
0x1ec5   :  { %v4027_v21 = vpop.eup %4026 }
0x1ec6   :  { %1778 = vrot.lane.b32.xlu0 %v4027_v21, %s4190_s22 }
0x1f38   :  { %v1779_v25 = vpop.permute.xlu0 %1778 }
0x1f39   :  { %v1781_v9 = vmul.f32 %v1779_v25, %v1776_v15 }
0x1f3b   :  { %v4792_v27 = vadd.f32 %v1782_v8, %v1781_v9  ;;  %v470_v8 = vadd.f32 %v4713_v26, %v4571_v45 }
0x1f3d   :  { %1792 = vrot.lane.b32.xlu1 %v4792_v27, %s4190_s22 }
0x1faf   :  { %v1793_v28 = vpop.permute.xlu1 %1792 }
0x1fb0   :  { %1795 = vst.msk [vmem:[%s5242_s12 + $0xc] sm:$0x2] %vm845_vm5, %v1793_v28  ;;  %3865 = vmatmul.msk.f32.vlgmr.msrb.gmra.mxu2 %vm73_vm0, %v1793_v28 }
0x1fb1   :  { %2396 = vmatpush.msrb.mxu2 %v4694_v13 }
0x1fb3   :  { %2397 = vmatpush.msrb.mxu2 %v4700_v20 }
0x2033   :  { %v1815_v44 = vpop.f32.mrf.mxu2 }
0x2034   :  { %v1816_v29 = vadd.f32 %v4706_v23, %v1815_v44 }
0x2036   :  { %1839 = vrot.lane.b32.xlu2 %v1816_v29, %s4188_s19  ;;  %v1818_v32 = vadd.f32 %v1816_v29, %v445_v31 }
0x2038   :  { %v3866_v34 = vmul.f32 -1.442695, %v1818_v32 }
0x203a   :  { %4028 = vpow2.f32 %v3866_v34 }
0x2040   :  { %v4029_v48 = vpop.eup %4028 }
0x2041   :  { %v1822_v35 = vadd.f32 1.0, %v4029_v48 }
0x2043   :  { %4030 = vrcp.f32 %v1822_v35  ;;  %v1834_v0 = vand.u32 2147483648, %v1822_v35  ;;  %vm1828_vm7 = vweird.f32 %v1822_v35  ;;  %v1832_v19 = vand.u32 2147483647, %v1822_v35 }
0x2045   :  { %v1835_v14 = vor.u32 1.1754944e-38, %v1834_v0  ;;  %vm1833_vm9 = vcmp.eq.f32.partialorder %v1832_v19, 8.507059e+37 }
0x2049   :  { %v4031_v37 = vpop.eup %4030 }
0x204a   :  { %v1824_v39 = vmul.f32 %v4031_v37, %v1822_v35  ;;  %vm1829_vm6 = vweird.f32 %v4031_v37 }
0x204b   :  { %vm1830_vm8 = vmor %vm1828_vm7, %vm1829_vm6 }
0x204c   :  { %v1825_v40 = vsub.f32 1.0, %v1824_v39 }
0x204e   :  { %v1826_v57 = vmul.f32 %v4031_v37, %v1825_v40 }
0x2050   :  { %v1827_v42 = vadd.f32 %v4031_v37, %v1826_v57 }
0x2052   :  { %v1831_v62 = vsel %vm1830_vm8, %v4031_v37, %v1827_v42 }
0x2053   :  { %v1836_v22 = vsel %vm1833_vm9, %v1835_v14, %v1831_v62 }
0x2054   :  { %v1849_v58 = vsub.f32 1.0, %v1836_v22  ;;  %v1855_v6 = vmul.f32 %v1836_v22, %v4792_v27 }
0x2090   :  { %v1840_v49 = vpop.permute.xlu2 %1839 }
0x2091   :  { %v1842_v47 = vmul.f32 %v1840_v49, %v1836_v22 }
0x2093   :  { %1844 = vrot.lane.b32.xlu0 %v1842_v47, %s4189_s21 }
0x2105   :  { %v1845_v63 = vpop.permute.xlu0 %1844 }
0x2106   :  { %v1847_v3 = vadd.f32 %v1845_v63, %v445_v31 }
0x2108   :  { %4032 = vtanh.f32 %v1847_v3 }
0x210e   :  { %v4033_v5 = vpop.eup %4032 }
0x210f   :  { %1851 = vrot.lane.b32.xlu1 %v4033_v5, %s4190_s22 }
0x2181   :  { %v1852_v56 = vpop.permute.xlu1 %1851 }
0x2182   :  { %v1854_v7 = vmul.f32 %v1852_v56, %v1849_v58 }
0x2184   :  { %v4810_v12 = vadd.f32 %v1855_v6, %v1854_v7 }
0x2186   :  { %1865 = vrot.lane.b32.xlu2 %v4810_v12, %s4190_s22 }
0x21e0   :  { %v1866_v21 = vpop.permute.xlu2 %1865 }
0x21e1   :  { %1868 = vst.msk [vmem:[%s5242_s12 + $0xd] sm:$0x2] %vm845_vm5, %v1866_v21  ;;  %3867 = vmatmul.msk.f32.vlgmr.msra.gmra.mxu3 %vm73_vm0, %v1866_v21 }
0x21e2   :  { %2469 = vmatpush.msra.mxu3 %v4694_v13 }
0x21e4   :  { %2470 = vmatpush.msra.mxu3 %v4700_v20 }
0x2264   :  { %v1888_v15 = vpop.f32.mrf.mxu3 }
0x2265   :  { %v1889_v25 = vadd.f32 %v4706_v23, %v1888_v15 }
0x2267   :  { %1912 = vrot.lane.b32.xlu0 %v1889_v25, %s4188_s19  ;;  %v1891_v9 = vadd.f32 %v1889_v25, %v470_v8 }
0x2269   :  { %v3868_v28 = vmul.f32 -1.442695, %v1891_v9 }
0x226b   :  { %4034 = vpow2.f32 %v3868_v28 }
0x2271   :  { %v4035_v44 = vpop.eup %4034 }
0x2272   :  { %v1895_v29 = vadd.f32 1.0, %v4035_v44 }
0x2274   :  { %4036 = vrcp.f32 %v1895_v29  ;;  %v1907_v37 = vand.u32 2147483648, %v1895_v29  ;;  %vm1901_vm11 = vweird.f32 %v1895_v29  ;;  %v1905_v39 = vand.u32 2147483647, %v1895_v29 }
0x2276   :  { %v1908_v57 = vor.u32 1.1754944e-38, %v1907_v37  ;;  %vm1906_vm13 = vcmp.eq.f32.partialorder %v1905_v39, 8.507059e+37 }
0x227a   :  { %v4037_v31 = vpop.eup %4036 }
0x227b   :  { %v1897_v32 = vmul.f32 %v4037_v31, %v1895_v29  ;;  %vm1902_vm10 = vweird.f32 %v4037_v31 }
0x227c   :  { %vm1903_vm12 = vmor %vm1901_vm11, %vm1902_vm10 }
0x227d   :  { %v1898_v34 = vsub.f32 1.0, %v1897_v32 }
0x227f   :  { %v1899_v48 = vmul.f32 %v4037_v31, %v1898_v34 }
0x2281   :  { %v1900_v35 = vadd.f32 %v4037_v31, %v1899_v48 }
0x2283   :  { %v1904_v40 = vsel %vm1903_vm12, %v4037_v31, %v1900_v35  ;;  %v495_v35 = vadd.f32 %v4713_v26, %v4351_v16 }
0x2284   :  { %v1909_v42 = vsel %vm1906_vm13, %v1908_v57, %v1904_v40 }
0x2285   :  { %v1922_v49 = vsub.f32 1.0, %v1909_v42  ;;  %v1928_v47 = vmul.f32 %v1909_v42, %v4810_v12 }
0x22d9   :  { %v1913_v45 = vpop.permute.xlu0 %1912 }
0x22da   :  { %v1915_v0 = vmul.f32 %v1913_v45, %v1909_v42 }
0x22dc   :  { %1917 = vrot.lane.b32.xlu1 %v1915_v0, %s4189_s21 }
0x234e   :  { %v1918_v19 = vpop.permute.xlu1 %1917 }
0x234f   :  { %v1920_v62 = vadd.f32 %v1918_v19, %v470_v8 }
0x2351   :  { %4038 = vtanh.f32 %v1920_v62 }
0x2357   :  { %v4039_v14 = vpop.eup %4038 }
0x2358   :  { %1924 = vrot.lane.b32.xlu2 %v4039_v14, %s4190_s22 }
0x23b2   :  { %v1925_v22 = vpop.permute.xlu2 %1924 }
0x23b3   :  { %v1927_v63 = vmul.f32 %v1925_v22, %v1922_v49 }
0x23b5   :  { %v4828_v3 = vadd.f32 %v1928_v47, %v1927_v63 }
0x23b7   :  { %1938 = vrot.lane.b32.xlu0 %v4828_v3, %s4190_s22 }
0x2429   :  { %v1939_v5 = vpop.permute.xlu0 %1938 }
0x242a   :  { %1941 = vst.msk [vmem:[%s5242_s12 + $0xe] sm:$0x2] %vm845_vm5, %v1939_v5  ;;  %3869 = vmatmul.msk.f32.vlgmr.msrb.gmra.mxu0 %vm73_vm0, %v1939_v5 }
0x242b   :  { %2542 = vmatpush.msrb.mxu0 %v4694_v13 }
0x242d   :  { %2543 = vmatpush.msrb.mxu0 %v4700_v20 }
0x2431   :  { %v2819_v58 = vld [vmem:[%s5242_s12 + $0x8] sm:$0xff] }
0x2432   :  { %v3894_v56 = vmul.f32 -1.442695, %v2819_v58 }
0x2434   :  { %4040 = vpow2.f32 %v3894_v56 }
0x243a   :  { %v4041_v6 = vpop.eup %4040 }
0x243b   :  { %v2835_v7 = vadd.f32 1.0, %v4041_v6 }
0x243d   :  { %4042 = vrcp.f32 %v2835_v7  ;;  %v2864_v8 = vand.u32 2147483648, %v2835_v7  ;;  %v2862_v28 = vand.u32 2147483647, %v2835_v7  ;;  %vm2858_vm15 = vweird.f32 %v2835_v7 }
0x243f   :  { %v2865_v29 = vor.u32 1.1754944e-38, %v2864_v8  ;;  %vm2863_vm2 = vcmp.eq.f32.partialorder %v2862_v28, 8.507059e+37 }
0x2443   :  { %v4043_v21 = vpop.eup %4042 }
0x2444   :  { %v2854_v15 = vmul.f32 %v4043_v21, %v2835_v7  ;;  %vm2859_vm14 = vweird.f32 %v4043_v21 }
0x2445   :  { %vm2860_vm1 = vmor %vm2858_vm15, %vm2859_vm14 }
0x2446   :  { %v2855_v25 = vsub.f32 1.0, %v2854_v15 }
0x2448   :  { %v2856_v9 = vmul.f32 %v4043_v21, %v2855_v25 }
0x244a   :  { %v2857_v44 = vadd.f32 %v4043_v21, %v2856_v9 }
0x244c   :  { %v2861_v31 = vsel %vm2860_vm1, %v4043_v21, %v2857_v44 }
0x244d   :  { %v2866_v32 = vsel %vm2863_vm2, %v2865_v29, %v2861_v31  ;;  %v520_v29 = vadd.f32 %v4713_v26, %v4431_v59 }
0x244e   :  { %2899 = vst.msk [vmem:[%s5242_s12 + $0x8] sm:$0xff] %vm73_vm0, %v2866_v32 }
0x24a7   :  { %v1961_v34 = vpop.f32.mrf.mxu0 }
0x24a8   :  { %v1962_v48 = vadd.f32 %v4706_v23, %v1961_v34 }
0x24aa   :  { %1985 = vrot.lane.b32.xlu1 %v1962_v48, %s4188_s19  ;;  %v1964_v37 = vadd.f32 %v1962_v48, %v495_v35 }
0x24ac   :  { %v3870_v39 = vmul.f32 -1.442695, %v1964_v37 }
0x24ae   :  { %4044 = vpow2.f32 %v3870_v39 }
0x24b4   :  { %v4045_v40 = vpop.eup %4044 }
0x24b5   :  { %v1968_v57 = vadd.f32 1.0, %v4045_v40 }
0x24b7   :  { %4046 = vrcp.f32 %v1968_v57  ;;  %v1980_v14 = vand.u32 2147483648, %v1968_v57  ;;  %vm1974_vm4 = vweird.f32 %v1968_v57  ;;  %v1978_v49 = vand.u32 2147483647, %v1968_v57 }
0x24b9   :  { %v1981_v47 = vor.u32 1.1754944e-38, %v1980_v14  ;;  %vm1979_vm7 = vcmp.eq.f32.partialorder %v1978_v49, 8.507059e+37 }
0x24bd   :  { %v4047_v45 = vpop.eup %4046 }
0x24be   :  { %v1970_v42 = vmul.f32 %v4047_v45, %v1968_v57  ;;  %vm1975_vm3 = vweird.f32 %v4047_v45 }
0x24bf   :  { %vm1976_vm6 = vmor %vm1974_vm4, %vm1975_vm3 }
0x24c0   :  { %v1971_v0 = vsub.f32 1.0, %v1970_v42 }
0x24c2   :  { %v1972_v19 = vmul.f32 %v4047_v45, %v1971_v0 }
0x24c4   :  { %v1973_v62 = vadd.f32 %v4047_v45, %v1972_v19 }
0x24c6   :  { %v1977_v22 = vsel %vm1976_vm6, %v4047_v45, %v1973_v62 }
0x24c7   :  { %v1982_v63 = vsel %vm1979_vm7, %v1981_v47, %v1977_v22 }
0x24c8   :  { %v1995_v7 = vsub.f32 1.0, %v1982_v63  ;;  %v2001_v15 = vmul.f32 %v1982_v63, %v4828_v3 }
0x251c   :  { %v1986_v16 = vpop.permute.xlu1 %1985 }
0x251d   :  { %v1988_v5 = vmul.f32 %v1986_v16, %v1982_v63 }
0x251f   :  { %1990 = vrot.lane.b32.xlu2 %v1988_v5, %s4189_s21 }
0x2579   :  { %v1991_v58 = vpop.permute.xlu2 %1990 }
0x257a   :  { %v1993_v56 = vadd.f32 %v1991_v58, %v495_v35 }
0x257c   :  { %4048 = vtanh.f32 %v1993_v56 }
0x2582   :  { %v4049_v6 = vpop.eup %4048 }
0x2583   :  { %1997 = vrot.lane.b32.xlu0 %v4049_v6, %s4190_s22 }
0x25f5   :  { %v1998_v21 = vpop.permute.xlu0 %1997 }
0x25f6   :  { %v2000_v25 = vmul.f32 %v1998_v21, %v1995_v7 }
0x25f8   :  { %v4853_v8 = vadd.f32 %v2001_v15, %v2000_v25  ;;  %v545_v15 = vadd.f32 %v4713_v26, %v4502_v50 }
0x25fa   :  { %2011 = vrot.lane.b32.xlu1 %v4853_v8, %s4190_s22 }
0x266c   :  { %v2012_v9 = vpop.permute.xlu1 %2011 }
0x266d   :  { %2014 = vst.msk [vmem:[%s5242_s12 + $0xf] sm:$0x2] %vm845_vm5, %v2012_v9  ;;  %3871 = vmatmul.msk.f32.vlgmr.msra.gmra.mxu1 %vm73_vm0, %v2012_v9 }
0x266e   :  { %2615 = vmatpush.msra.mxu1 %v4694_v13 }
0x2670   :  { %2616 = vmatpush.msra.mxu1 %v4700_v20 }
0x26ea   :  { %v2034_v28 = vpop.f32.mrf.mxu1 }
0x26eb   :  { %v2035_v44 = vadd.f32 %v4706_v23, %v2034_v28 }
0x26ed   :  { %2058 = vrot.lane.b32.xlu2 %v2035_v44, %s4188_s19  ;;  %v2037_v31 = vadd.f32 %v2035_v44, %v520_v29 }
0x26ef   :  { %v3872_v32 = vmul.f32 -1.442695, %v2037_v31 }
0x26f1   :  { %4050 = vpow2.f32 %v3872_v32 }
0x26f7   :  { %v4051_v34 = vpop.eup %4050 }
0x26f8   :  { %v2041_v48 = vadd.f32 1.0, %v4051_v34 }
0x26fa   :  { %4052 = vrcp.f32 %v2041_v48  ;;  %v2053_v45 = vand.u32 2147483648, %v2041_v48  ;;  %vm2047_vm9 = vweird.f32 %v2041_v48  ;;  %v2051_v42 = vand.u32 2147483647, %v2041_v48 }
0x26fc   :  { %v2054_v19 = vor.u32 1.1754944e-38, %v2053_v45  ;;  %vm2052_vm11 = vcmp.eq.f32.partialorder %v2051_v42, 8.507059e+37 }
0x2700   :  { %v4053_v35 = vpop.eup %4052 }
0x2701   :  { %v2043_v37 = vmul.f32 %v4053_v35, %v2041_v48  ;;  %vm2048_vm8 = vweird.f32 %v4053_v35 }
0x2702   :  { %vm2049_vm10 = vmor %vm2047_vm9, %vm2048_vm8 }
0x2703   :  { %v2044_v39 = vsub.f32 1.0, %v2043_v37 }
0x2705   :  { %v2045_v40 = vmul.f32 %v4053_v35, %v2044_v39 }
0x2707   :  { %v2046_v57 = vadd.f32 %v4053_v35, %v2045_v40 }
0x2709   :  { %v2050_v0 = vsel %vm2049_vm10, %v4053_v35, %v2046_v57 }
0x270a   :  { %v2055_v62 = vsel %vm2052_vm11, %v2054_v19, %v2050_v0 }
0x270b   :  { %v2068_v16 = vsub.f32 1.0, %v2055_v62  ;;  %v2074_v5 = vmul.f32 %v2055_v62, %v4853_v8 }
0x2747   :  { %v2059_v59 = vpop.permute.xlu2 %2058 }
0x2748   :  { %v2061_v14 = vmul.f32 %v2059_v59, %v2055_v62 }
0x274a   :  { %2063 = vrot.lane.b32.xlu0 %v2061_v14, %s4189_s21 }
0x27bc   :  { %v2064_v49 = vpop.permute.xlu0 %2063 }
0x27bd   :  { %v2066_v22 = vadd.f32 %v2064_v49, %v520_v29 }
0x27bf   :  { %4054 = vtanh.f32 %v2066_v22 }
0x27c5   :  { %v4055_v47 = vpop.eup %4054 }
0x27c6   :  { %2070 = vrot.lane.b32.xlu1 %v4055_v47, %s4190_s22 }
0x2838   :  { %v2071_v63 = vpop.permute.xlu1 %2070 }
0x2839   :  { %v2073_v58 = vmul.f32 %v2071_v63, %v2068_v16 }
0x283b   :  { %v4871_v56 = vadd.f32 %v2074_v5, %v2073_v58  ;;  %v570_v5 = vadd.f32 %v4713_v26, %v4573_v46 }
0x283d   :  { %2084 = vrot.lane.b32.xlu2 %v4871_v56, %s4190_s22 }
0x2897   :  { %v2085_v6 = vpop.permute.xlu2 %2084 }
0x2898   :  { %2087 = vst.msk [vmem:[%s5242_s12 + $0x10] sm:$0x2] %vm845_vm5, %v2085_v6  ;;  %3873 = vmatmul.msk.f32.vlgmr.msra.gmra.mxu2 %vm73_vm0, %v2085_v6 }
0x2899   :  { %2688 = vmatpush.msra.mxu2 %v4694_v13 }
0x289b   :  { %2689 = vmatpush.msra.mxu2 %v4700_v20 }
0x291b   :  { %v2107_v7 = vpop.f32.mrf.mxu2 }
0x291c   :  { %v2108_v21 = vadd.f32 %v4706_v23, %v2107_v7 }
0x291e   :  { %2131 = vrot.lane.b32.xlu0 %v2108_v21, %s4188_s19  ;;  %v2110_v25 = vadd.f32 %v2108_v21, %v545_v15 }
0x2920   :  { %v3874_v9 = vmul.f32 -1.442695, %v2110_v25 }
0x2922   :  { %4056 = vpow2.f32 %v3874_v9 }
0x2928   :  { %v4057_v28 = vpop.eup %4056 }
0x2929   :  { %v2114_v44 = vadd.f32 1.0, %v4057_v28 }
0x292b   :  { %4058 = vrcp.f32 %v2114_v44  ;;  %v2126_v35 = vand.u32 2147483648, %v2114_v44  ;;  %vm2120_vm13 = vweird.f32 %v2114_v44  ;;  %v2124_v37 = vand.u32 2147483647, %v2114_v44 }
0x292d   :  { %v2127_v40 = vor.u32 1.1754944e-38, %v2126_v35  ;;  %vm2125_vm15 = vcmp.eq.f32.partialorder %v2124_v37, 8.507059e+37 }
0x2931   :  { %v4059_v29 = vpop.eup %4058 }
0x2932   :  { %v2116_v31 = vmul.f32 %v4059_v29, %v2114_v44  ;;  %vm2121_vm12 = vweird.f32 %v4059_v29 }
0x2933   :  { %vm2122_vm14 = vmor %vm2120_vm13, %vm2121_vm12 }
0x2934   :  { %v2117_v32 = vsub.f32 1.0, %v2116_v31 }
0x2936   :  { %v2118_v34 = vmul.f32 %v4059_v29, %v2117_v32 }
0x2938   :  { %v2119_v48 = vadd.f32 %v4059_v29, %v2118_v34 }
0x293a   :  { %v2123_v39 = vsel %vm2122_vm14, %v4059_v29, %v2119_v48 }
0x293b   :  { %v2128_v57 = vsel %vm2125_vm15, %v2127_v40, %v2123_v39 }
0x293c   :  { %v2141_v59 = vsub.f32 1.0, %v2128_v57  ;;  %v2147_v14 = vmul.f32 %v2128_v57, %v4871_v56 }
0x2990   :  { %v2132_v50 = vpop.permute.xlu0 %2131 }
0x2991   :  { %v2134_v45 = vmul.f32 %v2132_v50, %v2128_v57 }
0x2993   :  { %2136 = vrot.lane.b32.xlu1 %v2134_v45, %s4189_s21 }
0x2a05   :  { %v2137_v42 = vpop.permute.xlu1 %2136 }
0x2a06   :  { %v2139_v0 = vadd.f32 %v2137_v42, %v545_v15 }
0x2a08   :  { %4060 = vtanh.f32 %v2139_v0 }
0x2a0e   :  { %v4061_v19 = vpop.eup %4060 }
0x2a0f   :  { %2143 = vrot.lane.b32.xlu2 %v4061_v19, %s4190_s22 }
0x2a69   :  { %v2144_v62 = vpop.permute.xlu2 %2143 }
0x2a6a   :  { %v2146_v49 = vmul.f32 %v2144_v62, %v2141_v59  ;;  %v595_v59 = vadd.f32 %v4713_v26, %v4353_v17 }
0x2a6c   :  { %v4889_v22 = vadd.f32 %v2147_v14, %v2146_v49 }
0x2a6e   :  { %2157 = vrot.lane.b32.xlu0 %v4889_v22, %s4190_s22 }
0x2ae0   :  { %v2158_v47 = vpop.permute.xlu0 %2157 }
0x2ae1   :  { %2160 = vst.msk [vmem:[%s5242_s12 + $0x11] sm:$0x2] %vm845_vm5, %v2158_v47  ;;  %3875 = vmatmul.msk.f32.vlgmr.msrb.gmra.mxu3 %vm73_vm0, %v2158_v47 }
0x2ae2   :  { %2761 = vmatpush.msrb.mxu3 %v4694_v13 }
0x2ae4   :  { %2762 = vmatpush.msrb.mxu3 %v4700_v20 }
0x2b64   :  { %v2180_v16 = vpop.f32.mrf.mxu3 }
0x2b65   :  { %v2181_v63 = vadd.f32 %v4706_v23, %v2180_v16 }
0x2b67   :  { %2204 = vrot.lane.b32.xlu1 %v2181_v63, %s4188_s19  ;;  %v2183_v58 = vadd.f32 %v2181_v63, %v570_v5 }
0x2b69   :  { %v3876_v6 = vmul.f32 -1.442695, %v2183_v58 }
0x2b6b   :  { %4062 = vpow2.f32 %v3876_v6 }
0x2b71   :  { %v4063_v7 = vpop.eup %4062 }
0x2b72   :  { %v2187_v21 = vadd.f32 1.0, %v4063_v7 }
0x2b74   :  { %4064 = vrcp.f32 %v2187_v21  ;;  %v2199_v20 = vand.u32 2147483648, %v2187_v21  ;;  %vm2193_vm2 = vweird.f32 %v2187_v21  ;;  %v2197_v44 = vand.u32 2147483647, %v2187_v21 }
0x2b76   :  { %v2200_v31 = vor.u32 1.1754944e-38, %v2199_v20  ;;  %vm2198_vm4 = vcmp.eq.f32.partialorder %v2197_v44, 8.507059e+37 }
0x2b7a   :  { %v4065_v15 = vpop.eup %4064 }
0x2b7b   :  { %v2189_v25 = vmul.f32 %v4065_v15, %v2187_v21  ;;  %vm2194_vm1 = vweird.f32 %v4065_v15 }
0x2b7c   :  { %vm2195_vm3 = vmor %vm2193_vm2, %vm2194_vm1 }
0x2b7d   :  { %v2190_v9 = vsub.f32 1.0, %v2189_v25 }
0x2b7f   :  { %v2191_v13 = vmul.f32 %v4065_v15, %v2190_v9 }
0x2b81   :  { %v2192_v28 = vadd.f32 %v4065_v15, %v2191_v13 }
0x2b83   :  { %v2196_v29 = vsel %vm2195_vm3, %v4065_v15, %v2192_v28 }
0x2b84   :  { %v2201_v32 = vsel %vm2198_vm4, %v2200_v31, %v2196_v29 }
0x2b85   :  { %v2214_v39 = vsub.f32 1.0, %v2201_v32  ;;  %v2220_v50 = vmul.f32 %v2201_v32, %v4889_v22 }
0x2bd9   :  { %v2205_v46 = vpop.permute.xlu1 %2204 }
0x2bda   :  { %v2207_v34 = vmul.f32 %v2205_v46, %v2201_v32 }
0x2bdc   :  { %2209 = vrot.lane.b32.xlu2 %v2207_v34, %s4189_s21 }
0x2c36   :  { %v2210_v48 = vpop.permute.xlu2 %2209 }
0x2c37   :  { %v2212_v35 = vadd.f32 %v2210_v48, %v570_v5  ;;  %v4935_v48 = vld [vmem:[%s5235_s5] ss:$0 sm:$0xff]  ;;  %s3771_s5 = sshll.u32 %s5243_s13, 4  ;;  %s3772_s5 = int_to_ptr.hbm [resolvable:$true] %s3771_s5 }
0x2c39   :  { %4066 = vtanh.f32 %v2212_v35 }
0x2c3f   :  { %v4067_v37 = vpop.eup %4066 }
0x2c40   :  { %2216 = vrot.lane.b32.xlu0 %v4067_v37, %s4190_s22  ;;  %v4942_v37 = vld [vmem:[%s5234_s4] ss:$0 sm:$0xff] }
0x2cb2   :  { %v2217_v40 = vpop.permute.xlu0 %2216 }
0x2cb3   :  { %v2219_v57 = vmul.f32 %v2217_v40, %v2214_v39  ;;  %v620_v39 = vadd.f32 %v4942_v37, %v4433_v60 }
0x2cb5   :  { %v4907_v45 = vadd.f32 %v2220_v50, %v2219_v57 }
0x2cb7   :  { %2230 = vrot.lane.b32.xlu1 %v4907_v45, %s4190_s22 }
0x2d29   :  { %v2231_v42 = vpop.permute.xlu1 %2230 }
0x2d2a   :  { %2233 = vst.msk [vmem:[%s5242_s12 + $0x12] sm:$0x2] %vm845_vm5, %v2231_v42  ;;  %3877 = vmatmul.msk.f32.vlgmr.msra.gmra.mxu0 %vm73_vm0, %v2231_v42 }
0x2da7   :  { %v2253_v0 = vpop.f32.mrf.mxu0 }
0x2da8   :  { %v2254_v19 = vadd.f32 %v4706_v23, %v2253_v0 }
0x2daa   :  { %2277 = vrot.lane.b32.xlu2 %v2254_v19, %s4188_s19  ;;  %v2256_v62 = vadd.f32 %v2254_v19, %v595_v59 }
0x2dac   :  { %v3878_v14 = vmul.f32 -1.442695, %v2256_v62 }
0x2dae   :  { %4068 = vpow2.f32 %v3878_v14 }
0x2db4   :  { %v4069_v49 = vpop.eup %4068 }
0x2db5   :  { %v2260_v47 = vadd.f32 1.0, %v4069_v49 }
0x2db7   :  { %4070 = vrcp.f32 %v2260_v47  ;;  %v2272_v7 = vand.u32 2147483648, %v2260_v47  ;;  %vm2266_vm7 = vweird.f32 %v2260_v47  ;;  %v2270_v23 = vand.u32 2147483647, %v2260_v47 }
0x2db9   :  { %v2273_v15 = vor.u32 1.1754944e-38, %v2272_v7  ;;  %vm2271_vm9 = vcmp.eq.f32.partialorder %v2270_v23, 8.507059e+37 }
0x2dbd   :  { %v4071_v16 = vpop.eup %4070 }
0x2dbe   :  { %v2262_v63 = vmul.f32 %v4071_v16, %v2260_v47  ;;  %vm2267_vm6 = vweird.f32 %v4071_v16 }
0x2dbf   :  { %vm2268_vm8 = vmor %vm2266_vm7, %vm2267_vm6 }
0x2dc0   :  { %v2263_v5 = vsub.f32 1.0, %v2262_v63 }
0x2dc2   :  { %v2264_v58 = vmul.f32 %v4071_v16, %v2263_v5 }
0x2dc4   :  { %v2265_v6 = vadd.f32 %v4071_v16, %v2264_v58 }
0x2dc6   :  { %v2269_v21 = vsel %vm2268_vm8, %v4071_v16, %v2265_v6 }
0x2dc7   :  { %v2274_v26 = vsel %vm2271_vm9, %v2273_v15, %v2269_v21 }
0x2dc8   :  { %v2287_v20 = vsub.f32 1.0, %v2274_v26  ;;  %v2293_v29 = vmul.f32 %v2274_v26, %v4907_v45 }
0x2e04   :  { %v2278_v17 = vpop.permute.xlu2 %2277 }
0x2e05   :  { %v2280_v25 = vmul.f32 %v2278_v17, %v2274_v26 }
0x2e07   :  { %2282 = vrot.lane.b32.xlu0 %v2280_v25, %s4189_s21 }
0x2e79   :  { %v2283_v9 = vpop.permute.xlu0 %2282 }
0x2e7a   :  { %v2285_v13 = vadd.f32 %v2283_v9, %v595_v59 }
0x2e7c   :  { %4072 = vtanh.f32 %v2285_v13 }
0x2e82   :  { %v4073_v28 = vpop.eup %4072 }
0x2e83   :  { %2289 = vrot.lane.b32.xlu1 %v4073_v28, %s4190_s22 }
0x2ef5   :  { %v2290_v44 = vpop.permute.xlu1 %2289 }
0x2ef6   :  { %v2292_v31 = vmul.f32 %v2290_v44, %v2287_v20  ;;  %v645_v20 = vadd.f32 %v4942_v37, %v4504_v51 }
0x2ef8   :  { %v4923_v46 = vadd.f32 %v2293_v29, %v2292_v31 }
0x2efa   :  { %2303 = vrot.lane.b32.xlu2 %v4923_v46, %s4190_s22 }
0x2f54   :  { %v2304_v32 = vpop.permute.xlu2 %2303 }
0x2f55   :  { %2306 = vst.msk [vmem:[%s5242_s12 + $0x13] sm:$0x2] %vm845_vm5, %v2304_v32  ;;  %3879 = vmatmul.msk.f32.vlgmr.msrb.gmra.mxu1 %vm73_vm0, %v2304_v32 }
0x2fd2   :  { %v2326_v34 = vpop.f32.mrf.mxu1 }
0x2fd3   :  { %v2327_v35 = vadd.f32 %v4935_v48, %v2326_v34 }
0x2fd5   :  { %2350 = vrot.lane.b32.xlu0 %v2327_v35, %s4188_s19  ;;  %v2329_v40 = vadd.f32 %v2327_v35, %v620_v39 }
0x2fd7   :  { %v3880_v50 = vmul.f32 -1.442695, %v2329_v40 }
0x2fd9   :  { %4074 = vpow2.f32 %v3880_v50 }
0x2fdf   :  { %v4075_v57 = vpop.eup %4074 }
0x2fe0   :  { %v2333_v42 = vadd.f32 1.0, %v4075_v57 }
0x2fe2   :  { %4076 = vrcp.f32 %v2333_v42  ;;  %v2345_v49 = vand.u32 2147483648, %v2333_v42  ;;  %vm2339_vm11 = vweird.f32 %v2333_v42  ;;  %v2343_v47 = vand.u32 2147483647, %v2333_v42 }
0x2fe4   :  { %v2346_v63 = vor.u32 1.1754944e-38, %v2345_v49  ;;  %vm2344_vm13 = vcmp.eq.f32.partialorder %v2343_v47, 8.507059e+37 }
0x2fe8   :  { %v4077_v0 = vpop.eup %4076 }
0x2fe9   :  { %v2335_v19 = vmul.f32 %v4077_v0, %v2333_v42  ;;  %vm2340_vm10 = vweird.f32 %v4077_v0 }
0x2fea   :  { %vm2341_vm12 = vmor %vm2339_vm11, %vm2340_vm10 }
0x2feb   :  { %v2336_v59 = vsub.f32 1.0, %v2335_v19 }
0x2fed   :  { %v2337_v62 = vmul.f32 %v4077_v0, %v2336_v59 }
0x2fef   :  { %v2338_v14 = vadd.f32 %v4077_v0, %v2337_v62 }
0x2ff1   :  { %v2342_v16 = vsel %vm2341_vm12, %v4077_v0, %v2338_v14 }
0x2ff2   :  { %v2347_v5 = vsel %vm2344_vm13, %v2346_v63, %v2342_v16 }
0x2ff3   :  { %v2360_v21 = vsub.f32 1.0, %v2347_v5  ;;  %v2366_v17 = vmul.f32 %v2347_v5, %v4923_v46 }
0x3047   :  { %v2351_v60 = vpop.permute.xlu0 %2350 }
0x3048   :  { %v2353_v58 = vmul.f32 %v2351_v60, %v2347_v5 }
0x304a   :  { %2355 = vrot.lane.b32.xlu1 %v2353_v58, %s4189_s21 }
0x30bc   :  { %v2356_v6 = vpop.permute.xlu1 %2355 }
0x30bd   :  { %v2358_v7 = vadd.f32 %v2356_v6, %v620_v39 }
0x30bf   :  { %4078 = vtanh.f32 %v2358_v7 }
0x30c5   :  { %v4079_v23 = vpop.eup %4078 }
0x30c6   :  { %2362 = vrot.lane.b32.xlu2 %v4079_v23, %s4190_s22 }
0x3120   :  { %v2363_v15 = vpop.permute.xlu2 %2362 }
0x3121   :  { %v2365_v26 = vmul.f32 %v2363_v15, %v2360_v21  ;;  %v670_v21 = vadd.f32 %v4942_v37, %v4575_v54 }
0x3123   :  { %v4949_v25 = vadd.f32 %v2366_v17, %v2365_v26 }
0x3125   :  { %2376 = vrot.lane.b32.xlu0 %v4949_v25, %s4190_s22 }
0x3197   :  { %v2377_v9 = vpop.permute.xlu0 %2376 }
0x3198   :  { %2379 = vst.msk [vmem:[%s5242_s12 + $0x14] sm:$0x2] %vm845_vm5, %v2377_v9  ;;  %3881 = vmatmul.msk.f32.vlgmr.msrb.gmra.mxu2 %vm73_vm0, %v2377_v9 }
0x321b   :  { %v2399_v13 = vpop.f32.mrf.mxu2 }
0x321c   :  { %v2400_v28 = vadd.f32 %v4935_v48, %v2399_v13 }
0x321e   :  { %2423 = vrot.lane.b32.xlu1 %v2400_v28, %s4188_s19  ;;  %v2402_v44 = vadd.f32 %v2400_v28, %v645_v20 }
0x3220   :  { %v3882_v29 = vmul.f32 -1.442695, %v2402_v44 }
0x3222   :  { %4080 = vpow2.f32 %v3882_v29 }
0x3228   :  { %v4081_v31 = vpop.eup %4080 }
0x3229   :  { %v2406_v32 = vadd.f32 1.0, %v4081_v31 }
0x322b   :  { %4082 = vrcp.f32 %v2406_v32  ;;  %v2418_v57 = vand.u32 2147483648, %v2406_v32  ;;  %vm2412_vm15 = vweird.f32 %v2406_v32  ;;  %v2416_v42 = vand.u32 2147483647, %v2406_v32 }
0x322d   :  { %v2419_v19 = vor.u32 1.1754944e-38, %v2418_v57  ;;  %vm2417_vm2 = vcmp.eq.f32.partialorder %v2416_v42, 8.507059e+37 }
0x3231   :  { %v4083_v34 = vpop.eup %4082 }
0x3232   :  { %v2408_v35 = vmul.f32 %v4083_v34, %v2406_v32  ;;  %vm2413_vm14 = vweird.f32 %v4083_v34 }
0x3233   :  { %vm2414_vm1 = vmor %vm2412_vm15, %vm2413_vm14 }
0x3234   :  { %v2409_v39 = vsub.f32 1.0, %v2408_v35 }
0x3236   :  { %v2410_v40 = vmul.f32 %v4083_v34, %v2409_v39 }
0x3238   :  { %v2411_v50 = vadd.f32 %v4083_v34, %v2410_v40 }
0x323a   :  { %v2415_v0 = vsel %vm2414_vm1, %v4083_v34, %v2411_v50 }
0x323b   :  { %v2420_v59 = vsel %vm2417_vm2, %v2419_v19, %v2415_v0 }
0x323c   :  { %v2433_v16 = vsub.f32 1.0, %v2420_v59  ;;  %v2439_v60 = vmul.f32 %v2420_v59, %v4949_v25 }
0x3290   :  { %v2424_v51 = vpop.permute.xlu1 %2423 }
0x3291   :  { %v2426_v62 = vmul.f32 %v2424_v51, %v2420_v59 }
0x3293   :  { %2428 = vrot.lane.b32.xlu2 %v2426_v62, %s4189_s21 }
0x32ed   :  { %v2429_v14 = vpop.permute.xlu2 %2428 }
0x32ee   :  { %v2431_v49 = vadd.f32 %v2429_v14, %v645_v20 }
0x32f0   :  { %4084 = vtanh.f32 %v2431_v49 }
0x32f6   :  { %v4085_v47 = vpop.eup %4084 }
0x32f7   :  { %2435 = vrot.lane.b32.xlu0 %v4085_v47, %s4190_s22 }
0x3369   :  { %v2436_v63 = vpop.permute.xlu0 %2435 }
0x336a   :  { %v2438_v5 = vmul.f32 %v2436_v63, %v2433_v16 }
0x336c   :  { %v4965_v58 = vadd.f32 %v2439_v60, %v2438_v5 }
0x336e   :  { %2449 = vrot.lane.b32.xlu1 %v4965_v58, %s4190_s22 }
0x33e0   :  { %v2450_v6 = vpop.permute.xlu1 %2449 }
0x33e1   :  { %2452 = vst.msk [vmem:[%s5242_s12 + $0x15] sm:$0x2] %vm845_vm5, %v2450_v6  ;;  %3883 = vmatmul.msk.f32.vlgmr.msra.gmra.mxu3 %vm73_vm0, %v2450_v6 }
0x3464   :  { %v2472_v7 = vpop.f32.mrf.mxu3 }
0x3465   :  { %v2473_v23 = vadd.f32 %v4935_v48, %v2472_v7 }
0x3467   :  { %2496 = vrot.lane.b32.xlu2 %v2473_v23, %s4188_s19  ;;  %v2475_v15 = vadd.f32 %v2473_v23, %v670_v21 }
0x3469   :  { %v3884_v17 = vmul.f32 -1.442695, %v2475_v15 }
0x346b   :  { %4086 = vpow2.f32 %v3884_v17 }
0x3471   :  { %v4087_v26 = vpop.eup %4086 }
0x3472   :  { %v2479_v9 = vadd.f32 1.0, %v4087_v26 }
0x3474   :  { %4088 = vrcp.f32 %v2479_v9  ;;  %v2491_v31 = vand.u32 2147483648, %v2479_v9  ;;  %vm2485_vm4 = vweird.f32 %v2479_v9  ;;  %v2489_v32 = vand.u32 2147483647, %v2479_v9 }
0x3476   :  { %v2492_v35 = vor.u32 1.1754944e-38, %v2491_v31  ;;  %vm2490_vm7 = vcmp.eq.f32.partialorder %v2489_v32, 8.507059e+37 }
0x347a   :  { %v4089_v13 = vpop.eup %4088 }
0x347b   :  { %v2481_v28 = vmul.f32 %v4089_v13, %v2479_v9  ;;  %vm2486_vm3 = vweird.f32 %v4089_v13 }
0x347c   :  { %vm2487_vm6 = vmor %vm2485_vm4, %vm2486_vm3 }
0x347d   :  { %v2482_v20 = vsub.f32 1.0, %v2481_v28 }
0x347f   :  { %v2483_v44 = vmul.f32 %v4089_v13, %v2482_v20  ;;  %v695_v20 = vadd.f32 %v4942_v37, %v4355_v18 }
0x3481   :  { %v2484_v29 = vadd.f32 %v4089_v13, %v2483_v44 }
0x3483   :  { %v2488_v34 = vsel %vm2487_vm6, %v4089_v13, %v2484_v29 }
0x3484   :  { %v2493_v39 = vsel %vm2490_vm7, %v2492_v35, %v2488_v34 }
0x3485   :  { %v2506_v0 = vsub.f32 1.0, %v2493_v39  ;;  %v2512_v51 = vmul.f32 %v2493_v39, %v4965_v58 }
0x34c1   :  { %v2497_v54 = vpop.permute.xlu2 %2496 }
0x34c2   :  { %v2499_v40 = vmul.f32 %v2497_v54, %v2493_v39 }
0x34c4   :  { %2501 = vrot.lane.b32.xlu0 %v2499_v40, %s4189_s21 }
0x3536   :  { %v2502_v50 = vpop.permute.xlu0 %2501 }
0x3537   :  { %v2504_v57 = vadd.f32 %v2502_v50, %v670_v21 }
0x3539   :  { %4090 = vtanh.f32 %v2504_v57 }
0x353f   :  { %v4091_v42 = vpop.eup %4090 }
0x3540   :  { %2508 = vrot.lane.b32.xlu1 %v4091_v42, %s4190_s22 }
0x35b2   :  { %v2509_v19 = vpop.permute.xlu1 %2508 }
0x35b3   :  { %v2511_v59 = vmul.f32 %v2509_v19, %v2506_v0 }
0x35b5   :  { %v4981_v62 = vadd.f32 %v2512_v51, %v2511_v59 }
0x35b7   :  { %2522 = vrot.lane.b32.xlu2 %v4981_v62, %s4190_s22 }
0x3611   :  { %v2523_v14 = vpop.permute.xlu2 %2522 }
0x3612   :  { %2525 = vst.msk [vmem:[%s5242_s12 + $0x16] sm:$0x2] %vm845_vm5, %v2523_v14  ;;  %3885 = vmatmul.msk.f32.vlgmr.msrb.gmra.mxu0 %vm73_vm0, %v2523_v14 }
0x3619   :  { %v2820_v49 = vld [vmem:[%s5242_s12 + $0x10] sm:$0xff] }
0x361a   :  { %v3895_v47 = vmul.f32 -1.442695, %v2820_v49 }
0x361c   :  { %4092 = vpow2.f32 %v3895_v47 }
0x3622   :  { %v4093_v16 = vpop.eup %4092 }
0x3623   :  { %v2836_v63 = vadd.f32 1.0, %v4093_v16 }
0x3625   :  { %4094 = vrcp.f32 %v2836_v63  ;;  %v2879_v7 = vand.u32 2147483648, %v2836_v63  ;;  %v2877_v21 = vand.u32 2147483647, %v2836_v63  ;;  %vm2873_vm9 = vweird.f32 %v2836_v63 }
0x3627   :  { %v2880_v17 = vor.u32 1.1754944e-38, %v2879_v7  ;;  %vm2878_vm11 = vcmp.eq.f32.partialorder %v2877_v21, 8.507059e+37  ;;  %v720_v21 = vadd.f32 %v4942_v37, %v4435_v61 }
0x362b   :  { %v4095_v60 = vpop.eup %4094 }
0x362c   :  { %v2869_v5 = vmul.f32 %v4095_v60, %v2836_v63  ;;  %vm2874_vm8 = vweird.f32 %v4095_v60 }
0x362d   :  { %vm2875_vm10 = vmor %vm2873_vm9, %vm2874_vm8 }
0x362e   :  { %v2870_v6 = vsub.f32 1.0, %v2869_v5 }
0x3630   :  { %v2871_v23 = vmul.f32 %v4095_v60, %v2870_v6 }
0x3632   :  { %v2872_v15 = vadd.f32 %v4095_v60, %v2871_v23 }
0x3634   :  { %v2876_v26 = vsel %vm2875_vm10, %v4095_v60, %v2872_v15  ;;  %vm839_vm10 = vcmask 123904  }
0x3635   :  { %v2881_v9 = vsel %vm2878_vm11, %v2880_v17, %v2876_v26 }
0x3636   :  { %2900 = vst.msk [vmem:[%s5242_s12 + $0x10] sm:$0xff] %vm73_vm0, %v2881_v9 }
0x368f   :  { %v2545_v13 = vpop.f32.mrf.mxu0 }
0x3690   :  { %v2546_v28 = vadd.f32 %v4935_v48, %v2545_v13 }
0x3692   :  { %2569 = vrot.lane.b32.xlu0 %v2546_v28, %s4188_s19  ;;  %v2548_v44 = vadd.f32 %v2546_v28, %v695_v20 }
0x3694   :  { %v3886_v29 = vmul.f32 -1.442695, %v2548_v44 }
0x3696   :  { %4096 = vpow2.f32 %v3886_v29 }
0x369c   :  { %v4097_v31 = vpop.eup %4096 }
0x369d   :  { %v2552_v32 = vadd.f32 1.0, %v4097_v31 }
0x369f   :  { %4098 = vrcp.f32 %v2552_v32  ;;  %v2564_v50 = vand.u32 2147483648, %v2552_v32  ;;  %vm2558_vm13 = vweird.f32 %v2552_v32  ;;  %v2562_v57 = vand.u32 2147483647, %v2552_v32 }
0x36a1   :  { %v2565_v0 = vor.u32 1.1754944e-38, %v2564_v50  ;;  %vm2563_vm15 = vcmp.eq.f32.partialorder %v2562_v57, 8.507059e+37 }
0x36a5   :  { %v4099_v34 = vpop.eup %4098 }
0x36a6   :  { %v2554_v35 = vmul.f32 %v4099_v34, %v2552_v32  ;;  %vm2559_vm12 = vweird.f32 %v4099_v34 }
0x36a7   :  { %vm2560_vm14 = vmor %vm2558_vm13, %vm2559_vm12 }
0x36a8   :  { %v2555_v54 = vsub.f32 1.0, %v2554_v35 }
0x36aa   :  { %v2556_v39 = vmul.f32 %v4099_v34, %v2555_v54 }
0x36ac   :  { %v2557_v40 = vadd.f32 %v4099_v34, %v2556_v39 }
0x36ae   :  { %v2561_v42 = vsel %vm2560_vm14, %v4099_v34, %v2557_v40 }
0x36af   :  { %v2566_v19 = vsel %vm2563_vm15, %v2565_v0, %v2561_v42  ;;  %vm2901_vm15 = vcmask 125952  }
0x36b0   :  { %v2579_v47 = vsub.f32 1.0, %v2566_v19  ;;  %v2585_v63 = vmul.f32 %v2566_v19, %v4981_v62 }
0x3704   :  { %v2570_v18 = vpop.permute.xlu0 %2569 }
0x3705   :  { %v2572_v51 = vmul.f32 %v2570_v18, %v2566_v19 }
0x3707   :  { %2574 = vrot.lane.b32.xlu1 %v2572_v51, %s4189_s21 }
0x3779   :  { %v2575_v59 = vpop.permute.xlu1 %2574 }
0x377a   :  { %v2577_v14 = vadd.f32 %v2575_v59, %v695_v20 }
0x377c   :  { %4100 = vtanh.f32 %v2577_v14 }
0x3782   :  { %v4101_v49 = vpop.eup %4100 }
0x3783   :  { %2581 = vrot.lane.b32.xlu2 %v4101_v49, %s4190_s22 }
0x37dd   :  { %v2582_v16 = vpop.permute.xlu2 %2581 }
0x37de   :  { %v2584_v60 = vmul.f32 %v2582_v16, %v2579_v47  ;;  %v745_v47 = vadd.f32 %v4942_v37, %v4506_v53 }
0x37e0   :  { %v5004_v5 = vadd.f32 %v2585_v63, %v2584_v60 }
0x37e2   :  { %2595 = vrot.lane.b32.xlu0 %v5004_v5, %s4190_s22 }
0x3854   :  { %v2596_v6 = vpop.permute.xlu0 %2595 }
0x3855   :  { %2598 = vst.msk [vmem:[%s5242_s12 + $0x17] sm:$0x2] %vm845_vm5, %v2596_v6  ;;  %3887 = vmatmul.msk.f32.vlgmr.msra.gmra.mxu1 %vm73_vm0, %v2596_v6 }
0x38d2   :  { %v2618_v7 = vpop.f32.mrf.mxu1 }
0x38d3   :  { %v2619_v23 = vadd.f32 %v4935_v48, %v2618_v7 }
0x38d5   :  { %2642 = vrot.lane.b32.xlu1 %v2619_v23, %s4188_s19  ;;  %v2621_v15 = vadd.f32 %v2619_v23, %v720_v21 }
0x38d7   :  { %v3888_v17 = vmul.f32 -1.442695, %v2621_v15 }
0x38d9   :  { %4102 = vpow2.f32 %v3888_v17 }
0x38df   :  { %v4103_v26 = vpop.eup %4102 }
0x38e0   :  { %v2625_v9 = vadd.f32 1.0, %v4103_v26 }
0x38e2   :  { %4104 = vrcp.f32 %v2625_v9  ;;  %v2637_v31 = vand.u32 2147483648, %v2625_v9  ;;  %vm2631_vm2 = vweird.f32 %v2625_v9  ;;  %v2635_v32 = vand.u32 2147483647, %v2625_v9 }
0x38e4   :  { %v2638_v35 = vor.u32 1.1754944e-38, %v2637_v31  ;;  %vm2636_vm4 = vcmp.eq.f32.partialorder %v2635_v32, 8.507059e+37 }
0x38e8   :  { %v4105_v13 = vpop.eup %4104 }
0x38e9   :  { %v2627_v28 = vmul.f32 %v4105_v13, %v2625_v9  ;;  %vm2632_vm1 = vweird.f32 %v4105_v13 }
0x38ea   :  { %vm2633_vm3 = vmor %vm2631_vm2, %vm2632_vm1 }
0x38eb   :  { %v2628_v20 = vsub.f32 1.0, %v2627_v28 }
0x38ed   :  { %v2629_v44 = vmul.f32 %v4105_v13, %v2628_v20 }
0x38ef   :  { %v2630_v29 = vadd.f32 %v4105_v13, %v2629_v44 }
0x38f1   :  { %v2634_v34 = vsel %vm2633_vm3, %v4105_v13, %v2630_v29  ;;  %vm3735_vm3 = vcmask 523264  }
0x38f2   :  { %v2639_v54 = vsel %vm2636_vm4, %v2638_v35, %v2634_v34 }
0x38f3   :  { %v2652_v42 = vsub.f32 1.0, %v2639_v54  ;;  %v2658_v18 = vmul.f32 %v2639_v54, %v5004_v5 }
0x3947   :  { %v2643_v61 = vpop.permute.xlu1 %2642 }
0x3948   :  { %v2645_v39 = vmul.f32 %v2643_v61, %v2639_v54 }
0x394a   :  { %2647 = vrot.lane.b32.xlu2 %v2645_v39, %s4189_s21 }
0x39a4   :  { %v2648_v40 = vpop.permute.xlu2 %2647 }
0x39a5   :  { %v2650_v50 = vadd.f32 %v2648_v40, %v720_v21  ;;  %v834_v40 = vmax.f32 %v4402_v52, 0.0  ;;  %v1930_v52 = vmax.f32 %v4828_v3, 0.0  ;;  %v2936_v3 = vld [vmem:[#allocation3 + $0x10] sm:$0xff] }
0x39a7   :  { %4106 = vtanh.f32 %v2650_v50  ;;  %v908_v50 = vmax.f32 %v4467_v41, 0.0  ;;  %v2149_v41 = vmax.f32 %v4889_v22, 0.0 }
0x39ad   :  { %v4107_v57 = vpop.eup %4106 }
0x39ae   :  { %2654 = vrot.lane.b32.xlu0 %v4107_v57, %s4190_s22  ;;  %v1273_v57 = vmax.f32 %v4639_v11, 0.0  ;;  %v2295_v11 = vmax.f32 %v4923_v46, 0.0 }
0x3a20   :  { %v2655_v0 = vpop.permute.xlu0 %2654 }
0x3a21   :  { %v2657_v19 = vmul.f32 %v2655_v0, %v2652_v42  ;;  %v1419_v42 = vmax.f32 %v4682_v10, 0.0  ;;  %v1492_v0 = vmax.f32 %v4720_v2, 0.0  ;;  %v2908_v10 = vld [vmem:[#allocation3] sm:$0xff]  ;;  %v2937_v2 = vld [vmem:[#allocation3 + $0x18] sm:$0xff] }
0x3a22   :  { %2955 = vmatpush.msrb.mxu1 %v2937_v2 }
0x3a23   :  { %v5020_v51 = vadd.f32 %v2658_v18, %v2657_v19  ;;  %v2909_v18 = vld [vmem:[#allocation3 + $0x8] sm:$0xff]  ;;  %v2368_v19 = vmax.f32 %v4949_v25, 0.0 }
0x3a24   :  { %2927 = vmatpush.msra.mxu0 %v2909_v18  ;;  %2956 = vmatpush.msrb.mxu1 %v2936_v3  ;;  %v3188_v18 = vld [vmem:[#allocation3 + $0xa0] sm:$0xff]  ;;  %v1857_v3 = vmax.f32 %v4810_v12, 0.0  ;;  %v2992_v12 = vld [vmem:[#allocation3 + $0x30] sm:$0xff] }
0x3a25   :  { %2668 = vrot.lane.b32.xlu1 %v5020_v51, %s4190_s22 }
0x3a26   :  { %2928 = vmatpush.msra.mxu0 %v2908_v10 }
0x3a97   :  { %v2669_v59 = vpop.permute.xlu1 %2668 }
0x3a98   :  { %2671 = vst.msk [vmem:[%s5242_s12 + $0x18] sm:$0x2] %vm845_vm5, %v2669_v59  ;;  %3889 = vmatmul.msk.f32.vlgmr.msra.gmra.mxu2 %vm73_vm0, %v2669_v59 }
0x3b1b   :  { %v2691_v14 = vpop.f32.mrf.mxu2 }
0x3b1c   :  { %v2692_v49 = vadd.f32 %v4935_v48, %v2691_v14 }
0x3b1e   :  { %2715 = vrot.lane.b32.xlu2 %v2692_v49, %s4188_s19  ;;  %v2694_v16 = vadd.f32 %v2692_v49, %v745_v47 }
0x3b20   :  { %v3890_v63 = vmul.f32 -1.442695, %v2694_v16 }
0x3b22   :  { %4108 = vpow2.f32 %v3890_v63 }
0x3b28   :  { %v4109_v60 = vpop.eup %4108 }
0x3b29   :  { %v2698_v6 = vadd.f32 1.0, %v4109_v60 }
0x3b2b   :  { %4110 = vrcp.f32 %v2698_v6  ;;  %v2710_v26 = vand.u32 2147483648, %v2698_v6  ;;  %vm2704_vm7 = vweird.f32 %v2698_v6  ;;  %v2708_v9 = vand.u32 2147483647, %v2698_v6 }
0x3b2d   :  { %v2711_v28 = vor.u32 1.1754944e-38, %v2710_v26  ;;  %vm2709_vm9 = vcmp.eq.f32.partialorder %v2708_v9, 8.507059e+37  ;;  %v1565_v26 = vmax.f32 %v4738_v1, 0.0  ;;  %v5084_v9 = vadd.f32 %v4942_v37, %v4577_v55 }
0x3b31   :  { %v4111_v7 = vpop.eup %4110 }
0x3b32   :  { %v2700_v23 = vmul.f32 %v4111_v7, %v2698_v6  ;;  %vm2705_vm6 = vweird.f32 %v4111_v7 }
0x3b33   :  { %vm2706_vm8 = vmor %vm2704_vm7, %vm2705_vm6 }
0x3b34   :  { %v2701_v21 = vsub.f32 1.0, %v2700_v23 }
0x3b36   :  { %v2702_v15 = vmul.f32 %v4111_v7, %v2701_v21 }
0x3b38   :  { %v2703_v17 = vadd.f32 %v4111_v7, %v2702_v15  ;;  %v981_v15 = vmax.f32 %v4538_v38, 0.0 }
0x3b3a   :  { %v2707_v13 = vsel %vm2706_vm8, %v4111_v7, %v2703_v17  ;;  %v1346_v17 = vmax.f32 %v4657_v4, 0.0  ;;  %v2964_v4 = vld [vmem:[#allocation3 + $0x20] sm:$0xff] }
0x3b3b   :  { %v2712_v20 = vsel %vm2709_vm9, %v2711_v28, %v2707_v13 }
0x3b3c   :  { %v2725_v34 = vsub.f32 1.0, %v2712_v20  ;;  %v2731_v61 = vmul.f32 %v2712_v20, %v5020_v51 }
0x3b78   :  { %v2716_v53 = vpop.permute.xlu2 %2715 }
0x3b79   :  { %v2718_v44 = vmul.f32 %v2716_v53, %v2712_v20  ;;  %v2965_v20 = vld [vmem:[#allocation3 + $0x28] sm:$0xff] }
0x3b7a   :  { %2983 = vmatpush.msrb.mxu2 %v2965_v20  ;;  %v3412_v20 = vld [vmem:[#allocation3 + $0x120] sm:$0xff] }
0x3b7b   :  { %2720 = vrot.lane.b32.xlu0 %v2718_v44, %s4189_s21 }
0x3b7c   :  { %2984 = vmatpush.msrb.mxu2 %v2964_v4 }
0x3bed   :  { %v2721_v29 = vpop.permute.xlu0 %2720 }
0x3bee   :  { %v2723_v31 = vadd.f32 %v2721_v29, %v745_v47  ;;  %v3077_v29 = vld [vmem:[#allocation3 + $0x68] sm:$0xff] }
0x3bef   :  { %3095 = vmatpush.msra.mxu2 %v3077_v29  ;;  %v1784_v29 = vmax.f32 %v4792_v27, 0.0 }
0x3bf0   :  { %4112 = vtanh.f32 %v2723_v31  ;;  %v3076_v31 = vld [vmem:[#allocation3 + $0x60] sm:$0xff] }
0x3bf1   :  { %3096 = vmatpush.msra.mxu2 %v3076_v31 }
0x3bf6   :  { %v4113_v32 = vpop.eup %4112 }
0x3bf7   :  { %2727 = vrot.lane.b32.xlu1 %v4113_v32, %s4190_s22 }
0x3c69   :  { %v2728_v35 = vpop.permute.xlu1 %2727 }
0x3c6a   :  { %v2730_v54 = vmul.f32 %v2728_v35, %v2725_v34 }
0x3c6c   :  { %v5036_v39 = vadd.f32 %v2731_v61, %v2730_v54 }
0x3c6e   :  { %2741 = vrot.lane.b32.xlu2 %v5036_v39, %s4190_s22 }
0x3c76   :  { %836 = vrot.lane.b32.xlu2 %v834_v40, %s4190_s22 }
0x3c7e   :  { %910 = vrot.lane.b32.xlu2 %v908_v50, %s4190_s22 }
0x3c86   :  { %1275 = vrot.lane.b32.xlu2 %v1273_v57, %s4190_s22 }
0x3c8e   :  { %1421 = vrot.lane.b32.xlu2 %v1419_v42, %s4190_s22  ;;  %v1054_v42 = vmax.f32 %v4585_v36, 0.0  ;;  %v1200_v36 = vmax.f32 %v4621_v24, 0.0  ;;  %v2514_v24 = vmax.f32 %v4981_v62, 0.0  ;;  %v3133_v62 = vld [vmem:[#allocation3 + $0x88] sm:$0xff] }
0x3c96   :  { %1494 = vrot.lane.b32.xlu2 %v1492_v0, %s4190_s22  ;;  %v3189_v0 = vld [vmem:[#allocation3 + $0xa8] sm:$0xff] }
0x3c9e   :  { %1932 = vrot.lane.b32.xlu2 %v1930_v52, %s4190_s22 }
0x3ca6   :  { %2151 = vrot.lane.b32.xlu2 %v2149_v41, %s4190_s22 }
0x3cae   :  { %2297 = vrot.lane.b32.xlu2 %v2295_v11, %s4190_s22  ;;  %v1127_v11 = vmax.f32 %v4603_v30, 0.0  ;;  %v1638_v30 = vmax.f32 %v4756_v43, 0.0  ;;  %v2733_v43 = vmax.f32 %v5036_v39, 0.0 }
0x3cb6   :  { %2370 = vrot.lane.b32.xlu2 %v2368_v19, %s4190_s22 }
0x3cc8   :  { %v2742_v59 = vpop.permute.xlu2 %2741 }
0x3cc9   :  { %2744 = vst.msk [vmem:[%s5242_s12 + $0x19] sm:$0x2] %vm845_vm5, %v2742_v59  ;;  %3891 = vmatmul.msk.f32.vlgmr.msrb.gmra.mxu3 %vm73_vm0, %v2742_v59  ;;  %v2003_v59 = vmax.f32 %v4853_v8, 0.0  ;;  %v3105_v8 = vld [vmem:[#allocation3 + $0x78] sm:$0xff] }
0x3cd0   :  { %v837_v22 = vpop.permute.xlu2 %836 }
0x3cd1   :  { %840 = vst.msk [vmem:[#allocation2] sm:$0x3] %vm839_vm10, %v837_v22  ;;  %v2076_v22 = vmax.f32 %v4871_v56, 0.0  ;;  %v3104_v56 = vld [vmem:[#allocation3 + $0x70] sm:$0xff] }
0x3cd8   :  { %v911_v46 = vpop.permute.xlu2 %910  ;;  %v2907_v25 = vld [vmem:[#allocation2] sm:$0x3] }
0x3cd9   :  { %914 = vst.msk [vmem:[#allocation2 + $0x2] sm:$0x3] %vm839_vm10, %v911_v46  ;;  %3897 = vmatmul.msk.f32.vlgmr.msra.gmra.mxu0 %vm73_vm0, %v2907_v25  ;;  %v2993_v46 = vld [vmem:[#allocation3 + $0x38] sm:$0xff]  ;;  %v3021_v25 = vld [vmem:[#allocation3 + $0x48] sm:$0xff] }
0x3cda   :  { %3011 = vmatpush.msra.mxu3 %v2993_v46  ;;  %3039 = vmatpush.msrb.mxu0 %v3021_v25  ;;  %v3525_v25 = vld [vmem:[#allocation3 + $0x168] sm:$0xff] }
0x3cdc   :  { %3012 = vmatpush.msra.mxu3 %v2992_v12 }
0x3cde   :  { %3123 = vmatpush.msrb.mxu3 %v3105_v8  ;;  %v3553_v8 = vld [vmem:[#allocation3 + $0x178] sm:$0xff] }
0x3ce0   :  { %v1276_v14 = vpop.permute.xlu2 %1275  ;;  %v2934_v49 = vld [vmem:[#allocation2 + $0x2] sm:$0x3]  ;;  %3124 = vmatpush.msrb.mxu3 %v3104_v56  ;;  %v3524_v56 = vld [vmem:[#allocation3 + $0x160] sm:$0xff] }
0x3ce1   :  { %1279 = vst.msk [vmem:[#allocation2 + $0xc] sm:$0x3] %vm839_vm10, %v1276_v14  ;;  %3898 = vmatmul.msk.f32.vlgmr.msrb.gmra.mxu1 %vm73_vm0, %v2934_v49  ;;  %v3020_v14 = vld [vmem:[#allocation3 + $0x40] sm:$0xff]  ;;  %v3049_v49 = vld [vmem:[#allocation3 + $0x58] sm:$0xff] }
0x3ce2   :  { %3040 = vmatpush.msrb.mxu0 %v3020_v14  ;;  %3067 = vmatpush.msra.mxu1 %v3049_v49  ;;  %v3552_v49 = vld [vmem:[#allocation3 + $0x170] sm:$0xff] }
0x3ce4   :  { %3151 = vmatpush.msra.mxu0 %v3133_v62  ;;  %v3637_v62 = vld [vmem:[#allocation3 + $0x1a8] sm:$0xff] }
0x3ce8   :  { %v1422_v47 = vpop.permute.xlu2 %1421  ;;  %v3074_v19 = vld [vmem:[#allocation2 + $0xc] sm:$0x3] }
0x3ce9   :  { %1425 = vst.msk [vmem:[#allocation2 + $0x10] sm:$0x3] %vm839_vm10, %v1422_v47  ;;  %v3048_v47 = vld [vmem:[#allocation3 + $0x50] sm:$0xff] }
0x3cea   :  { %3068 = vmatpush.msra.mxu1 %v3048_v47 }
0x3cf0   :  { %v1495_v16 = vpop.permute.xlu2 %1494 }
0x3cf1   :  { %1498 = vst.msk [vmem:[#allocation2 + $0x12] sm:$0x3] %vm839_vm10, %v1495_v16  ;;  %v3132_v16 = vld [vmem:[#allocation3 + $0x80] sm:$0xff] }
0x3cf2   :  { %3152 = vmatpush.msra.mxu0 %v3132_v16  ;;  %v3636_v16 = vld [vmem:[#allocation3 + $0x1a0] sm:$0xff] }
0x3cf8   :  { %v1933_v63 = vpop.permute.xlu2 %1932 }
0x3cf9   :  { %1936 = vst.msk [vmem:[#allocation2 + $0x1e] sm:$0x3] %vm839_vm10, %v1933_v63 }
0x3d00   :  { %v2152_v60 = vpop.permute.xlu2 %2151 }
0x3d01   :  { %2155 = vst.msk [vmem:[#allocation2 + $0x24] sm:$0x3] %vm839_vm10, %v2152_v60 }
0x3d08   :  { %v2298_v6 = vpop.permute.xlu2 %2297 }
0x3d09   :  { %2301 = vst.msk [vmem:[#allocation2 + $0x28] sm:$0x3] %vm839_vm10, %v2298_v6  ;;  %v3161_v6 = vld [vmem:[#allocation3 + $0x98] sm:$0xff] }
0x3d0a   :  { %3179 = vmatpush.msrb.mxu1 %v3161_v6  ;;  %v3581_v6 = vld [vmem:[#allocation3 + $0x188] sm:$0xff] }
0x3d10   :  { %v2371_v7 = vpop.permute.xlu2 %2370 }
0x3d11   :  { %2374 = vst.msk [vmem:[#allocation2 + $0x2a] sm:$0x3] %vm839_vm10, %v2371_v7  ;;  %v3160_v7 = vld [vmem:[#allocation3 + $0x90] sm:$0xff] }
0x3d12   :  { %3180 = vmatpush.msrb.mxu1 %v3160_v7 }
0x3d4c   :  { %v2764_v23 = vpop.f32.mrf.mxu3 }
0x3d4d   :  { %v2765_v21 = vadd.f32 %v4935_v48, %v2764_v23 }
0x3d4f   :  { %2788 = vrot.lane.b32.xlu0 %v2765_v21, %s4188_s19  ;;  %v2767_v48 = vadd.f32 %v2765_v21, %v5084_v9 }
0x3d51   :  { %v3892_v13 = vmul.f32 -1.442695, %v2767_v48 }
0x3d53   :  { %4114 = vpow2.f32 %v3892_v13 }
0x3d57   :  { %983 = vrot.lane.b32.xlu0 %v981_v15, %s4190_s22  ;;  %v3301_v15 = vld [vmem:[#allocation3 + $0xe8] sm:$0xff] }
0x3d59   :  { %v4115_v28 = vpop.eup %4114 }
0x3d5a   :  { %v2771_v38 = vadd.f32 1.0, %v4115_v28  ;;  %v1711_v28 = vmax.f32 %v4774_v33, 0.0  ;;  %v3328_v33 = vld [vmem:[#allocation3 + $0xf0] sm:$0xff] }
0x3d5c   :  { %4116 = vrcp.f32 %v2771_v38  ;;  %v2783_v37 = vand.u32 2147483648, %v2771_v38  ;;  %vm2777_vm12 = vweird.f32 %v2771_v38  ;;  %v2781_v34 = vand.u32 2147483647, %v2771_v38 }
0x3d5e   :  { %v2784_v61 = vor.u32 1.1754944e-38, %v2783_v37  ;;  %vm2782_vm14 = vcmp.eq.f32.partialorder %v2781_v34, 8.507059e+37  ;;  %v2222_v37 = vmax.f32 %v4907_v45, 0.0  ;;  %v3158_v34 = vld [vmem:[#allocation2 + $0x12] sm:$0x3] }
0x3d5f   :  { %1348 = vrot.lane.b32.xlu0 %v1346_v17, %s4190_s22  ;;  %v3217_v17 = vld [vmem:[#allocation3 + $0xb8] sm:$0xff] }
0x3d62   :  { %v4117_v53 = vpop.eup %4116 }
0x3d63   :  { %v2773_v44 = vmul.f32 %v4117_v53, %v2771_v38  ;;  %vm2778_vm11 = vweird.f32 %v4117_v53  ;;  %v3413_v38 = vld [vmem:[#allocation3 + $0x128] sm:$0xff] }
0x3d64   :  { %vm2779_vm13 = vmor %vm2777_vm12, %vm2778_vm11 }
0x3d65   :  { %v2774_v1 = vsub.f32 1.0, %v2773_v44 }
0x3d67   :  { %1567 = vrot.lane.b32.xlu0 %v1565_v26, %s4190_s22  ;;  %v2775_v32 = vmul.f32 %v4117_v53, %v2774_v1  ;;  %v3300_v26 = vld [vmem:[#allocation3 + $0xe0] sm:$0xff] }
0x3d69   :  { %v2776_v55 = vadd.f32 %v4117_v53, %v2775_v32 }
0x3d6b   :  { %v2780_v35 = vsel %vm2779_vm13, %v4117_v53, %v2776_v55  ;;  %v3329_v53 = vld [vmem:[#allocation3 + $0xf8] sm:$0xff] }
0x3d6c   :  { %v5087_v40 = vsel %vm2782_vm14, %v2784_v61, %v2780_v35  ;;  %v3130_v55 = vld [vmem:[#allocation2 + $0x10] sm:$0x3]  ;;  %v2441_v61 = vmax.f32 %v4965_v58, 0.0 }
0x3dc1   :  { %v2789_v54 = vpop.permute.xlu0 %2788 }
0x3dc2   :  { %v2791_v50 = vmul.f32 %v2789_v54, %v5087_v40 }
0x3dc4   :  { %2793 = vrot.lane.b32.xlu1 %v2791_v50, %s4189_s21  ;;  %v3326_v50 = vld [vmem:[#allocation2 + $0x1e] sm:$0x3] }
0x3dc9   :  { %v984_v57 = vpop.permute.xlu0 %983 }
0x3dca   :  { %987 = vst.msk [vmem:[#allocation2 + $0x4] sm:$0x3] %vm839_vm10, %v984_v57  ;;  %v2587_v57 = vmax.f32 %v5004_v5, 0.0 }
0x3dcc   :  { %1056 = vrot.lane.b32.xlu1 %v1054_v42, %s4190_s22  ;;  %v3410_v42 = vld [vmem:[#allocation2 + $0x24] sm:$0x3] }
0x3dd1   :  { %v1349_v52 = vpop.permute.xlu0 %1348  ;;  %v2962_v41 = vld [vmem:[#allocation2 + $0x4] sm:$0x3] }
0x3dd2   :  { %1352 = vst.msk [vmem:[#allocation2 + $0xe] sm:$0x3] %vm839_vm10, %v1349_v52  ;;  %3899 = vmatmul.msk.f32.vlgmr.msrb.gmra.mxu2 %vm73_vm0, %v2962_v41  ;;  %v3245_v41 = vld [vmem:[#allocation3 + $0xc8] sm:$0xff] }
0x3dd3   :  { %3207 = vmatpush.msrb.mxu2 %v3189_v0  ;;  %v2660_v0 = vmax.f32 %v5020_v51, 0.0  ;;  %v3272_v51 = vld [vmem:[#allocation3 + $0xd0] sm:$0xff] }
0x3dd4   :  { %1129 = vrot.lane.b32.xlu1 %v1127_v11, %s4190_s22  ;;  %v3244_v11 = vld [vmem:[#allocation3 + $0xc0] sm:$0xff] }
0x3dd5   :  { %3208 = vmatpush.msrb.mxu2 %v3188_v18  ;;  %v3273_v18 = vld [vmem:[#allocation3 + $0xd8] sm:$0xff] }
0x3dd9   :  { %v1568_v10 = vpop.permute.xlu0 %1567  ;;  %v3102_v1 = vld [vmem:[#allocation2 + $0xe] sm:$0x3] }
0x3dda   :  { %1571 = vst.msk [vmem:[#allocation2 + $0x14] sm:$0x3] %vm839_vm10, %v1568_v10  ;;  %3903 = vmatmul.msk.f32.vlgmr.msra.gmra.mxu2 %vm73_vm0, %v3074_v19  ;;  %v3357_v10 = vld [vmem:[#allocation3 + $0x108] sm:$0xff]  ;;  %v3356_v19 = vld [vmem:[#allocation3 + $0x100] sm:$0xff] }
0x3ddb   :  { %3319 = vmatpush.msra.mxu2 %v3301_v15  ;;  %v3496_v15 = vld [vmem:[#allocation3 + $0x150] sm:$0xff] }
0x3ddc   :  { %1202 = vrot.lane.b32.xlu1 %v1200_v36, %s4190_s22  ;;  %v3385_v36 = vld [vmem:[#allocation3 + $0x118] sm:$0xff] }
0x3ddd   :  { %3320 = vmatpush.msra.mxu2 %v3300_v26  ;;  %v3609_v26 = vld [vmem:[#allocation3 + $0x198] sm:$0xff] }
0x3de1   :  { %v3186_v2 = vld [vmem:[#allocation2 + $0x14] sm:$0x3] }
0x3de2   :  { %3907 = vmatmul.msk.f32.vlgmr.msrb.gmra.mxu2 %vm73_vm0, %v3186_v2  ;;  %v3441_v2 = vld [vmem:[#allocation3 + $0x138] sm:$0xff] }
0x3de3   :  { %3431 = vmatpush.msrb.mxu2 %v3413_v38  ;;  %v3608_v38 = vld [vmem:[#allocation3 + $0x190] sm:$0xff] }
0x3de4   :  { %1640 = vrot.lane.b32.xlu1 %v1638_v30, %s4190_s22  ;;  %v2798_v30 = vsub.f32 1.0, %v5087_v40 }
0x3de5   :  { %3432 = vmatpush.msrb.mxu2 %v3412_v20  ;;  %v3494_v20 = vld [vmem:[#allocation2 + $0x2a] sm:$0x3] }
0x3dec   :  { %1859 = vrot.lane.b32.xlu1 %v1857_v3, %s4190_s22  ;;  %v3440_v3 = vld [vmem:[#allocation3 + $0x130] sm:$0xff] }
0x3df4   :  { %2005 = vrot.lane.b32.xlu1 %v2003_v59, %s4190_s22  ;;  %v3384_v59 = vld [vmem:[#allocation3 + $0x110] sm:$0xff] }
0x3dfc   :  { %2078 = vrot.lane.b32.xlu1 %v2076_v22, %s4190_s22 }
0x3e04   :  { %2516 = vrot.lane.b32.xlu1 %v2514_v24, %s4190_s22  ;;  %v2804_v24 = vmul.f32 %v5087_v40, %v5036_v39  ;;  %v3469_v39 = vld [vmem:[#allocation3 + $0x148] sm:$0xff] }
0x3e0c   :  { %2735 = vrot.lane.b32.xlu1 %v2733_v43, %s4190_s22 }
0x3e36   :  { %v2794_v63 = vpop.permute.xlu1 %2793 }
0x3e37   :  { %v2796_v60 = vadd.f32 %v2794_v63, %v5084_v9  ;;  %v3216_v9 = vld [vmem:[#allocation3 + $0xb0] sm:$0xff]  ;;  %v3468_v63 = vld [vmem:[#allocation3 + $0x140] sm:$0xff] }
0x3e39   :  { %4118 = vtanh.f32 %v2796_v60  ;;  %v3497_v60 = vld [vmem:[#allocation3 + $0x158] sm:$0xff] }
0x3e3e   :  { %v1057_v23 = vpop.permute.xlu1 %1056 }
0x3e3f   :  { %v4119_v21 = vpop.eup %4118  ;;  %1060 = vst.msk [vmem:[#allocation2 + $0x6] sm:$0x3] %vm839_vm10, %v1057_v23 }
0x3e40   :  { %2800 = vrot.lane.b32.xlu0 %v4119_v21, %s4190_s22 }
0x3e46   :  { %v1130_v48 = vpop.permute.xlu1 %1129  ;;  %v2990_v13 = vld [vmem:[#allocation2 + $0x6] sm:$0x3] }
0x3e47   :  { %1133 = vst.msk [vmem:[#allocation2 + $0x8] sm:$0x3] %vm839_vm10, %v1130_v48  ;;  %3900 = vmatmul.msk.f32.vlgmr.msra.gmra.mxu3 %vm73_vm0, %v2990_v13 }
0x3e48   :  { %1713 = vrot.lane.b32.xlu0 %v1711_v28, %s4190_s22  ;;  %3235 = vmatpush.msra.mxu3 %v3217_v17  ;;  %v3580_v17 = vld [vmem:[#allocation3 + $0x180] sm:$0xff] }
0x3e4a   :  { %3236 = vmatpush.msra.mxu3 %v3216_v9  ;;  %v3466_v9 = vld [vmem:[#allocation2 + $0x28] sm:$0x3] }
0x3e4e   :  { %v1203_v4 = vpop.permute.xlu1 %1202  ;;  %v3018_v44 = vld [vmem:[#allocation2 + $0x8] sm:$0x3] }
0x3e4f   :  { %1206 = vst.msk [vmem:[#allocation2 + $0xa] sm:$0x3] %vm839_vm10, %v1203_v4  ;;  %3901 = vmatmul.msk.f32.vlgmr.msrb.gmra.mxu0 %vm73_vm0, %v3018_v44  ;;  %3904 = vmatmul.msk.f32.vlgmr.msrb.gmra.mxu3 %vm73_vm0, %v3102_v1 }
0x3e50   :  { %1786 = vrot.lane.b32.xlu0 %v1784_v29, %s4190_s22  ;;  %3347 = vmatpush.msrb.mxu3 %v3329_v53 }
0x3e51   :  { %3263 = vmatpush.msrb.mxu0 %v3245_v41  ;;  %v2930_v41 = vpop.f32.mrf.mxu0 }
0x3e52   :  { %3348 = vmatpush.msrb.mxu3 %v3328_v33 }
0x3e53   :  { %3264 = vmatpush.msrb.mxu0 %v3244_v11 }
0x3e56   :  { %v1641_v31 = vpop.permute.xlu1 %1640  ;;  %v3046_v32 = vld [vmem:[#allocation2 + $0xa] sm:$0x3] }
0x3e57   :  { %1644 = vst.msk [vmem:[#allocation2 + $0x16] sm:$0x3] %vm839_vm10, %v1641_v31  ;;  %3902 = vmatmul.msk.f32.vlgmr.msra.gmra.mxu1 %vm73_vm0, %v3046_v32  ;;  %3905 = vmatmul.msk.f32.vlgmr.msra.gmra.mxu0 %vm73_vm0, %v3130_v55  ;;  %v3665_v32 = vld [vmem:[#allocation3 + $0x1b8] sm:$0xff]  ;;  %v3664_v55 = vld [vmem:[#allocation3 + $0x1b0] sm:$0xff] }
0x3e58   :  { %2224 = vrot.lane.b32.xlu0 %v2222_v37, %s4190_s22  ;;  %3291 = vmatpush.msra.mxu1 %v3273_v18  ;;  %v3693_v37 = vld [vmem:[%s5238_s8 + $0x8] sm:$0xff] }
0x3e59   :  { %3375 = vmatpush.msra.mxu0 %v3357_v10 }
0x3e5a   :  { %3292 = vmatpush.msra.mxu1 %v3272_v51  ;;  %v2958_v51 = vpop.f32.mrf.mxu1 }
0x3e5b   :  { %3376 = vmatpush.msra.mxu0 %v3356_v19  ;;  %v3730_v19 = vld [vmem:[%s5240_s10 + $0x38] sm:$0xff] }
0x3e5e   :  { %v1860_v27 = vpop.permute.xlu1 %1859  ;;  %v3214_v35 = vld [vmem:[#allocation2 + $0x16] sm:$0x3] }
0x3e5f   :  { %1863 = vst.msk [vmem:[#allocation2 + $0x1c] sm:$0x3] %vm839_vm10, %v1860_v27  ;;  %3906 = vmatmul.msk.f32.vlgmr.msrb.gmra.mxu1 %vm73_vm0, %v3158_v34  ;;  %3908 = vmatmul.msk.f32.vlgmr.msra.gmra.mxu3 %vm73_vm0, %v3214_v35  ;;  %v3692_v27 = vld [vmem:[%s5238_s8] sm:$0xff] }
0x3e60   :  { %2443 = vrot.lane.b32.xlu0 %v2441_v61, %s4190_s22  ;;  %3403 = vmatpush.msrb.mxu1 %v3385_v36  ;;  %v3691_v34 = vld [vmem:[%s5231_s1] sm:$0x3]  ;;  %v3729_v36 = vld [vmem:[%s5240_s10 + $0x30] sm:$0xff] }
0x3e61   :  { %3459 = vmatpush.msra.mxu3 %v3441_v2 }
0x3e62   :  { %3404 = vmatpush.msrb.mxu1 %v3384_v59 }
0x3e63   :  { %3460 = vmatpush.msra.mxu3 %v3440_v3  ;;  %v2986_v3 = vpop.f32.mrf.mxu2 }
0x3e66   :  { %v2006_v45 = vpop.permute.xlu1 %2005  ;;  %v3298_v54 = vld [vmem:[#allocation2 + $0x1c] sm:$0x3] }
0x3e67   :  { %2009 = vst.msk [vmem:[#allocation2 + $0x20] sm:$0x3] %vm839_vm10, %v2006_v45  ;;  %3911 = vmatmul.msk.f32.vlgmr.msra.gmra.mxu2 %vm73_vm0, %v3298_v54  ;;  %3912 = vmatmul.msk.f32.vlgmr.msrb.gmra.mxu3 %vm73_vm0, %v3326_v50 }
0x3e68   :  { %2589 = vrot.lane.b32.xlu0 %v2587_v57, %s4190_s22  ;;  %3543 = vmatpush.msra.mxu2 %v3525_v25  ;;  %v3727_v25 = vld [vmem:[%s5240_s10 + $0x20] sm:$0xff] }
0x3e69   :  { %3571 = vmatpush.msrb.mxu3 %v3553_v8 }
0x3e6a   :  { %3544 = vmatpush.msra.mxu2 %v3524_v56 }
0x3e6b   :  { %3572 = vmatpush.msrb.mxu3 %v3552_v49 }
0x3e6e   :  { %v2079_v58 = vpop.permute.xlu1 %2078  ;;  %v3354_v21 = vld [vmem:[#allocation2 + $0x20] sm:$0x3] }
0x3e6f   :  { %2082 = vst.msk [vmem:[#allocation2 + $0x22] sm:$0x3] %vm839_vm10, %v2079_v58  ;;  %3915 = vmatmul.msk.f32.vlgmr.msrb.gmra.mxu2 %vm73_vm0, %v3410_v42 }
0x3e70   :  { %2662 = vrot.lane.b32.xlu0 %v2660_v0, %s4190_s22  ;;  %3655 = vmatpush.msrb.mxu2 %v3637_v62 }
0x3e72   :  { %3656 = vmatpush.msrb.mxu2 %v3636_v16 }
0x3e76   :  { %v2517_v52 = vpop.permute.xlu1 %2516  ;;  %v3382_v13 = vld [vmem:[#allocation2 + $0x22] sm:$0x3] }
0x3e77   :  { %2520 = vst.msk [vmem:[#allocation2 + $0x2e] sm:$0x3] %vm839_vm10, %v2517_v52  ;;  %v3937_v52 = vld [vmem:[%s5237_s7] ss:$0 sm:$0xff] }
0x3e78   :  { %v2933_v2 = vadd.f32 %v3937_v52, %v2930_v41 }
0x3e7e   :  { %v2736_v5 = vpop.permute.xlu1 %2735  ;;  %v3550_v44 = vld [vmem:[#allocation2 + $0x2e] sm:$0x3] }
0x3e7f   :  { %2739 = vst.msk [vmem:[#allocation2 + $0x34] sm:$0x3] %vm839_vm10, %v2736_v5 }
0x3e86   :  { %v3634_v33 = vld [vmem:[#allocation2 + $0x34] sm:$0x3] }
0x3eb2   :  { %v2801_v22 = vpop.permute.xlu0 %2800 }
0x3eb3   :  { %v2803_v43 = vmul.f32 %v2801_v22, %v2798_v30  ;;  %v3728_v22 = vld [vmem:[%s5240_s10 + $0x28] sm:$0xff] }
0x3eb5   :  { %v2805_v46 = vadd.f32 %v2804_v24, %v2803_v43  ;;  %v2961_v24 = vadd.f32 %v2958_v51, %v2933_v2 }
0x3eb7   :  { %2814 = vrot.lane.b32.xlu1 %v2805_v46, %s4190_s22  ;;  %v2806_v12 = vmax.f32 %v2805_v46, 0.0  ;;  %v2989_v8 = vadd.f32 %v2986_v3, %v2961_v24 }
0x3eb9   :  { %2808 = vrot.lane.b32.xlu2 %v2806_v12, %s4190_s22 }
0x3eba   :  { %v1714_v14 = vpop.permute.xlu0 %1713 }
0x3ebb   :  { %1717 = vst.msk [vmem:[#allocation2 + $0x18] sm:$0x3] %vm839_vm10, %v1714_v14 }
0x3ec2   :  { %v1787_v40 = vpop.permute.xlu0 %1786  ;;  %v3242_v47 = vld [vmem:[#allocation2 + $0x18] sm:$0x3] }
0x3ec3   :  { %1790 = vst.msk [vmem:[#allocation2 + $0x1a] sm:$0x3] %vm839_vm10, %v1787_v40  ;;  %3909 = vmatmul.msk.f32.vlgmr.msrb.gmra.mxu0 %vm73_vm0, %v3242_v47  ;;  %v3098_v40 = vpop.f32.mrf.mxu2 }
0x3ec4   :  { %3487 = vmatpush.msrb.mxu0 %v3469_v39 }
0x3ec6   :  { %3488 = vmatpush.msrb.mxu0 %v3468_v63 }
0x3eca   :  { %v2225_v7 = vpop.permute.xlu0 %2224  ;;  %v3270_v23 = vld [vmem:[#allocation2 + $0x1a] sm:$0x3]  ;;  %v3014_v46 = vpop.f32.mrf.mxu3 }
0x3ecb   :  { %2228 = vst.msk [vmem:[#allocation2 + $0x26] sm:$0x3] %vm839_vm10, %v2225_v7  ;;  %3910 = vmatmul.msk.f32.vlgmr.msra.gmra.mxu1 %vm73_vm0, %v3270_v23  ;;  %3913 = vmatmul.msk.f32.vlgmr.msra.gmra.mxu0 %vm73_vm0, %v3354_v21  ;;  %v3017_v14 = vadd.f32 %v3014_v46, %v2989_v8  ;;  %v3210_v21 = vpop.f32.mrf.mxu2 }
0x3ecc   :  { %3515 = vmatpush.msra.mxu1 %v3497_v60  ;;  %3599 = vmatpush.msra.mxu0 %v3581_v6  ;;  %v3042_v56 = vpop.f32.mrf.mxu0 }
0x3ecd   :  { %v3045_v62 = vadd.f32 %v3042_v56, %v3017_v14 }
0x3ece   :  { %3516 = vmatpush.msra.mxu1 %v3496_v15  ;;  %3600 = vmatpush.msra.mxu0 %v3580_v17 }
0x3ed2   :  { %v2444_v48 = vpop.permute.xlu0 %2443  ;;  %v3438_v28 = vld [vmem:[#allocation2 + $0x26] sm:$0x3]  ;;  %v3126_v16 = vpop.f32.mrf.mxu3 }
0x3ed3   :  { %2447 = vst.msk [vmem:[#allocation2 + $0x2c] sm:$0x3] %vm839_vm10, %v2444_v48  ;;  %3914 = vmatmul.msk.f32.vlgmr.msrb.gmra.mxu1 %vm73_vm0, %v3382_v13  ;;  %3916 = vmatmul.msk.f32.vlgmr.msra.gmra.mxu3 %vm73_vm0, %v3438_v28 }
0x3ed4   :  { %3917 = vmatmul.msk.f32.vlgmr.msrb.gmra.mxu0 %vm73_vm0, %v3466_v9  ;;  %3627 = vmatpush.msrb.mxu1 %v3609_v26  ;;  %v3070_v49 = vpop.f32.mrf.mxu1  ;;  %v3154_v60 = vpop.f32.mrf.mxu0 }
0x3ed5   :  { %3683 = vmatpush.msra.mxu3 %v3665_v32  ;;  %3715 = vmatpush.msrb.mxu0 %v3693_v37  ;;  %v3073_v39 = vadd.f32 %v3070_v49, %v3045_v62  ;;  %v3725_v32 = vld [vmem:[%s5240_s10 + $0x10] sm:$0xff] }
0x3ed6   :  { %3628 = vmatpush.msrb.mxu1 %v3608_v38 }
0x3ed7   :  { %3684 = vmatpush.msra.mxu3 %v3664_v55  ;;  %3716 = vmatpush.msrb.mxu0 %v3692_v27  ;;  %v3101_v47 = vadd.f32 %v3098_v40, %v3073_v39  ;;  %v3724_v27 = vld [vmem:[%s5240_s10 + $0x8] sm:$0xff] }
0x3ed9   :  { %v3129_v63 = vadd.f32 %v3126_v16, %v3101_v47 }
0x3eda   :  { %v2590_v53 = vpop.permute.xlu0 %2589  ;;  %v3522_v4 = vld [vmem:[#allocation2 + $0x2c] sm:$0x3] }
0x3edb   :  { %2593 = vst.msk [vmem:[#allocation2 + $0x30] sm:$0x3] %vm839_vm10, %v2590_v53  ;;  %3918 = vmatmul.msk.f32.vlgmr.msra.gmra.mxu1 %vm73_vm0, %v3494_v20  ;;  %3919 = vmatmul.msk.f32.vlgmr.msra.gmra.mxu2 %vm73_vm0, %v3522_v4  ;;  %v3157_v6 = vadd.f32 %v3154_v60, %v3129_v63 }
0x3edc   :  { %3920 = vmatmul.msk.f32.vlgmr.msrb.gmra.mxu3 %vm73_vm0, %v3550_v44  ;;  %3747 = vmatpush.msra.mxu1 %v3730_v19  ;;  %v3182_v7 = vpop.f32.mrf.mxu1 }
0x3edd   :  { %v3185_v23 = vadd.f32 %v3182_v7, %v3157_v6 }
0x3ede   :  { %3748 = vmatpush.msra.mxu1 %v3729_v36 }
0x3edf   :  { %v3213_v17 = vadd.f32 %v3210_v21, %v3185_v23 }
0x3ee0   :  { %3749 = vmatpush.msra.mxu1 %v3728_v22 }
0x3ee2   :  { %v2663_v1 = vpop.permute.xlu0 %2662  ;;  %v3578_v29 = vld [vmem:[#allocation2 + $0x30] sm:$0x3]  ;;  %3750 = vmatpush.msra.mxu1 %v3727_v25  ;;  %v3238_v15 = vpop.f32.mrf.mxu3 }
0x3ee3   :  { %2666 = vst.msk [vmem:[#allocation2 + $0x32] sm:$0x3] %vm839_vm10, %v2663_v1  ;;  %3921 = vmatmul.msk.f32.vlgmr.msra.gmra.mxu0 %vm73_vm0, %v3578_v29  ;;  %3923 = vmatmul.msk.f32.vlgmr.msrb.gmra.mxu2 %vm73_vm0, %v3634_v33  ;;  %v3241_v48 = vadd.f32 %v3238_v15, %v3213_v17  ;;  %v3726_v33 = vld [vmem:[%s5240_s10 + $0x18] sm:$0xff] }
0x3ee4   :  { %3751 = vmatpush.msra.mxu1 %v3726_v33 }
0x3ee6   :  { %3752 = vmatpush.msra.mxu1 %v3725_v32 }
0x3ee8   :  { %3753 = vmatpush.msra.mxu1 %v3724_v27 }
0x3eea   :  { %v3606_v31 = vld [vmem:[#allocation2 + $0x32] sm:$0x3]  ;;  %v3322_v38 = vpop.f32.mrf.mxu2  ;;  %v3350_v20 = vpop.f32.mrf.mxu3 }
0x3eeb   :  { %3922 = vmatmul.msk.f32.vlgmr.msrb.gmra.mxu1 %vm73_vm0, %v3606_v31  ;;  %3925 = vmatmul.msk.f32.vlgmr.msrb.gmra.mxu0 %vm73_vm0, %v3691_v34 }
0x3ef2   :  { %v3434_v55 = vpop.f32.mrf.mxu2 }
0x3f13   :  { %v2809_v35 = vpop.permute.xlu2 %2808 }
0x3f14   :  { %2812 = vst.msk [vmem:[#allocation2 + $0x36] sm:$0x3] %vm839_vm10, %v2809_v35  ;;  %v3723_v35 = vld [vmem:[%s5240_s10] sm:$0xff] }
0x3f15   :  { %3754 = vmatpush.msra.mxu1 %v3723_v35 }
0x3f1b   :  { %v3662_v61 = vld [vmem:[#allocation2 + $0x36] sm:$0x3] }
0x3f1c   :  { %3924 = vmatmul.msk.f32.vlgmr.msra.gmra.mxu3 %vm73_vm0, %v3662_v61 }
0x3f29   :  { %v2815_v45 = vpop.permute.xlu1 %2814 }
0x3f2a   :  { %2817 = vst.msk [vmem:[%s5242_s12 + $0x1a] sm:$0x2] %vm845_vm5, %v2815_v45 }
0x3f31   :  { %v2821_v54 = vld [vmem:[%s5242_s12 + $0x18] sm:$0xf] }
0x3f32   :  { %v3896_v50 = vmul.f32 -1.442695, %v2821_v54 }
0x3f34   :  { %4120 = vpow2.f32 %v3896_v50 }
0x3f3a   :  { %v4121_v57 = vpop.eup %4120 }
0x3f3b   :  { %v2837_v58 = vadd.f32 1.0, %v4121_v57 }
0x3f3d   :  { %4122 = vrcp.f32 %v2837_v58  ;;  %v2894_v11 = vand.u32 2147483648, %v2837_v58  ;;  %v2892_v10 = vand.u32 2147483647, %v2837_v58  ;;  %vm2888_vm5 = vweird.f32 %v2837_v58 }
0x3f3f   :  { %v2895_v59 = vor.u32 1.1754944e-38, %v2894_v11  ;;  %vm2893_vm2 = vcmp.eq.f32.partialorder %v2892_v10, 8.507059e+37 }
0x3f40   :  { %v3266_v26 = vpop.f32.mrf.mxu0 }
0x3f41   :  { %v3269_v28 = vadd.f32 %v3266_v26, %v3241_v48 }
0x3f43   :  { %v4123_v42 = vpop.eup %4122 }
0x3f44   :  { %v2884_v0 = vmul.f32 %v4123_v42, %v2837_v58  ;;  %vm2889_vm0 = vweird.f32 %v4123_v42 }
0x3f45   :  { %vm2890_vm1 = vmor %vm2888_vm5, %vm2889_vm0 }
0x3f46   :  { %v2885_v5 = vsub.f32 1.0, %v2884_v0 }
0x3f48   :  { %v2886_v18 = vmul.f32 %v4123_v42, %v2885_v5  ;;  %v3294_v13 = vpop.f32.mrf.mxu1  ;;  %v3378_v44 = vpop.f32.mrf.mxu0 }
0x3f49   :  { %v3297_v9 = vadd.f32 %v3294_v13, %v3269_v28 }
0x3f4a   :  { %v2887_v30 = vadd.f32 %v4123_v42, %v2886_v18  ;;  %v3938_v18 = vld [vmem:[%s5239_s9] ss:$0 sm:$0xff]  ;;  %s4191_s9 = smov [#allocation6]  }
0x3f4b   :  { %v3325_v53 = vadd.f32 %v3322_v38, %v3297_v9  ;;  %s3769_s24 = sshll.u32 %s4191_s9, 4  ;;  %s3770_s24 = int_to_ptr.vmem [resolvable:$true] %s3769_s24 }
0x3f4c   :  { %v2891_v43 = vsel %vm2890_vm1, %v4123_v42, %v2887_v30 }
0x3f4d   :  { %v2896_v12 = vsel %vm2893_vm2, %v2895_v59, %v2891_v43  ;;  %v3353_v4 = vadd.f32 %v3350_v20, %v3325_v53  ;;  %v3939_v43 = vld [vmem:[%s5241_s11] ss:$0 sm:$0xff] }
0x3f4e   :  { %2902 = vst.msk [vmem:[%s5242_s12 + $0x18] sm:$0xf] %vm2901_vm15, %v2896_v12 }
0x3f4f   :  { %v3381_v1 = vadd.f32 %v3378_v44, %v3353_v4 }
0x3f50   :  { %v3406_v29 = vpop.f32.mrf.mxu1 }
0x3f51   :  { %v3409_v31 = vadd.f32 %v3406_v29, %v3381_v1  ;;  %v3490_v45 = vpop.f32.mrf.mxu0 }
0x3f53   :  { %v3437_v34 = vadd.f32 %v3434_v55, %v3409_v31 }
0x3f56   :  { %v3462_v37 = vpop.f32.mrf.mxu3 }
0x3f57   :  { %v3465_v61 = vadd.f32 %v3462_v37, %v3437_v34 }
0x3f58   :  { %v3518_v50 = vpop.f32.mrf.mxu1 }
0x3f59   :  { %v3493_v54 = vadd.f32 %v3490_v45, %v3465_v61 }
0x3f5b   :  { %v3521_v58 = vadd.f32 %v3518_v50, %v3493_v54 }
0x3f5e   :  { %v3546_v57 = vpop.f32.mrf.mxu2 }
0x3f5f   :  { %v3549_v42 = vadd.f32 %v3546_v57, %v3521_v58  ;;  %v3574_v52 = vpop.f32.mrf.mxu3 }
0x3f60   :  { %v3602_v0 = vpop.f32.mrf.mxu0 }
0x3f61   :  { %v3577_v5 = vadd.f32 %v3574_v52, %v3549_v42 }
0x3f63   :  { %v3605_v11 = vadd.f32 %v3602_v0, %v3577_v5 }
0x3f66   :  { %v3658_v36 = vpop.f32.mrf.mxu2 }
0x3f68   :  { %v3630_v41 = vpop.f32.mrf.mxu1  ;;  %v3718_v10 = vpop.f32.mrf.mxu0 }
0x3f69   :  { %v3633_v51 = vadd.f32 %v3630_v41, %v3605_v11  ;;  %v3719_v19 = vadd.f32 %v3938_v18, %v3718_v10 }
0x3f6b   :  { %v3661_v2 = vadd.f32 %v3658_v36, %v3633_v51  ;;  %v3721_v59 = vmax.f32 %v3719_v19, 0.0 }
0x3f9f   :  { %v3686_v30 = vpop.f32.mrf.mxu3 }
0x3fa0   :  { %v3689_v3 = vadd.f32 %v3686_v30, %v3661_v2 }
0x3fa2   :  { %v3690_v22 = vmax.f32 %v3689_v3, 0.0 }
0x3fa4   :  { %v3722_v24 = vadd.f32 %v3721_v59, %v3690_v22 }
0x3fa6   :  { %3926 = vmatmul.msk.f32.vlgmr.msra.gmra.mxu1 %vm3735_vm3, %v3722_v24 }
0x4023   :  { %v3756_v46 = vpop.f32.mrf.mxu1 }
0x4024   :  { %v3757_v12 = vadd.f32 %v3939_v43, %v3756_v46 }
0x4026   :  { %v3759_v25 = vmax.f32 %v3757_v12, 0.0 }
0x4028   :  { %4124 = vtanh.f32 %v3759_v25 }
0x402e   :  { %v4125_v8 = vpop.eup %4124 }
0x402f   :  { %3761 = vst.msk [vmem:[#allocation6] sm:$0x3] %vm839_vm10, %v4125_v8 }
0x4030   :  { %3774 = dma.vmem_to_hbm [thread:$0]  %s3770_s24, 32, %s3772_s5, [#allocation5]  }
0x4031   :  { %4182 = dma.done.wait [#allocation5], 32  }
0x4032   :  { %4183 = vsyncadd [#allocation5], 4294967264 }
0x4033   :  { %3781 = vsyncpa [#allocation4], 1 }
0x4034   :  { %3782 = vsyncpa [#allocation5], 1 }

</bundles_post_ra>
